<compile_context>
chip_gen: v7x
topology: tpu7x:2x2x1
jax: 0.10.0
libtpu: 0.0.40
codegen_flags: <defaults>
</compile_context>

<pallas_src>
import jax
import jax.numpy as jnp
from jax import lax
from jax.experimental import pallas as pl
from jax.experimental.pallas import tpu as pltpu

N_SWEEPS = 4                                    # cyclic Jacobi sweeps (4x4 converges in <=4)
_PIVOTS = ((0, 1), (0, 2), (0, 3), (1, 2), (1, 3), (2, 3))
_LANES = 128                                    # batch lives on the lane axis
_SUB = 8                                        # sublane rows per inner (8,128) chunk
_MAX_CHUNKS_PER_STEP = 8                        # up to 8*8*128 = 8192 batch elems / grid step


def _jacobi_smallest_eigvec(A):
    """A: 4x4 nested list of (rows, 128) f32 arrays (symmetric; batch on sublanes/lanes).
    Returns 4 arrays: components of the unit eigenvector of the smallest eigenvalue."""
    zero = jnp.zeros_like(A[0][0])
    one = jnp.ones_like(A[0][0])
    neg_one = -one
    theta_cap = jnp.full_like(zero, 1e18)       # keeps theta**2 finite in f32
    V = [[one if i == j else zero for j in range(4)] for i in range(4)]
    A = [[A[i][j] for j in range(4)] for i in range(4)]          # local working copy

    for _ in range(N_SWEEPS):
        for p, q in _PIVOTS:
            app, aqq, apq = A[p][p], A[q][q], A[p][q]
            nonzero = apq != zero
            apq_safe = jnp.where(nonzero, apq, one)
            # theta = (aqq - app) / (2*apq): EUP approx reciprocal instead of a VALU divide.
            theta = (aqq - app) * pl.reciprocal(apq_safe + apq_safe, approx=True)
            sgn = jnp.where(theta >= zero, one, neg_one)
            abs_theta = jnp.minimum(jnp.abs(theta), theta_cap)
            t = sgn * pl.reciprocal(abs_theta + jnp.sqrt(abs_theta * abs_theta + one),
                                    approx=True)
            t = jnp.where(nonzero, t, zero)                       # identity rotation if apq==0
            c = lax.rsqrt(t * t + one)                            # EUP rsqrt
            s = t * c
            cc, ss, cs = c * c, s * s, c * s
            cs_apq = cs * apq
            cs_apq2 = cs_apq + cs_apq
            # Full symmetric 2x2 update: robust to the approximate rotation angle (the
            # transform stays an exact similarity; an imperfect angle only slows convergence).
            new_pq = cs * (app - aqq) + (cc - ss) * apq
            A[p][p] = cc * app - cs_apq2 + ss * aqq
            A[q][q] = ss * app + cs_apq2 + cc * aqq
            A[p][q] = new_pq
            A[q][p] = new_pq
            for r in range(4):
                if r == p or r == q:
                    continue
                arp, arq = A[r][p], A[r][q]
                nrp = c * arp - s * arq
                nrq = s * arp + c * arq
                A[r][p] = nrp; A[p][r] = nrp
                A[r][q] = nrq; A[q][r] = nrq
            # V' = V G  (columns accumulate the eigenvectors)
            for r in range(4):
                vrp, vrq = V[r][p], V[r][q]
                V[r][p] = c * vrp - s * vrq
                V[r][q] = s * vrp + c * vrq

    d = [A[i][i] for i in range(4)]
    dmin = jnp.minimum(jnp.minimum(d[0], d[1]), jnp.minimum(d[2], d[3]))
    # Column of V whose diagonal entry is the minimum (lowest index wins ties), mirroring
    # torch.linalg.eigh's ascending order / column 0.
    vec = []
    for i in range(4):
        col = V[i][3]
        col = jnp.where(d[2] == dmin, V[i][2], col)
        col = jnp.where(d[1] == dmin, V[i][1], col)
        col = jnp.where(d[0] == dmin, V[i][0], col)
        vec.append(col)
    inv_norm = lax.rsqrt(vec[0] * vec[0] + vec[1] * vec[1]
                         + vec[2] * vec[2] + vec[3] * vec[3])
    return [v * inv_norm for v in vec]


def _make_pose_post_kernel(n_chunks, chunk_rows):
    """Kernel over one (17, n_chunks*chunk_rows, 128) tile; batch is lane-dense."""

    def kernel(x_ref, o_ref):
        o_dt = o_ref.dtype

        def body(ci, carry):
            r0 = pl.multiple_of(ci * chunk_rows, chunk_rows)
            rows = pl.ds(r0, chunk_rows)
            x = x_ref[:, rows, :].astype(jnp.float32)             # (17, chunk_rows, 128)
            # Pass-through / exp features first (their vregs die before the Jacobi loop).
            for i in range(3):
                o_ref[i, rows, :] = x[i].astype(o_dt)                      # translation
            for i in range(3):
                o_ref[3 + i, rows, :] = jnp.exp(x[3 + i]).astype(o_dt)     # positive scales
            o_ref[10, rows, :] = jnp.exp(x[16]).astype(o_dt)               # positive scalar
            # 10-D upper triangle -> 4x4 symmetric matrix; each entry is one (8,128) vreg.
            v = [x[6 + i] for i in range(10)]
            A = [[v[0], v[1], v[2], v[3]],
                 [v[1], v[4], v[5], v[6]],
                 [v[2], v[5], v[7], v[8]],
                 [v[3], v[6], v[8], v[9]]]
            quat = _jacobi_smallest_eigvec(A)
            for i in range(4):
                o_ref[6 + i, rows, :] = quat[i].astype(o_dt)
            return carry

        lax.fori_loop(0, n_chunks, body, 0, unroll=True)

    return kernel


def pose_post(edge_preds):
    """Pallas TPU implementation of PosePost.forward (single fused pallas_call).

    Returns (translation (B,3), exp(scale) (B,3), unit quaternion XYZW (B,4), exp(conf) (B,)).
    """
    B, F = edge_preds.shape
    assert F >= 17, "edge_preds needs at least 17 features"
    dt = edge_preds.dtype

    # ---- lane-dense layout: batch on lanes, features on the leading axis ----
    rows = -(-B // _LANES)                        # number of 128-wide batch rows
    chunk_rows = _SUB if rows >= _SUB else rows   # one (chunk_rows,128) chunk per feature
    n_chunks = min(_MAX_CHUNKS_PER_STEP, -(-rows // chunk_rows))
    rows_per_step = chunk_rows * n_chunks
    rows_pad = -(-rows // rows_per_step) * rows_per_step
    b_pad = rows_pad * _LANES

    xt = jnp.transpose(edge_preds[:, :17])                        # (17, B), original dtype
    xt = jnp.pad(xt, ((0, 0), (0, b_pad - B)))
    xt = xt.reshape(17, rows_pad, _LANES)

    grid = (rows_pad // rows_per_step,)
    cost = pl.CostEstimate(
        flops=int(b_pad) * N_SWEEPS * 6 * 60,
        transcendentals=int(b_pad) * (N_SWEEPS * 6 * 4 + 8),
        bytes_accessed=int(b_pad) * 28 * jnp.dtype(dt).itemsize,
    )

    packed = pl.pallas_call(
        _make_pose_post_kernel(n_chunks, chunk_rows),
        out_shape=jax.ShapeDtypeStruct((11, rows_pad, _LANES), dt),
        grid=grid,
        in_specs=[pl.BlockSpec((17, rows_per_step, _LANES), lambda i: (0, i, 0))],
        out_specs=pl.BlockSpec((11, rows_per_step, _LANES), lambda i: (0, i, 0)),
        compiler_params=pltpu.CompilerParams(dimension_semantics=("parallel",)),
        cost_estimate=cost,
    )(xt)

    flat = packed.reshape(11, b_pad)[:, :B]                        # (11, B)
    trans = jnp.transpose(flat[0:3])
    scale = jnp.transpose(flat[3:6])
    quat = jnp.transpose(flat[6:10])
    conf = flat[10]
    return trans, scale, quat, conf


if __name__ == "__main__":
    key = jax.random.PRNGKey(0)
    B = 8
    edge_preds = jax.random.normal(key, (B, 17), dtype=jnp.float32)

    fwd = jax.jit(pose_post)
    trans, scale, quat, conf = fwd(edge_preds)
    jax.block_until_ready((trans, scale, quat, conf))

    assert trans.shape == (B, 3) and scale.shape == (B, 3)
    assert quat.shape == (B, 4) and conf.shape == (B,)

    # --- light correctness checks against the reference semantics ---
    assert bool(jnp.allclose(trans, edge_preds[:, 0:3]))
    assert bool(jnp.allclose(scale, jnp.exp(edge_preds[:, 3:6]), rtol=1e-4, atol=1e-5))
    assert bool(jnp.allclose(conf, jnp.exp(edge_preds[:, 16]), rtol=1e-4, atol=1e-5))
    # quaternion must be the unit eigenvector of the smallest eigenvalue of the 4x4 sym matrix
    idx = jnp.array([[0, 1, 2, 3], [1, 4, 5, 6], [2, 5, 7, 8], [3, 6, 8, 9]])
    A = edge_preds[:, 6:16][:, idx]                                   # (B, 4, 4)
    lam = jnp.einsum("bi,bij,bj->b", quat, A, quat)                   # Rayleigh quotient
    resid = jnp.einsum("bij,bj->bi", A, quat) - lam[:, None] * quat
    assert bool(jnp.allclose(jnp.sum(quat * quat, axis=-1), 1.0, atol=1e-5))
    assert float(jnp.max(jnp.abs(resid))) < 1e-3                      # it is an eigenpair
    assert float(jnp.max(jnp.abs(lam - jnp.linalg.eigvalsh(A)[:, 0]))) < 1e-3  # the smallest

    print("KERNEL_OK")
</pallas_src>

<mosaic_0001>
module attributes {stable_mosaic.version = 11 : i64} {
  func.func @kernel(%arg0: i32, %arg1: memref<17x1x128xf32, #tpu.memory_space<vmem>>, %arg2: memref<11x1x128xf32, #tpu.memory_space<vmem>>) attributes {dimension_semantics = [#tpu.dimension_semantics<parallel>], iteration_bounds = array<i64: 1>, scalar_prefetch = 0 : i64, scratch_operands = 0 : i64, tpu.core_type = #tpu.core_type<tc>, window_params = [{transform_indices = @transform_0, window_bounds = array<i64: 17, 1, 128>}, {transform_indices = @transform_1, window_bounds = array<i64: 11, 1, 128>}]} {
    %c0_i32 = arith.constant 0 : i32
    %c1_i32 = arith.constant 1 : i32
    %0 = arith.muli %c0_i32, %c1_i32 : i32
    %1 = tpu.assume_multiple %0, 1 : i32
    %c0 = arith.constant 0 : index
    %2 = arith.index_cast %1 : i32 to index
    %c0_0 = arith.constant 0 : index
    %3 = vector.load %arg1[%c0, %2, %c0_0] : memref<17x1x128xf32, #tpu.memory_space<vmem>>, vector<17x1x128xf32>
    %4 = vector.extract_strided_slice %3 {offsets = [0, 0, 0], sizes = [1, 1, 128], strides = [1, 1, 1]} : vector<17x1x128xf32> to vector<1x1x128xf32>
    %5 = vector.shape_cast %4 : vector<1x1x128xf32> to vector<1x128xf32>
    %c0_1 = arith.constant 0 : index
    %6 = arith.index_cast %1 : i32 to index
    %c0_2 = arith.constant 0 : index
    %7 = vector.load %arg2[%c0_1, %6, %c0_2] : memref<11x1x128xf32, #tpu.memory_space<vmem>>, vector<1x1x128xf32>
    %8 = vector.shape_cast %7 : vector<1x1x128xf32> to vector<1x128xf32>
    %9 = vector.shape_cast %5 : vector<1x128xf32> to vector<1x1x128xf32>
    tpu.vector_store %arg2[%c0_1, %6, %c0_2], %9 {strides = array<i32>} : memref<11x1x128xf32, #tpu.memory_space<vmem>>, vector<1x1x128xf32>,
    %10 = vector.extract_strided_slice %3 {offsets = [1, 0, 0], sizes = [1, 1, 128], strides = [1, 1, 1]} : vector<17x1x128xf32> to vector<1x1x128xf32>
    %11 = vector.shape_cast %10 : vector<1x1x128xf32> to vector<1x128xf32>
    %c1 = arith.constant 1 : index
    %12 = arith.index_cast %1 : i32 to index
    %c0_3 = arith.constant 0 : index
    %13 = vector.load %arg2[%c1, %12, %c0_3] : memref<11x1x128xf32, #tpu.memory_space<vmem>>, vector<1x1x128xf32>
    %14 = vector.shape_cast %13 : vector<1x1x128xf32> to vector<1x128xf32>
    %15 = vector.shape_cast %11 : vector<1x128xf32> to vector<1x1x128xf32>
    tpu.vector_store %arg2[%c1, %12, %c0_3], %15 {strides = array<i32>} : memref<11x1x128xf32, #tpu.memory_space<vmem>>, vector<1x1x128xf32>,
    %16 = vector.extract_strided_slice %3 {offsets = [2, 0, 0], sizes = [1, 1, 128], strides = [1, 1, 1]} : vector<17x1x128xf32> to vector<1x1x128xf32>
    %17 = vector.shape_cast %16 : vector<1x1x128xf32> to vector<1x128xf32>
    %c2 = arith.constant 2 : index
    %18 = arith.index_cast %1 : i32 to index
    %c0_4 = arith.constant 0 : index
    %19 = vector.load %arg2[%c2, %18, %c0_4] : memref<11x1x128xf32, #tpu.memory_space<vmem>>, vector<1x1x128xf32>
    %20 = vector.shape_cast %19 : vector<1x1x128xf32> to vector<1x128xf32>
    %21 = vector.shape_cast %17 : vector<1x128xf32> to vector<1x1x128xf32>
    tpu.vector_store %arg2[%c2, %18, %c0_4], %21 {strides = array<i32>} : memref<11x1x128xf32, #tpu.memory_space<vmem>>, vector<1x1x128xf32>,
    %22 = vector.extract_strided_slice %3 {offsets = [3, 0, 0], sizes = [1, 1, 128], strides = [1, 1, 1]} : vector<17x1x128xf32> to vector<1x1x128xf32>
    %23 = vector.shape_cast %22 : vector<1x1x128xf32> to vector<1x128xf32>
    %24 = math.exp %23 : vector<1x128xf32>
    %c3 = arith.constant 3 : index
    %25 = arith.index_cast %1 : i32 to index
    %c0_5 = arith.constant 0 : index
    %26 = vector.load %arg2[%c3, %25, %c0_5] : memref<11x1x128xf32, #tpu.memory_space<vmem>>, vector<1x1x128xf32>
    %27 = vector.shape_cast %26 : vector<1x1x128xf32> to vector<1x128xf32>
    %28 = vector.shape_cast %24 : vector<1x128xf32> to vector<1x1x128xf32>
    tpu.vector_store %arg2[%c3, %25, %c0_5], %28 {strides = array<i32>} : memref<11x1x128xf32, #tpu.memory_space<vmem>>, vector<1x1x128xf32>,
    %29 = vector.extract_strided_slice %3 {offsets = [4, 0, 0], sizes = [1, 1, 128], strides = [1, 1, 1]} : vector<17x1x128xf32> to vector<1x1x128xf32>
    %30 = vector.shape_cast %29 : vector<1x1x128xf32> to vector<1x128xf32>
    %31 = math.exp %30 : vector<1x128xf32>
    %c4 = arith.constant 4 : index
    %32 = arith.index_cast %1 : i32 to index
    %c0_6 = arith.constant 0 : index
    %33 = vector.load %arg2[%c4, %32, %c0_6] : memref<11x1x128xf32, #tpu.memory_space<vmem>>, vector<1x1x128xf32>
    %34 = vector.shape_cast %33 : vector<1x1x128xf32> to vector<1x128xf32>
    %35 = vector.shape_cast %31 : vector<1x128xf32> to vector<1x1x128xf32>
    tpu.vector_store %arg2[%c4, %32, %c0_6], %35 {strides = array<i32>} : memref<11x1x128xf32, #tpu.memory_space<vmem>>, vector<1x1x128xf32>,
    %36 = vector.extract_strided_slice %3 {offsets = [5, 0, 0], sizes = [1, 1, 128], strides = [1, 1, 1]} : vector<17x1x128xf32> to vector<1x1x128xf32>
    %37 = vector.shape_cast %36 : vector<1x1x128xf32> to vector<1x128xf32>
    %38 = math.exp %37 : vector<1x128xf32>
    %c5 = arith.constant 5 : index
    %39 = arith.index_cast %1 : i32 to index
    %c0_7 = arith.constant 0 : index
    %40 = vector.load %arg2[%c5, %39, %c0_7] : memref<11x1x128xf32, #tpu.memory_space<vmem>>, vector<1x1x128xf32>
    %41 = vector.shape_cast %40 : vector<1x1x128xf32> to vector<1x128xf32>
    %42 = vector.shape_cast %38 : vector<1x128xf32> to vector<1x1x128xf32>
    tpu.vector_store %arg2[%c5, %39, %c0_7], %42 {strides = array<i32>} : memref<11x1x128xf32, #tpu.memory_space<vmem>>, vector<1x1x128xf32>,
    %43 = vector.extract_strided_slice %3 {offsets = [16, 0, 0], sizes = [1, 1, 128], strides = [1, 1, 1]} : vector<17x1x128xf32> to vector<1x1x128xf32>
    %44 = vector.shape_cast %43 : vector<1x1x128xf32> to vector<1x128xf32>
    %45 = math.exp %44 : vector<1x128xf32>
    %c10 = arith.constant 10 : index
    %46 = arith.index_cast %1 : i32 to index
    %c0_8 = arith.constant 0 : index
    %47 = vector.load %arg2[%c10, %46, %c0_8] : memref<11x1x128xf32, #tpu.memory_space<vmem>>, vector<1x1x128xf32>
    %48 = vector.shape_cast %47 : vector<1x1x128xf32> to vector<1x128xf32>
    %49 = vector.shape_cast %45 : vector<1x128xf32> to vector<1x1x128xf32>
    tpu.vector_store %arg2[%c10, %46, %c0_8], %49 {strides = array<i32>} : memref<11x1x128xf32, #tpu.memory_space<vmem>>, vector<1x1x128xf32>,
    %50 = vector.extract_strided_slice %3 {offsets = [6, 0, 0], sizes = [1, 1, 128], strides = [1, 1, 1]} : vector<17x1x128xf32> to vector<1x1x128xf32>
    %51 = vector.shape_cast %50 : vector<1x1x128xf32> to vector<1x128xf32>
    %52 = vector.extract_strided_slice %3 {offsets = [7, 0, 0], sizes = [1, 1, 128], strides = [1, 1, 1]} : vector<17x1x128xf32> to vector<1x1x128xf32>
    %53 = vector.shape_cast %52 : vector<1x1x128xf32> to vector<1x128xf32>
    %54 = vector.extract_strided_slice %3 {offsets = [8, 0, 0], sizes = [1, 1, 128], strides = [1, 1, 1]} : vector<17x1x128xf32> to vector<1x1x128xf32>
    %55 = vector.shape_cast %54 : vector<1x1x128xf32> to vector<1x128xf32>
    %56 = vector.extract_strided_slice %3 {offsets = [9, 0, 0], sizes = [1, 1, 128], strides = [1, 1, 1]} : vector<17x1x128xf32> to vector<1x1x128xf32>
    %57 = vector.shape_cast %56 : vector<1x1x128xf32> to vector<1x128xf32>
    %58 = vector.extract_strided_slice %3 {offsets = [10, 0, 0], sizes = [1, 1, 128], strides = [1, 1, 1]} : vector<17x1x128xf32> to vector<1x1x128xf32>
    %59 = vector.shape_cast %58 : vector<1x1x128xf32> to vector<1x128xf32>
    %60 = vector.extract_strided_slice %3 {offsets = [11, 0, 0], sizes = [1, 1, 128], strides = [1, 1, 1]} : vector<17x1x128xf32> to vector<1x1x128xf32>
    %61 = vector.shape_cast %60 : vector<1x1x128xf32> to vector<1x128xf32>
    %62 = vector.extract_strided_slice %3 {offsets = [12, 0, 0], sizes = [1, 1, 128], strides = [1, 1, 1]} : vector<17x1x128xf32> to vector<1x1x128xf32>
    %63 = vector.shape_cast %62 : vector<1x1x128xf32> to vector<1x128xf32>
    %64 = vector.extract_strided_slice %3 {offsets = [13, 0, 0], sizes = [1, 1, 128], strides = [1, 1, 1]} : vector<17x1x128xf32> to vector<1x1x128xf32>
    %65 = vector.shape_cast %64 : vector<1x1x128xf32> to vector<1x128xf32>
    %66 = vector.extract_strided_slice %3 {offsets = [14, 0, 0], sizes = [1, 1, 128], strides = [1, 1, 1]} : vector<17x1x128xf32> to vector<1x1x128xf32>
    %67 = vector.shape_cast %66 : vector<1x1x128xf32> to vector<1x128xf32>
    %68 = vector.extract_strided_slice %3 {offsets = [15, 0, 0], sizes = [1, 1, 128], strides = [1, 1, 1]} : vector<17x1x128xf32> to vector<1x1x128xf32>
    %69 = vector.shape_cast %68 : vector<1x1x128xf32> to vector<1x128xf32>
    %cst = arith.constant 0.000000e+00 : f32
    %70 = vector.broadcast %cst : f32 to vector<1x128xf32>
    %cst_9 = arith.constant 1.000000e+00 : f32
    %71 = vector.broadcast %cst_9 : f32 to vector<1x128xf32>
    %cst_10 = arith.constant 0.000000e+00 : f32
    %72 = vector.broadcast %cst_10 : f32 to vector<1x128xf32>
    %73 = arith.subf %72, %71 : vector<1x128xf32>
    %cst_11 = arith.constant 9.99999984E+17 : f32
    %74 = vector.broadcast %cst_11 : f32 to vector<1x128xf32>
    %75 = arith.cmpf one, %53, %70 : vector<1x128xf32>
    %76 = arith.select %75, %53, %71 : vector<1x128xi1>, vector<1x128xf32>
    %77 = arith.subf %59, %51 : vector<1x128xf32>
    %78 = arith.addf %76, %76 : vector<1x128xf32>
    %79 = tpu.reciprocal %78 {approx = true} : vector<1x128xf32> -> vector<1x128xf32>
    %80 = arith.mulf %77, %79 : vector<1x128xf32>
    %81 = arith.cmpf oge, %80, %70 : vector<1x128xf32>
    %82 = arith.select %81, %71, %73 : vector<1x128xi1>, vector<1x128xf32>
    %83 = math.absf %80 : vector<1x128xf32>
    %84 = arith.minimumf %83, %74 : vector<1x128xf32>
    %85 = arith.mulf %84, %84 : vector<1x128xf32>
    %86 = arith.addf %85, %71 : vector<1x128xf32>
    %87 = math.sqrt %86 : vector<1x128xf32>
    %88 = arith.addf %84, %87 : vector<1x128xf32>
    %89 = tpu.reciprocal %88 {approx = true} : vector<1x128xf32> -> vector<1x128xf32>
    %90 = arith.mulf %82, %89 : vector<1x128xf32>
    %91 = arith.select %75, %90, %70 : vector<1x128xi1>, vector<1x128xf32>
    %92 = arith.mulf %91, %91 : vector<1x128xf32>
    %93 = arith.addf %92, %71 : vector<1x128xf32>
    %94 = math.rsqrt %93 : vector<1x128xf32>
    %95 = arith.mulf %91, %94 : vector<1x128xf32>
    %96 = arith.mulf %94, %94 : vector<1x128xf32>
    %97 = arith.mulf %95, %95 : vector<1x128xf32>
    %98 = arith.mulf %94, %95 : vector<1x128xf32>
    %99 = arith.mulf %98, %53 : vector<1x128xf32>
    %100 = arith.addf %99, %99 : vector<1x128xf32>
    %101 = arith.subf %51, %59 : vector<1x128xf32>
    %102 = arith.mulf %98, %101 : vector<1x128xf32>
    %103 = arith.subf %96, %97 : vector<1x128xf32>
    %104 = arith.mulf %103, %53 : vector<1x128xf32>
    %105 = arith.addf %102, %104 : vector<1x128xf32>
    %106 = arith.mulf %96, %51 : vector<1x128xf32>
    %107 = arith.subf %106, %100 : vector<1x128xf32>
    %108 = arith.mulf %97, %59 : vector<1x128xf32>
    %109 = arith.addf %107, %108 : vector<1x128xf32>
    %110 = arith.mulf %97, %51 : vector<1x128xf32>
    %111 = arith.addf %110, %100 : vector<1x128xf32>
    %112 = arith.mulf %96, %59 : vector<1x128xf32>
    %113 = arith.addf %111, %112 : vector<1x128xf32>
    %114 = arith.mulf %94, %55 : vector<1x128xf32>
    %115 = arith.mulf %95, %61 : vector<1x128xf32>
    %116 = arith.subf %114, %115 : vector<1x128xf32>
    %117 = arith.mulf %95, %55 : vector<1x128xf32>
    %118 = arith.mulf %94, %61 : vector<1x128xf32>
    %119 = arith.addf %117, %118 : vector<1x128xf32>
    %120 = arith.mulf %94, %57 : vector<1x128xf32>
    %121 = arith.mulf %95, %63 : vector<1x128xf32>
    %122 = arith.subf %120, %121 : vector<1x128xf32>
    %123 = arith.mulf %95, %57 : vector<1x128xf32>
    %124 = arith.mulf %94, %63 : vector<1x128xf32>
    %125 = arith.addf %123, %124 : vector<1x128xf32>
    %126 = arith.mulf %94, %71 : vector<1x128xf32>
    %127 = arith.mulf %95, %70 : vector<1x128xf32>
    %128 = arith.subf %126, %127 : vector<1x128xf32>
    %129 = arith.mulf %95, %71 : vector<1x128xf32>
    %130 = arith.mulf %94, %70 : vector<1x128xf32>
    %131 = arith.addf %129, %130 : vector<1x128xf32>
    %132 = arith.mulf %94, %70 : vector<1x128xf32>
    %133 = arith.mulf %95, %71 : vector<1x128xf32>
    %134 = arith.subf %132, %133 : vector<1x128xf32>
    %135 = arith.mulf %95, %70 : vector<1x128xf32>
    %136 = arith.mulf %94, %71 : vector<1x128xf32>
    %137 = arith.addf %135, %136 : vector<1x128xf32>
    %138 = arith.mulf %94, %70 : vector<1x128xf32>
    %139 = arith.mulf %95, %70 : vector<1x128xf32>
    %140 = arith.subf %138, %139 : vector<1x128xf32>
    %141 = arith.mulf %95, %70 : vector<1x128xf32>
    %142 = arith.mulf %94, %70 : vector<1x128xf32>
    %143 = arith.addf %141, %142 : vector<1x128xf32>
    %144 = arith.mulf %94, %70 : vector<1x128xf32>
    %145 = arith.mulf %95, %70 : vector<1x128xf32>
    %146 = arith.subf %144, %145 : vector<1x128xf32>
    %147 = arith.mulf %95, %70 : vector<1x128xf32>
    %148 = arith.mulf %94, %70 : vector<1x128xf32>
    %149 = arith.addf %147, %148 : vector<1x128xf32>
    %150 = arith.cmpf one, %116, %70 : vector<1x128xf32>
    %151 = arith.select %150, %116, %71 : vector<1x128xi1>, vector<1x128xf32>
    %152 = arith.subf %65, %109 : vector<1x128xf32>
    %153 = arith.addf %151, %151 : vector<1x128xf32>
    %154 = tpu.reciprocal %153 {approx = true} : vector<1x128xf32> -> vector<1x128xf32>
    %155 = arith.mulf %152, %154 : vector<1x128xf32>
    %156 = arith.cmpf oge, %155, %70 : vector<1x128xf32>
    %157 = arith.select %156, %71, %73 : vector<1x128xi1>, vector<1x128xf32>
    %158 = math.absf %155 : vector<1x128xf32>
    %159 = arith.minimumf %158, %74 : vector<1x128xf32>
    %160 = arith.mulf %159, %159 : vector<1x128xf32>
    %161 = arith.addf %160, %71 : vector<1x128xf32>
    %162 = math.sqrt %161 : vector<1x128xf32>
    %163 = arith.addf %159, %162 : vector<1x128xf32>
    %164 = tpu.reciprocal %163 {approx = true} : vector<1x128xf32> -> vector<1x128xf32>
    %165 = arith.mulf %157, %164 : vector<1x128xf32>
    %166 = arith.select %150, %165, %70 : vector<1x128xi1>, vector<1x128xf32>
    %167 = arith.mulf %166, %166 : vector<1x128xf32>
    %168 = arith.addf %167, %71 : vector<1x128xf32>
    %169 = math.rsqrt %168 : vector<1x128xf32>
    %170 = arith.mulf %166, %169 : vector<1x128xf32>
    %171 = arith.mulf %169, %169 : vector<1x128xf32>
    %172 = arith.mulf %170, %170 : vector<1x128xf32>
    %173 = arith.mulf %169, %170 : vector<1x128xf32>
    %174 = arith.mulf %173, %116 : vector<1x128xf32>
    %175 = arith.addf %174, %174 : vector<1x128xf32>
    %176 = arith.subf %109, %65 : vector<1x128xf32>
    %177 = arith.mulf %173, %176 : vector<1x128xf32>
    %178 = arith.subf %171, %172 : vector<1x128xf32>
    %179 = arith.mulf %178, %116 : vector<1x128xf32>
    %180 = arith.addf %177, %179 : vector<1x128xf32>
    %181 = arith.mulf %171, %109 : vector<1x128xf32>
    %182 = arith.subf %181, %175 : vector<1x128xf32>
    %183 = arith.mulf %172, %65 : vector<1x128xf32>
    %184 = arith.addf %182, %183 : vector<1x128xf32>
    %185 = arith.mulf %172, %109 : vector<1x128xf32>
    %186 = arith.addf %185, %175 : vector<1x128xf32>
    %187 = arith.mulf %171, %65 : vector<1x128xf32>
    %188 = arith.addf %186, %187 : vector<1x128xf32>
    %189 = arith.mulf %169, %105 : vector<1x128xf32>
    %190 = arith.mulf %170, %119 : vector<1x128xf32>
    %191 = arith.subf %189, %190 : vector<1x128xf32>
    %192 = arith.mulf %170, %105 : vector<1x128xf32>
    %193 = arith.mulf %169, %119 : vector<1x128xf32>
    %194 = arith.addf %192, %193 : vector<1x128xf32>
    %195 = arith.mulf %169, %122 : vector<1x128xf32>
    %196 = arith.mulf %170, %67 : vector<1x128xf32>
    %197 = arith.subf %195, %196 : vector<1x128xf32>
    %198 = arith.mulf %170, %122 : vector<1x128xf32>
    %199 = arith.mulf %169, %67 : vector<1x128xf32>
    %200 = arith.addf %198, %199 : vector<1x128xf32>
    %201 = arith.mulf %169, %128 : vector<1x128xf32>
    %202 = arith.mulf %170, %70 : vector<1x128xf32>
    %203 = arith.subf %201, %202 : vector<1x128xf32>
    %204 = arith.mulf %170, %128 : vector<1x128xf32>
    %205 = arith.mulf %169, %70 : vector<1x128xf32>
    %206 = arith.addf %204, %205 : vector<1x128xf32>
    %207 = arith.mulf %169, %134 : vector<1x128xf32>
    %208 = arith.mulf %170, %70 : vector<1x128xf32>
    %209 = arith.subf %207, %208 : vector<1x128xf32>
    %210 = arith.mulf %170, %134 : vector<1x128xf32>
    %211 = arith.mulf %169, %70 : vector<1x128xf32>
    %212 = arith.addf %210, %211 : vector<1x128xf32>
    %213 = arith.mulf %169, %140 : vector<1x128xf32>
    %214 = arith.mulf %170, %71 : vector<1x128xf32>
    %215 = arith.subf %213, %214 : vector<1x128xf32>
    %216 = arith.mulf %170, %140 : vector<1x128xf32>
    %217 = arith.mulf %169, %71 : vector<1x128xf32>
    %218 = arith.addf %216, %217 : vector<1x128xf32>
    %219 = arith.mulf %169, %146 : vector<1x128xf32>
    %220 = arith.mulf %170, %70 : vector<1x128xf32>
    %221 = arith.subf %219, %220 : vector<1x128xf32>
    %222 = arith.mulf %170, %146 : vector<1x128xf32>
    %223 = arith.mulf %169, %70 : vector<1x128xf32>
    %224 = arith.addf %222, %223 : vector<1x128xf32>
    %225 = arith.cmpf one, %197, %70 : vector<1x128xf32>
    %226 = arith.select %225, %197, %71 : vector<1x128xi1>, vector<1x128xf32>
    %227 = arith.subf %69, %184 : vector<1x128xf32>
    %228 = arith.addf %226, %226 : vector<1x128xf32>
    %229 = tpu.reciprocal %228 {approx = true} : vector<1x128xf32> -> vector<1x128xf32>
    %230 = arith.mulf %227, %229 : vector<1x128xf32>
    %231 = arith.cmpf oge, %230, %70 : vector<1x128xf32>
    %232 = arith.select %231, %71, %73 : vector<1x128xi1>, vector<1x128xf32>
    %233 = math.absf %230 : vector<1x128xf32>
    %234 = arith.minimumf %233, %74 : vector<1x128xf32>
    %235 = arith.mulf %234, %234 : vector<1x128xf32>
    %236 = arith.addf %235, %71 : vector<1x128xf32>
    %237 = math.sqrt %236 : vector<1x128xf32>
    %238 = arith.addf %234, %237 : vector<1x128xf32>
    %239 = tpu.reciprocal %238 {approx = true} : vector<1x128xf32> -> vector<1x128xf32>
    %240 = arith.mulf %232, %239 : vector<1x128xf32>
    %241 = arith.select %225, %240, %70 : vector<1x128xi1>, vector<1x128xf32>
    %242 = arith.mulf %241, %241 : vector<1x128xf32>
    %243 = arith.addf %242, %71 : vector<1x128xf32>
    %244 = math.rsqrt %243 : vector<1x128xf32>
    %245 = arith.mulf %241, %244 : vector<1x128xf32>
    %246 = arith.mulf %244, %244 : vector<1x128xf32>
    %247 = arith.mulf %245, %245 : vector<1x128xf32>
    %248 = arith.mulf %244, %245 : vector<1x128xf32>
    %249 = arith.mulf %248, %197 : vector<1x128xf32>
    %250 = arith.addf %249, %249 : vector<1x128xf32>
    %251 = arith.subf %184, %69 : vector<1x128xf32>
    %252 = arith.mulf %248, %251 : vector<1x128xf32>
    %253 = arith.subf %246, %247 : vector<1x128xf32>
    %254 = arith.mulf %253, %197 : vector<1x128xf32>
    %255 = arith.addf %252, %254 : vector<1x128xf32>
    %256 = arith.mulf %246, %184 : vector<1x128xf32>
    %257 = arith.subf %256, %250 : vector<1x128xf32>
    %258 = arith.mulf %247, %69 : vector<1x128xf32>
    %259 = arith.addf %257, %258 : vector<1x128xf32>
    %260 = arith.mulf %247, %184 : vector<1x128xf32>
    %261 = arith.addf %260, %250 : vector<1x128xf32>
    %262 = arith.mulf %246, %69 : vector<1x128xf32>
    %263 = arith.addf %261, %262 : vector<1x128xf32>
    %264 = arith.mulf %244, %191 : vector<1x128xf32>
    %265 = arith.mulf %245, %125 : vector<1x128xf32>
    %266 = arith.subf %264, %265 : vector<1x128xf32>
    %267 = arith.mulf %245, %191 : vector<1x128xf32>
    %268 = arith.mulf %244, %125 : vector<1x128xf32>
    %269 = arith.addf %267, %268 : vector<1x128xf32>
    %270 = arith.mulf %244, %180 : vector<1x128xf32>
    %271 = arith.mulf %245, %200 : vector<1x128xf32>
    %272 = arith.subf %270, %271 : vector<1x128xf32>
    %273 = arith.mulf %245, %180 : vector<1x128xf32>
    %274 = arith.mulf %244, %200 : vector<1x128xf32>
    %275 = arith.addf %273, %274 : vector<1x128xf32>
    %276 = arith.mulf %244, %203 : vector<1x128xf32>
    %277 = arith.mulf %245, %70 : vector<1x128xf32>
    %278 = arith.subf %276, %277 : vector<1x128xf32>
    %279 = arith.mulf %245, %203 : vector<1x128xf32>
    %280 = arith.mulf %244, %70 : vector<1x128xf32>
    %281 = arith.addf %279, %280 : vector<1x128xf32>
    %282 = arith.mulf %244, %209 : vector<1x128xf32>
    %283 = arith.mulf %245, %70 : vector<1x128xf32>
    %284 = arith.subf %282, %283 : vector<1x128xf32>
    %285 = arith.mulf %245, %209 : vector<1x128xf32>
    %286 = arith.mulf %244, %70 : vector<1x128xf32>
    %287 = arith.addf %285, %286 : vector<1x128xf32>
    %288 = arith.mulf %244, %215 : vector<1x128xf32>
    %289 = arith.mulf %245, %70 : vector<1x128xf32>
    %290 = arith.subf %288, %289 : vector<1x128xf32>
    %291 = arith.mulf %245, %215 : vector<1x128xf32>
    %292 = arith.mulf %244, %70 : vector<1x128xf32>
    %293 = arith.addf %291, %292 : vector<1x128xf32>
    %294 = arith.mulf %244, %221 : vector<1x128xf32>
    %295 = arith.mulf %245, %71 : vector<1x128xf32>
    %296 = arith.subf %294, %295 : vector<1x128xf32>
    %297 = arith.mulf %245, %221 : vector<1x128xf32>
    %298 = arith.mulf %244, %71 : vector<1x128xf32>
    %299 = arith.addf %297, %298 : vector<1x128xf32>
    %300 = arith.cmpf one, %194, %70 : vector<1x128xf32>
    %301 = arith.select %300, %194, %71 : vector<1x128xi1>, vector<1x128xf32>
    %302 = arith.subf %188, %113 : vector<1x128xf32>
    %303 = arith.addf %301, %301 : vector<1x128xf32>
    %304 = tpu.reciprocal %303 {approx = true} : vector<1x128xf32> -> vector<1x128xf32>
    %305 = arith.mulf %302, %304 : vector<1x128xf32>
    %306 = arith.cmpf oge, %305, %70 : vector<1x128xf32>
    %307 = arith.select %306, %71, %73 : vector<1x128xi1>, vector<1x128xf32>
    %308 = math.absf %305 : vector<1x128xf32>
    %309 = arith.minimumf %308, %74 : vector<1x128xf32>
    %310 = arith.mulf %309, %309 : vector<1x128xf32>
    %311 = arith.addf %310, %71 : vector<1x128xf32>
    %312 = math.sqrt %311 : vector<1x128xf32>
    %313 = arith.addf %309, %312 : vector<1x128xf32>
    %314 = tpu.reciprocal %313 {approx = true} : vector<1x128xf32> -> vector<1x128xf32>
    %315 = arith.mulf %307, %314 : vector<1x128xf32>
    %316 = arith.select %300, %315, %70 : vector<1x128xi1>, vector<1x128xf32>
    %317 = arith.mulf %316, %316 : vector<1x128xf32>
    %318 = arith.addf %317, %71 : vector<1x128xf32>
    %319 = math.rsqrt %318 : vector<1x128xf32>
    %320 = arith.mulf %316, %319 : vector<1x128xf32>
    %321 = arith.mulf %319, %319 : vector<1x128xf32>
    %322 = arith.mulf %320, %320 : vector<1x128xf32>
    %323 = arith.mulf %319, %320 : vector<1x128xf32>
    %324 = arith.mulf %323, %194 : vector<1x128xf32>
    %325 = arith.addf %324, %324 : vector<1x128xf32>
    %326 = arith.subf %113, %188 : vector<1x128xf32>
    %327 = arith.mulf %323, %326 : vector<1x128xf32>
    %328 = arith.subf %321, %322 : vector<1x128xf32>
    %329 = arith.mulf %328, %194 : vector<1x128xf32>
    %330 = arith.addf %327, %329 : vector<1x128xf32>
    %331 = arith.mulf %321, %113 : vector<1x128xf32>
    %332 = arith.subf %331, %325 : vector<1x128xf32>
    %333 = arith.mulf %322, %188 : vector<1x128xf32>
    %334 = arith.addf %332, %333 : vector<1x128xf32>
    %335 = arith.mulf %322, %113 : vector<1x128xf32>
    %336 = arith.addf %335, %325 : vector<1x128xf32>
    %337 = arith.mulf %321, %188 : vector<1x128xf32>
    %338 = arith.addf %336, %337 : vector<1x128xf32>
    %339 = arith.mulf %319, %266 : vector<1x128xf32>
    %340 = arith.mulf %320, %272 : vector<1x128xf32>
    %341 = arith.subf %339, %340 : vector<1x128xf32>
    %342 = arith.mulf %320, %266 : vector<1x128xf32>
    %343 = arith.mulf %319, %272 : vector<1x128xf32>
    %344 = arith.addf %342, %343 : vector<1x128xf32>
    %345 = arith.mulf %319, %269 : vector<1x128xf32>
    %346 = arith.mulf %320, %275 : vector<1x128xf32>
    %347 = arith.subf %345, %346 : vector<1x128xf32>
    %348 = arith.mulf %320, %269 : vector<1x128xf32>
    %349 = arith.mulf %319, %275 : vector<1x128xf32>
    %350 = arith.addf %348, %349 : vector<1x128xf32>
    %351 = arith.mulf %319, %131 : vector<1x128xf32>
    %352 = arith.mulf %320, %206 : vector<1x128xf32>
    %353 = arith.subf %351, %352 : vector<1x128xf32>
    %354 = arith.mulf %320, %131 : vector<1x128xf32>
    %355 = arith.mulf %319, %206 : vector<1x128xf32>
    %356 = arith.addf %354, %355 : vector<1x128xf32>
    %357 = arith.mulf %319, %137 : vector<1x128xf32>
    %358 = arith.mulf %320, %212 : vector<1x128xf32>
    %359 = arith.subf %357, %358 : vector<1x128xf32>
    %360 = arith.mulf %320, %137 : vector<1x128xf32>
    %361 = arith.mulf %319, %212 : vector<1x128xf32>
    %362 = arith.addf %360, %361 : vector<1x128xf32>
    %363 = arith.mulf %319, %143 : vector<1x128xf32>
    %364 = arith.mulf %320, %218 : vector<1x128xf32>
    %365 = arith.subf %363, %364 : vector<1x128xf32>
    %366 = arith.mulf %320, %143 : vector<1x128xf32>
    %367 = arith.mulf %319, %218 : vector<1x128xf32>
    %368 = arith.addf %366, %367 : vector<1x128xf32>
    %369 = arith.mulf %319, %149 : vector<1x128xf32>
    %370 = arith.mulf %320, %224 : vector<1x128xf32>
    %371 = arith.subf %369, %370 : vector<1x128xf32>
    %372 = arith.mulf %320, %149 : vector<1x128xf32>
    %373 = arith.mulf %319, %224 : vector<1x128xf32>
    %374 = arith.addf %372, %373 : vector<1x128xf32>
    %375 = arith.cmpf one, %347, %70 : vector<1x128xf32>
    %376 = arith.select %375, %347, %71 : vector<1x128xi1>, vector<1x128xf32>
    %377 = arith.subf %263, %334 : vector<1x128xf32>
    %378 = arith.addf %376, %376 : vector<1x128xf32>
    %379 = tpu.reciprocal %378 {approx = true} : vector<1x128xf32> -> vector<1x128xf32>
    %380 = arith.mulf %377, %379 : vector<1x128xf32>
    %381 = arith.cmpf oge, %380, %70 : vector<1x128xf32>
    %382 = arith.select %381, %71, %73 : vector<1x128xi1>, vector<1x128xf32>
    %383 = math.absf %380 : vector<1x128xf32>
    %384 = arith.minimumf %383, %74 : vector<1x128xf32>
    %385 = arith.mulf %384, %384 : vector<1x128xf32>
    %386 = arith.addf %385, %71 : vector<1x128xf32>
    %387 = math.sqrt %386 : vector<1x128xf32>
    %388 = arith.addf %384, %387 : vector<1x128xf32>
    %389 = tpu.reciprocal %388 {approx = true} : vector<1x128xf32> -> vector<1x128xf32>
    %390 = arith.mulf %382, %389 : vector<1x128xf32>
    %391 = arith.select %375, %390, %70 : vector<1x128xi1>, vector<1x128xf32>
    %392 = arith.mulf %391, %391 : vector<1x128xf32>
    %393 = arith.addf %392, %71 : vector<1x128xf32>
    %394 = math.rsqrt %393 : vector<1x128xf32>
    %395 = arith.mulf %391, %394 : vector<1x128xf32>
    %396 = arith.mulf %394, %394 : vector<1x128xf32>
    %397 = arith.mulf %395, %395 : vector<1x128xf32>
    %398 = arith.mulf %394, %395 : vector<1x128xf32>
    %399 = arith.mulf %398, %347 : vector<1x128xf32>
    %400 = arith.addf %399, %399 : vector<1x128xf32>
    %401 = arith.subf %334, %263 : vector<1x128xf32>
    %402 = arith.mulf %398, %401 : vector<1x128xf32>
    %403 = arith.subf %396, %397 : vector<1x128xf32>
    %404 = arith.mulf %403, %347 : vector<1x128xf32>
    %405 = arith.addf %402, %404 : vector<1x128xf32>
    %406 = arith.mulf %396, %334 : vector<1x128xf32>
    %407 = arith.subf %406, %400 : vector<1x128xf32>
    %408 = arith.mulf %397, %263 : vector<1x128xf32>
    %409 = arith.addf %407, %408 : vector<1x128xf32>
    %410 = arith.mulf %397, %334 : vector<1x128xf32>
    %411 = arith.addf %410, %400 : vector<1x128xf32>
    %412 = arith.mulf %396, %263 : vector<1x128xf32>
    %413 = arith.addf %411, %412 : vector<1x128xf32>
    %414 = arith.mulf %394, %341 : vector<1x128xf32>
    %415 = arith.mulf %395, %255 : vector<1x128xf32>
    %416 = arith.subf %414, %415 : vector<1x128xf32>
    %417 = arith.mulf %395, %341 : vector<1x128xf32>
    %418 = arith.mulf %394, %255 : vector<1x128xf32>
    %419 = arith.addf %417, %418 : vector<1x128xf32>
    %420 = arith.mulf %394, %330 : vector<1x128xf32>
    %421 = arith.mulf %395, %350 : vector<1x128xf32>
    %422 = arith.subf %420, %421 : vector<1x128xf32>
    %423 = arith.mulf %395, %330 : vector<1x128xf32>
    %424 = arith.mulf %394, %350 : vector<1x128xf32>
    %425 = arith.addf %423, %424 : vector<1x128xf32>
    %426 = arith.mulf %394, %353 : vector<1x128xf32>
    %427 = arith.mulf %395, %281 : vector<1x128xf32>
    %428 = arith.subf %426, %427 : vector<1x128xf32>
    %429 = arith.mulf %395, %353 : vector<1x128xf32>
    %430 = arith.mulf %394, %281 : vector<1x128xf32>
    %431 = arith.addf %429, %430 : vector<1x128xf32>
    %432 = arith.mulf %394, %359 : vector<1x128xf32>
    %433 = arith.mulf %395, %287 : vector<1x128xf32>
    %434 = arith.subf %432, %433 : vector<1x128xf32>
    %435 = arith.mulf %395, %359 : vector<1x128xf32>
    %436 = arith.mulf %394, %287 : vector<1x128xf32>
    %437 = arith.addf %435, %436 : vector<1x128xf32>
    %438 = arith.mulf %394, %365 : vector<1x128xf32>
    %439 = arith.mulf %395, %293 : vector<1x128xf32>
    %440 = arith.subf %438, %439 : vector<1x128xf32>
    %441 = arith.mulf %395, %365 : vector<1x128xf32>
    %442 = arith.mulf %394, %293 : vector<1x128xf32>
    %443 = arith.addf %441, %442 : vector<1x128xf32>
    %444 = arith.mulf %394, %371 : vector<1x128xf32>
    %445 = arith.mulf %395, %299 : vector<1x128xf32>
    %446 = arith.subf %444, %445 : vector<1x128xf32>
    %447 = arith.mulf %395, %371 : vector<1x128xf32>
    %448 = arith.mulf %394, %299 : vector<1x128xf32>
    %449 = arith.addf %447, %448 : vector<1x128xf32>
    %450 = arith.cmpf one, %425, %70 : vector<1x128xf32>
    %451 = arith.select %450, %425, %71 : vector<1x128xi1>, vector<1x128xf32>
    %452 = arith.subf %413, %338 : vector<1x128xf32>
    %453 = arith.addf %451, %451 : vector<1x128xf32>
    %454 = tpu.reciprocal %453 {approx = true} : vector<1x128xf32> -> vector<1x128xf32>
    %455 = arith.mulf %452, %454 : vector<1x128xf32>
    %456 = arith.cmpf oge, %455, %70 : vector<1x128xf32>
    %457 = arith.select %456, %71, %73 : vector<1x128xi1>, vector<1x128xf32>
    %458 = math.absf %455 : vector<1x128xf32>
    %459 = arith.minimumf %458, %74 : vector<1x128xf32>
    %460 = arith.mulf %459, %459 : vector<1x128xf32>
    %461 = arith.addf %460, %71 : vector<1x128xf32>
    %462 = math.sqrt %461 : vector<1x128xf32>
    %463 = arith.addf %459, %462 : vector<1x128xf32>
    %464 = tpu.reciprocal %463 {approx = true} : vector<1x128xf32> -> vector<1x128xf32>
    %465 = arith.mulf %457, %464 : vector<1x128xf32>
    %466 = arith.select %450, %465, %70 : vector<1x128xi1>, vector<1x128xf32>
    %467 = arith.mulf %466, %466 : vector<1x128xf32>
    %468 = arith.addf %467, %71 : vector<1x128xf32>
    %469 = math.rsqrt %468 : vector<1x128xf32>
    %470 = arith.mulf %466, %469 : vector<1x128xf32>
    %471 = arith.mulf %469, %469 : vector<1x128xf32>
    %472 = arith.mulf %470, %470 : vector<1x128xf32>
    %473 = arith.mulf %469, %470 : vector<1x128xf32>
    %474 = arith.mulf %473, %425 : vector<1x128xf32>
    %475 = arith.addf %474, %474 : vector<1x128xf32>
    %476 = arith.subf %338, %413 : vector<1x128xf32>
    %477 = arith.mulf %473, %476 : vector<1x128xf32>
    %478 = arith.subf %471, %472 : vector<1x128xf32>
    %479 = arith.mulf %478, %425 : vector<1x128xf32>
    %480 = arith.addf %477, %479 : vector<1x128xf32>
    %481 = arith.mulf %471, %338 : vector<1x128xf32>
    %482 = arith.subf %481, %475 : vector<1x128xf32>
    %483 = arith.mulf %472, %413 : vector<1x128xf32>
    %484 = arith.addf %482, %483 : vector<1x128xf32>
    %485 = arith.mulf %472, %338 : vector<1x128xf32>
    %486 = arith.addf %485, %475 : vector<1x128xf32>
    %487 = arith.mulf %471, %413 : vector<1x128xf32>
    %488 = arith.addf %486, %487 : vector<1x128xf32>
    %489 = arith.mulf %469, %344 : vector<1x128xf32>
    %490 = arith.mulf %470, %419 : vector<1x128xf32>
    %491 = arith.subf %489, %490 : vector<1x128xf32>
    %492 = arith.mulf %470, %344 : vector<1x128xf32>
    %493 = arith.mulf %469, %419 : vector<1x128xf32>
    %494 = arith.addf %492, %493 : vector<1x128xf32>
    %495 = arith.mulf %469, %422 : vector<1x128xf32>
    %496 = arith.mulf %470, %405 : vector<1x128xf32>
    %497 = arith.subf %495, %496 : vector<1x128xf32>
    %498 = arith.mulf %470, %422 : vector<1x128xf32>
    %499 = arith.mulf %469, %405 : vector<1x128xf32>
    %500 = arith.addf %498, %499 : vector<1x128xf32>
    %501 = arith.mulf %469, %356 : vector<1x128xf32>
    %502 = arith.mulf %470, %431 : vector<1x128xf32>
    %503 = arith.subf %501, %502 : vector<1x128xf32>
    %504 = arith.mulf %470, %356 : vector<1x128xf32>
    %505 = arith.mulf %469, %431 : vector<1x128xf32>
    %506 = arith.addf %504, %505 : vector<1x128xf32>
    %507 = arith.mulf %469, %362 : vector<1x128xf32>
    %508 = arith.mulf %470, %437 : vector<1x128xf32>
    %509 = arith.subf %507, %508 : vector<1x128xf32>
    %510 = arith.mulf %470, %362 : vector<1x128xf32>
    %511 = arith.mulf %469, %437 : vector<1x128xf32>
    %512 = arith.addf %510, %511 : vector<1x128xf32>
    %513 = arith.mulf %469, %368 : vector<1x128xf32>
    %514 = arith.mulf %470, %443 : vector<1x128xf32>
    %515 = arith.subf %513, %514 : vector<1x128xf32>
    %516 = arith.mulf %470, %368 : vector<1x128xf32>
    %517 = arith.mulf %469, %443 : vector<1x128xf32>
    %518 = arith.addf %516, %517 : vector<1x128xf32>
    %519 = arith.mulf %469, %374 : vector<1x128xf32>
    %520 = arith.mulf %470, %449 : vector<1x128xf32>
    %521 = arith.subf %519, %520 : vector<1x128xf32>
    %522 = arith.mulf %470, %374 : vector<1x128xf32>
    %523 = arith.mulf %469, %449 : vector<1x128xf32>
    %524 = arith.addf %522, %523 : vector<1x128xf32>
    %525 = arith.cmpf one, %416, %70 : vector<1x128xf32>
    %526 = arith.select %525, %416, %71 : vector<1x128xi1>, vector<1x128xf32>
    %527 = arith.subf %409, %259 : vector<1x128xf32>
    %528 = arith.addf %526, %526 : vector<1x128xf32>
    %529 = tpu.reciprocal %528 {approx = true} : vector<1x128xf32> -> vector<1x128xf32>
    %530 = arith.mulf %527, %529 : vector<1x128xf32>
    %531 = arith.cmpf oge, %530, %70 : vector<1x128xf32>
    %532 = arith.select %531, %71, %73 : vector<1x128xi1>, vector<1x128xf32>
    %533 = math.absf %530 : vector<1x128xf32>
    %534 = arith.minimumf %533, %74 : vector<1x128xf32>
    %535 = arith.mulf %534, %534 : vector<1x128xf32>
    %536 = arith.addf %535, %71 : vector<1x128xf32>
    %537 = math.sqrt %536 : vector<1x128xf32>
    %538 = arith.addf %534, %537 : vector<1x128xf32>
    %539 = tpu.reciprocal %538 {approx = true} : vector<1x128xf32> -> vector<1x128xf32>
    %540 = arith.mulf %532, %539 : vector<1x128xf32>
    %541 = arith.select %525, %540, %70 : vector<1x128xi1>, vector<1x128xf32>
    %542 = arith.mulf %541, %541 : vector<1x128xf32>
    %543 = arith.addf %542, %71 : vector<1x128xf32>
    %544 = math.rsqrt %543 : vector<1x128xf32>
    %545 = arith.mulf %541, %544 : vector<1x128xf32>
    %546 = arith.mulf %544, %544 : vector<1x128xf32>
    %547 = arith.mulf %545, %545 : vector<1x128xf32>
    %548 = arith.mulf %544, %545 : vector<1x128xf32>
    %549 = arith.mulf %548, %416 : vector<1x128xf32>
    %550 = arith.addf %549, %549 : vector<1x128xf32>
    %551 = arith.subf %259, %409 : vector<1x128xf32>
    %552 = arith.mulf %548, %551 : vector<1x128xf32>
    %553 = arith.subf %546, %547 : vector<1x128xf32>
    %554 = arith.mulf %553, %416 : vector<1x128xf32>
    %555 = arith.addf %552, %554 : vector<1x128xf32>
    %556 = arith.mulf %546, %259 : vector<1x128xf32>
    %557 = arith.subf %556, %550 : vector<1x128xf32>
    %558 = arith.mulf %547, %409 : vector<1x128xf32>
    %559 = arith.addf %557, %558 : vector<1x128xf32>
    %560 = arith.mulf %547, %259 : vector<1x128xf32>
    %561 = arith.addf %560, %550 : vector<1x128xf32>
    %562 = arith.mulf %546, %409 : vector<1x128xf32>
    %563 = arith.addf %561, %562 : vector<1x128xf32>
    %564 = arith.mulf %544, %491 : vector<1x128xf32>
    %565 = arith.mulf %545, %497 : vector<1x128xf32>
    %566 = arith.subf %564, %565 : vector<1x128xf32>
    %567 = arith.mulf %545, %491 : vector<1x128xf32>
    %568 = arith.mulf %544, %497 : vector<1x128xf32>
    %569 = arith.addf %567, %568 : vector<1x128xf32>
    %570 = arith.mulf %544, %494 : vector<1x128xf32>
    %571 = arith.mulf %545, %500 : vector<1x128xf32>
    %572 = arith.subf %570, %571 : vector<1x128xf32>
    %573 = arith.mulf %545, %494 : vector<1x128xf32>
    %574 = arith.mulf %544, %500 : vector<1x128xf32>
    %575 = arith.addf %573, %574 : vector<1x128xf32>
    %576 = arith.mulf %544, %278 : vector<1x128xf32>
    %577 = arith.mulf %545, %428 : vector<1x128xf32>
    %578 = arith.subf %576, %577 : vector<1x128xf32>
    %579 = arith.mulf %545, %278 : vector<1x128xf32>
    %580 = arith.mulf %544, %428 : vector<1x128xf32>
    %581 = arith.addf %579, %580 : vector<1x128xf32>
    %582 = arith.mulf %544, %284 : vector<1x128xf32>
    %583 = arith.mulf %545, %434 : vector<1x128xf32>
    %584 = arith.subf %582, %583 : vector<1x128xf32>
    %585 = arith.mulf %545, %284 : vector<1x128xf32>
    %586 = arith.mulf %544, %434 : vector<1x128xf32>
    %587 = arith.addf %585, %586 : vector<1x128xf32>
    %588 = arith.mulf %544, %290 : vector<1x128xf32>
    %589 = arith.mulf %545, %440 : vector<1x128xf32>
    %590 = arith.subf %588, %589 : vector<1x128xf32>
    %591 = arith.mulf %545, %290 : vector<1x128xf32>
    %592 = arith.mulf %544, %440 : vector<1x128xf32>
    %593 = arith.addf %591, %592 : vector<1x128xf32>
    %594 = arith.mulf %544, %296 : vector<1x128xf32>
    %595 = arith.mulf %545, %446 : vector<1x128xf32>
    %596 = arith.subf %594, %595 : vector<1x128xf32>
    %597 = arith.mulf %545, %296 : vector<1x128xf32>
    %598 = arith.mulf %544, %446 : vector<1x128xf32>
    %599 = arith.addf %597, %598 : vector<1x128xf32>
    %600 = arith.cmpf one, %566, %70 : vector<1x128xf32>
    %601 = arith.select %600, %566, %71 : vector<1x128xi1>, vector<1x128xf32>
    %602 = arith.subf %484, %559 : vector<1x128xf32>
    %603 = arith.addf %601, %601 : vector<1x128xf32>
    %604 = tpu.reciprocal %603 {approx = true} : vector<1x128xf32> -> vector<1x128xf32>
    %605 = arith.mulf %602, %604 : vector<1x128xf32>
    %606 = arith.cmpf oge, %605, %70 : vector<1x128xf32>
    %607 = arith.select %606, %71, %73 : vector<1x128xi1>, vector<1x128xf32>
    %608 = math.absf %605 : vector<1x128xf32>
    %609 = arith.minimumf %608, %74 : vector<1x128xf32>
    %610 = arith.mulf %609, %609 : vector<1x128xf32>
    %611 = arith.addf %610, %71 : vector<1x128xf32>
    %612 = math.sqrt %611 : vector<1x128xf32>
    %613 = arith.addf %609, %612 : vector<1x128xf32>
    %614 = tpu.reciprocal %613 {approx = true} : vector<1x128xf32> -> vector<1x128xf32>
    %615 = arith.mulf %607, %614 : vector<1x128xf32>
    %616 = arith.select %600, %615, %70 : vector<1x128xi1>, vector<1x128xf32>
    %617 = arith.mulf %616, %616 : vector<1x128xf32>
    %618 = arith.addf %617, %71 : vector<1x128xf32>
    %619 = math.rsqrt %618 : vector<1x128xf32>
    %620 = arith.mulf %616, %619 : vector<1x128xf32>
    %621 = arith.mulf %619, %619 : vector<1x128xf32>
    %622 = arith.mulf %620, %620 : vector<1x128xf32>
    %623 = arith.mulf %619, %620 : vector<1x128xf32>
    %624 = arith.mulf %623, %566 : vector<1x128xf32>
    %625 = arith.addf %624, %624 : vector<1x128xf32>
    %626 = arith.subf %559, %484 : vector<1x128xf32>
    %627 = arith.mulf %623, %626 : vector<1x128xf32>
    %628 = arith.subf %621, %622 : vector<1x128xf32>
    %629 = arith.mulf %628, %566 : vector<1x128xf32>
    %630 = arith.addf %627, %629 : vector<1x128xf32>
    %631 = arith.mulf %621, %559 : vector<1x128xf32>
    %632 = arith.subf %631, %625 : vector<1x128xf32>
    %633 = arith.mulf %622, %484 : vector<1x128xf32>
    %634 = arith.addf %632, %633 : vector<1x128xf32>
    %635 = arith.mulf %622, %559 : vector<1x128xf32>
    %636 = arith.addf %635, %625 : vector<1x128xf32>
    %637 = arith.mulf %621, %484 : vector<1x128xf32>
    %638 = arith.addf %636, %637 : vector<1x128xf32>
    %639 = arith.mulf %619, %555 : vector<1x128xf32>
    %640 = arith.mulf %620, %569 : vector<1x128xf32>
    %641 = arith.subf %639, %640 : vector<1x128xf32>
    %642 = arith.mulf %620, %555 : vector<1x128xf32>
    %643 = arith.mulf %619, %569 : vector<1x128xf32>
    %644 = arith.addf %642, %643 : vector<1x128xf32>
    %645 = arith.mulf %619, %572 : vector<1x128xf32>
    %646 = arith.mulf %620, %480 : vector<1x128xf32>
    %647 = arith.subf %645, %646 : vector<1x128xf32>
    %648 = arith.mulf %620, %572 : vector<1x128xf32>
    %649 = arith.mulf %619, %480 : vector<1x128xf32>
    %650 = arith.addf %648, %649 : vector<1x128xf32>
    %651 = arith.mulf %619, %578 : vector<1x128xf32>
    %652 = arith.mulf %620, %503 : vector<1x128xf32>
    %653 = arith.subf %651, %652 : vector<1x128xf32>
    %654 = arith.mulf %620, %578 : vector<1x128xf32>
    %655 = arith.mulf %619, %503 : vector<1x128xf32>
    %656 = arith.addf %654, %655 : vector<1x128xf32>
    %657 = arith.mulf %619, %584 : vector<1x128xf32>
    %658 = arith.mulf %620, %509 : vector<1x128xf32>
    %659 = arith.subf %657, %658 : vector<1x128xf32>
    %660 = arith.mulf %620, %584 : vector<1x128xf32>
    %661 = arith.mulf %619, %509 : vector<1x128xf32>
    %662 = arith.addf %660, %661 : vector<1x128xf32>
    %663 = arith.mulf %619, %590 : vector<1x128xf32>
    %664 = arith.mulf %620, %515 : vector<1x128xf32>
    %665 = arith.subf %663, %664 : vector<1x128xf32>
    %666 = arith.mulf %620, %590 : vector<1x128xf32>
    %667 = arith.mulf %619, %515 : vector<1x128xf32>
    %668 = arith.addf %666, %667 : vector<1x128xf32>
    %669 = arith.mulf %619, %596 : vector<1x128xf32>
    %670 = arith.mulf %620, %521 : vector<1x128xf32>
    %671 = arith.subf %669, %670 : vector<1x128xf32>
    %672 = arith.mulf %620, %596 : vector<1x128xf32>
    %673 = arith.mulf %619, %521 : vector<1x128xf32>
    %674 = arith.addf %672, %673 : vector<1x128xf32>
    %675 = arith.cmpf one, %647, %70 : vector<1x128xf32>
    %676 = arith.select %675, %647, %71 : vector<1x128xi1>, vector<1x128xf32>
    %677 = arith.subf %488, %634 : vector<1x128xf32>
    %678 = arith.addf %676, %676 : vector<1x128xf32>
    %679 = tpu.reciprocal %678 {approx = true} : vector<1x128xf32> -> vector<1x128xf32>
    %680 = arith.mulf %677, %679 : vector<1x128xf32>
    %681 = arith.cmpf oge, %680, %70 : vector<1x128xf32>
    %682 = arith.select %681, %71, %73 : vector<1x128xi1>, vector<1x128xf32>
    %683 = math.absf %680 : vector<1x128xf32>
    %684 = arith.minimumf %683, %74 : vector<1x128xf32>
    %685 = arith.mulf %684, %684 : vector<1x128xf32>
    %686 = arith.addf %685, %71 : vector<1x128xf32>
    %687 = math.sqrt %686 : vector<1x128xf32>
    %688 = arith.addf %684, %687 : vector<1x128xf32>
    %689 = tpu.reciprocal %688 {approx = true} : vector<1x128xf32> -> vector<1x128xf32>
    %690 = arith.mulf %682, %689 : vector<1x128xf32>
    %691 = arith.select %675, %690, %70 : vector<1x128xi1>, vector<1x128xf32>
    %692 = arith.mulf %691, %691 : vector<1x128xf32>
    %693 = arith.addf %692, %71 : vector<1x128xf32>
    %694 = math.rsqrt %693 : vector<1x128xf32>
    %695 = arith.mulf %691, %694 : vector<1x128xf32>
    %696 = arith.mulf %694, %694 : vector<1x128xf32>
    %697 = arith.mulf %695, %695 : vector<1x128xf32>
    %698 = arith.mulf %694, %695 : vector<1x128xf32>
    %699 = arith.mulf %698, %647 : vector<1x128xf32>
    %700 = arith.addf %699, %699 : vector<1x128xf32>
    %701 = arith.subf %634, %488 : vector<1x128xf32>
    %702 = arith.mulf %698, %701 : vector<1x128xf32>
    %703 = arith.subf %696, %697 : vector<1x128xf32>
    %704 = arith.mulf %703, %647 : vector<1x128xf32>
    %705 = arith.addf %702, %704 : vector<1x128xf32>
    %706 = arith.mulf %696, %634 : vector<1x128xf32>
    %707 = arith.subf %706, %700 : vector<1x128xf32>
    %708 = arith.mulf %697, %488 : vector<1x128xf32>
    %709 = arith.addf %707, %708 : vector<1x128xf32>
    %710 = arith.mulf %697, %634 : vector<1x128xf32>
    %711 = arith.addf %710, %700 : vector<1x128xf32>
    %712 = arith.mulf %696, %488 : vector<1x128xf32>
    %713 = arith.addf %711, %712 : vector<1x128xf32>
    %714 = arith.mulf %694, %641 : vector<1x128xf32>
    %715 = arith.mulf %695, %575 : vector<1x128xf32>
    %716 = arith.subf %714, %715 : vector<1x128xf32>
    %717 = arith.mulf %695, %641 : vector<1x128xf32>
    %718 = arith.mulf %694, %575 : vector<1x128xf32>
    %719 = arith.addf %717, %718 : vector<1x128xf32>
    %720 = arith.mulf %694, %630 : vector<1x128xf32>
    %721 = arith.mulf %695, %650 : vector<1x128xf32>
    %722 = arith.subf %720, %721 : vector<1x128xf32>
    %723 = arith.mulf %695, %630 : vector<1x128xf32>
    %724 = arith.mulf %694, %650 : vector<1x128xf32>
    %725 = arith.addf %723, %724 : vector<1x128xf32>
    %726 = arith.mulf %694, %653 : vector<1x128xf32>
    %727 = arith.mulf %695, %506 : vector<1x128xf32>
    %728 = arith.subf %726, %727 : vector<1x128xf32>
    %729 = arith.mulf %695, %653 : vector<1x128xf32>
    %730 = arith.mulf %694, %506 : vector<1x128xf32>
    %731 = arith.addf %729, %730 : vector<1x128xf32>
    %732 = arith.mulf %694, %659 : vector<1x128xf32>
    %733 = arith.mulf %695, %512 : vector<1x128xf32>
    %734 = arith.subf %732, %733 : vector<1x128xf32>
    %735 = arith.mulf %695, %659 : vector<1x128xf32>
    %736 = arith.mulf %694, %512 : vector<1x128xf32>
    %737 = arith.addf %735, %736 : vector<1x128xf32>
    %738 = arith.mulf %694, %665 : vector<1x128xf32>
    %739 = arith.mulf %695, %518 : vector<1x128xf32>
    %740 = arith.subf %738, %739 : vector<1x128xf32>
    %741 = arith.mulf %695, %665 : vector<1x128xf32>
    %742 = arith.mulf %694, %518 : vector<1x128xf32>
    %743 = arith.addf %741, %742 : vector<1x128xf32>
    %744 = arith.mulf %694, %671 : vector<1x128xf32>
    %745 = arith.mulf %695, %524 : vector<1x128xf32>
    %746 = arith.subf %744, %745 : vector<1x128xf32>
    %747 = arith.mulf %695, %671 : vector<1x128xf32>
    %748 = arith.mulf %694, %524 : vector<1x128xf32>
    %749 = arith.addf %747, %748 : vector<1x128xf32>
    %750 = arith.cmpf one, %644, %70 : vector<1x128xf32>
    %751 = arith.select %750, %644, %71 : vector<1x128xi1>, vector<1x128xf32>
    %752 = arith.subf %638, %563 : vector<1x128xf32>
    %753 = arith.addf %751, %751 : vector<1x128xf32>
    %754 = tpu.reciprocal %753 {approx = true} : vector<1x128xf32> -> vector<1x128xf32>
    %755 = arith.mulf %752, %754 : vector<1x128xf32>
    %756 = arith.cmpf oge, %755, %70 : vector<1x128xf32>
    %757 = arith.select %756, %71, %73 : vector<1x128xi1>, vector<1x128xf32>
    %758 = math.absf %755 : vector<1x128xf32>
    %759 = arith.minimumf %758, %74 : vector<1x128xf32>
    %760 = arith.mulf %759, %759 : vector<1x128xf32>
    %761 = arith.addf %760, %71 : vector<1x128xf32>
    %762 = math.sqrt %761 : vector<1x128xf32>
    %763 = arith.addf %759, %762 : vector<1x128xf32>
    %764 = tpu.reciprocal %763 {approx = true} : vector<1x128xf32> -> vector<1x128xf32>
    %765 = arith.mulf %757, %764 : vector<1x128xf32>
    %766 = arith.select %750, %765, %70 : vector<1x128xi1>, vector<1x128xf32>
    %767 = arith.mulf %766, %766 : vector<1x128xf32>
    %768 = arith.addf %767, %71 : vector<1x128xf32>
    %769 = math.rsqrt %768 : vector<1x128xf32>
    %770 = arith.mulf %766, %769 : vector<1x128xf32>
    %771 = arith.mulf %769, %769 : vector<1x128xf32>
    %772 = arith.mulf %770, %770 : vector<1x128xf32>
    %773 = arith.mulf %769, %770 : vector<1x128xf32>
    %774 = arith.mulf %773, %644 : vector<1x128xf32>
    %775 = arith.addf %774, %774 : vector<1x128xf32>
    %776 = arith.subf %563, %638 : vector<1x128xf32>
    %777 = arith.mulf %773, %776 : vector<1x128xf32>
    %778 = arith.subf %771, %772 : vector<1x128xf32>
    %779 = arith.mulf %778, %644 : vector<1x128xf32>
    %780 = arith.addf %777, %779 : vector<1x128xf32>
    %781 = arith.mulf %771, %563 : vector<1x128xf32>
    %782 = arith.subf %781, %775 : vector<1x128xf32>
    %783 = arith.mulf %772, %638 : vector<1x128xf32>
    %784 = arith.addf %782, %783 : vector<1x128xf32>
    %785 = arith.mulf %772, %563 : vector<1x128xf32>
    %786 = arith.addf %785, %775 : vector<1x128xf32>
    %787 = arith.mulf %771, %638 : vector<1x128xf32>
    %788 = arith.addf %786, %787 : vector<1x128xf32>
    %789 = arith.mulf %769, %716 : vector<1x128xf32>
    %790 = arith.mulf %770, %722 : vector<1x128xf32>
    %791 = arith.subf %789, %790 : vector<1x128xf32>
    %792 = arith.mulf %770, %716 : vector<1x128xf32>
    %793 = arith.mulf %769, %722 : vector<1x128xf32>
    %794 = arith.addf %792, %793 : vector<1x128xf32>
    %795 = arith.mulf %769, %719 : vector<1x128xf32>
    %796 = arith.mulf %770, %725 : vector<1x128xf32>
    %797 = arith.subf %795, %796 : vector<1x128xf32>
    %798 = arith.mulf %770, %719 : vector<1x128xf32>
    %799 = arith.mulf %769, %725 : vector<1x128xf32>
    %800 = arith.addf %798, %799 : vector<1x128xf32>
    %801 = arith.mulf %769, %581 : vector<1x128xf32>
    %802 = arith.mulf %770, %656 : vector<1x128xf32>
    %803 = arith.subf %801, %802 : vector<1x128xf32>
    %804 = arith.mulf %770, %581 : vector<1x128xf32>
    %805 = arith.mulf %769, %656 : vector<1x128xf32>
    %806 = arith.addf %804, %805 : vector<1x128xf32>
    %807 = arith.mulf %769, %587 : vector<1x128xf32>
    %808 = arith.mulf %770, %662 : vector<1x128xf32>
    %809 = arith.subf %807, %808 : vector<1x128xf32>
    %810 = arith.mulf %770, %587 : vector<1x128xf32>
    %811 = arith.mulf %769, %662 : vector<1x128xf32>
    %812 = arith.addf %810, %811 : vector<1x128xf32>
    %813 = arith.mulf %769, %593 : vector<1x128xf32>
    %814 = arith.mulf %770, %668 : vector<1x128xf32>
    %815 = arith.subf %813, %814 : vector<1x128xf32>
    %816 = arith.mulf %770, %593 : vector<1x128xf32>
    %817 = arith.mulf %769, %668 : vector<1x128xf32>
    %818 = arith.addf %816, %817 : vector<1x128xf32>
    %819 = arith.mulf %769, %599 : vector<1x128xf32>
    %820 = arith.mulf %770, %674 : vector<1x128xf32>
    %821 = arith.subf %819, %820 : vector<1x128xf32>
    %822 = arith.mulf %770, %599 : vector<1x128xf32>
    %823 = arith.mulf %769, %674 : vector<1x128xf32>
    %824 = arith.addf %822, %823 : vector<1x128xf32>
    %825 = arith.cmpf one, %797, %70 : vector<1x128xf32>
    %826 = arith.select %825, %797, %71 : vector<1x128xi1>, vector<1x128xf32>
    %827 = arith.subf %713, %784 : vector<1x128xf32>
    %828 = arith.addf %826, %826 : vector<1x128xf32>
    %829 = tpu.reciprocal %828 {approx = true} : vector<1x128xf32> -> vector<1x128xf32>
    %830 = arith.mulf %827, %829 : vector<1x128xf32>
    %831 = arith.cmpf oge, %830, %70 : vector<1x128xf32>
    %832 = arith.select %831, %71, %73 : vector<1x128xi1>, vector<1x128xf32>
    %833 = math.absf %830 : vector<1x128xf32>
    %834 = arith.minimumf %833, %74 : vector<1x128xf32>
    %835 = arith.mulf %834, %834 : vector<1x128xf32>
    %836 = arith.addf %835, %71 : vector<1x128xf32>
    %837 = math.sqrt %836 : vector<1x128xf32>
    %838 = arith.addf %834, %837 : vector<1x128xf32>
    %839 = tpu.reciprocal %838 {approx = true} : vector<1x128xf32> -> vector<1x128xf32>
    %840 = arith.mulf %832, %839 : vector<1x128xf32>
    %841 = arith.select %825, %840, %70 : vector<1x128xi1>, vector<1x128xf32>
    %842 = arith.mulf %841, %841 : vector<1x128xf32>
    %843 = arith.addf %842, %71 : vector<1x128xf32>
    %844 = math.rsqrt %843 : vector<1x128xf32>
    %845 = arith.mulf %841, %844 : vector<1x128xf32>
    %846 = arith.mulf %844, %844 : vector<1x128xf32>
    %847 = arith.mulf %845, %845 : vector<1x128xf32>
    %848 = arith.mulf %844, %845 : vector<1x128xf32>
    %849 = arith.mulf %848, %797 : vector<1x128xf32>
    %850 = arith.addf %849, %849 : vector<1x128xf32>
    %851 = arith.subf %784, %713 : vector<1x128xf32>
    %852 = arith.mulf %848, %851 : vector<1x128xf32>
    %853 = arith.subf %846, %847 : vector<1x128xf32>
    %854 = arith.mulf %853, %797 : vector<1x128xf32>
    %855 = arith.addf %852, %854 : vector<1x128xf32>
    %856 = arith.mulf %846, %784 : vector<1x128xf32>
    %857 = arith.subf %856, %850 : vector<1x128xf32>
    %858 = arith.mulf %847, %713 : vector<1x128xf32>
    %859 = arith.addf %857, %858 : vector<1x128xf32>
    %860 = arith.mulf %847, %784 : vector<1x128xf32>
    %861 = arith.addf %860, %850 : vector<1x128xf32>
    %862 = arith.mulf %846, %713 : vector<1x128xf32>
    %863 = arith.addf %861, %862 : vector<1x128xf32>
    %864 = arith.mulf %844, %791 : vector<1x128xf32>
    %865 = arith.mulf %845, %705 : vector<1x128xf32>
    %866 = arith.subf %864, %865 : vector<1x128xf32>
    %867 = arith.mulf %845, %791 : vector<1x128xf32>
    %868 = arith.mulf %844, %705 : vector<1x128xf32>
    %869 = arith.addf %867, %868 : vector<1x128xf32>
    %870 = arith.mulf %844, %780 : vector<1x128xf32>
    %871 = arith.mulf %845, %800 : vector<1x128xf32>
    %872 = arith.subf %870, %871 : vector<1x128xf32>
    %873 = arith.mulf %845, %780 : vector<1x128xf32>
    %874 = arith.mulf %844, %800 : vector<1x128xf32>
    %875 = arith.addf %873, %874 : vector<1x128xf32>
    %876 = arith.mulf %844, %803 : vector<1x128xf32>
    %877 = arith.mulf %845, %731 : vector<1x128xf32>
    %878 = arith.subf %876, %877 : vector<1x128xf32>
    %879 = arith.mulf %845, %803 : vector<1x128xf32>
    %880 = arith.mulf %844, %731 : vector<1x128xf32>
    %881 = arith.addf %879, %880 : vector<1x128xf32>
    %882 = arith.mulf %844, %809 : vector<1x128xf32>
    %883 = arith.mulf %845, %737 : vector<1x128xf32>
    %884 = arith.subf %882, %883 : vector<1x128xf32>
    %885 = arith.mulf %845, %809 : vector<1x128xf32>
    %886 = arith.mulf %844, %737 : vector<1x128xf32>
    %887 = arith.addf %885, %886 : vector<1x128xf32>
    %888 = arith.mulf %844, %815 : vector<1x128xf32>
    %889 = arith.mulf %845, %743 : vector<1x128xf32>
    %890 = arith.subf %888, %889 : vector<1x128xf32>
    %891 = arith.mulf %845, %815 : vector<1x128xf32>
    %892 = arith.mulf %844, %743 : vector<1x128xf32>
    %893 = arith.addf %891, %892 : vector<1x128xf32>
    %894 = arith.mulf %844, %821 : vector<1x128xf32>
    %895 = arith.mulf %845, %749 : vector<1x128xf32>
    %896 = arith.subf %894, %895 : vector<1x128xf32>
    %897 = arith.mulf %845, %821 : vector<1x128xf32>
    %898 = arith.mulf %844, %749 : vector<1x128xf32>
    %899 = arith.addf %897, %898 : vector<1x128xf32>
    %900 = arith.cmpf one, %875, %70 : vector<1x128xf32>
    %901 = arith.select %900, %875, %71 : vector<1x128xi1>, vector<1x128xf32>
    %902 = arith.subf %863, %788 : vector<1x128xf32>
    %903 = arith.addf %901, %901 : vector<1x128xf32>
    %904 = tpu.reciprocal %903 {approx = true} : vector<1x128xf32> -> vector<1x128xf32>
    %905 = arith.mulf %902, %904 : vector<1x128xf32>
    %906 = arith.cmpf oge, %905, %70 : vector<1x128xf32>
    %907 = arith.select %906, %71, %73 : vector<1x128xi1>, vector<1x128xf32>
    %908 = math.absf %905 : vector<1x128xf32>
    %909 = arith.minimumf %908, %74 : vector<1x128xf32>
    %910 = arith.mulf %909, %909 : vector<1x128xf32>
    %911 = arith.addf %910, %71 : vector<1x128xf32>
    %912 = math.sqrt %911 : vector<1x128xf32>
    %913 = arith.addf %909, %912 : vector<1x128xf32>
    %914 = tpu.reciprocal %913 {approx = true} : vector<1x128xf32> -> vector<1x128xf32>
    %915 = arith.mulf %907, %914 : vector<1x128xf32>
    %916 = arith.select %900, %915, %70 : vector<1x128xi1>, vector<1x128xf32>
    %917 = arith.mulf %916, %916 : vector<1x128xf32>
    %918 = arith.addf %917, %71 : vector<1x128xf32>
    %919 = math.rsqrt %918 : vector<1x128xf32>
    %920 = arith.mulf %916, %919 : vector<1x128xf32>
    %921 = arith.mulf %919, %919 : vector<1x128xf32>
    %922 = arith.mulf %920, %920 : vector<1x128xf32>
    %923 = arith.mulf %919, %920 : vector<1x128xf32>
    %924 = arith.mulf %923, %875 : vector<1x128xf32>
    %925 = arith.addf %924, %924 : vector<1x128xf32>
    %926 = arith.subf %788, %863 : vector<1x128xf32>
    %927 = arith.mulf %923, %926 : vector<1x128xf32>
    %928 = arith.subf %921, %922 : vector<1x128xf32>
    %929 = arith.mulf %928, %875 : vector<1x128xf32>
    %930 = arith.addf %927, %929 : vector<1x128xf32>
    %931 = arith.mulf %921, %788 : vector<1x128xf32>
    %932 = arith.subf %931, %925 : vector<1x128xf32>
    %933 = arith.mulf %922, %863 : vector<1x128xf32>
    %934 = arith.addf %932, %933 : vector<1x128xf32>
    %935 = arith.mulf %922, %788 : vector<1x128xf32>
    %936 = arith.addf %935, %925 : vector<1x128xf32>
    %937 = arith.mulf %921, %863 : vector<1x128xf32>
    %938 = arith.addf %936, %937 : vector<1x128xf32>
    %939 = arith.mulf %919, %794 : vector<1x128xf32>
    %940 = arith.mulf %920, %869 : vector<1x128xf32>
    %941 = arith.subf %939, %940 : vector<1x128xf32>
    %942 = arith.mulf %920, %794 : vector<1x128xf32>
    %943 = arith.mulf %919, %869 : vector<1x128xf32>
    %944 = arith.addf %942, %943 : vector<1x128xf32>
    %945 = arith.mulf %919, %872 : vector<1x128xf32>
    %946 = arith.mulf %920, %855 : vector<1x128xf32>
    %947 = arith.subf %945, %946 : vector<1x128xf32>
    %948 = arith.mulf %920, %872 : vector<1x128xf32>
    %949 = arith.mulf %919, %855 : vector<1x128xf32>
    %950 = arith.addf %948, %949 : vector<1x128xf32>
    %951 = arith.mulf %919, %806 : vector<1x128xf32>
    %952 = arith.mulf %920, %881 : vector<1x128xf32>
    %953 = arith.subf %951, %952 : vector<1x128xf32>
    %954 = arith.mulf %920, %806 : vector<1x128xf32>
    %955 = arith.mulf %919, %881 : vector<1x128xf32>
    %956 = arith.addf %954, %955 : vector<1x128xf32>
    %957 = arith.mulf %919, %812 : vector<1x128xf32>
    %958 = arith.mulf %920, %887 : vector<1x128xf32>
    %959 = arith.subf %957, %958 : vector<1x128xf32>
    %960 = arith.mulf %920, %812 : vector<1x128xf32>
    %961 = arith.mulf %919, %887 : vector<1x128xf32>
    %962 = arith.addf %960, %961 : vector<1x128xf32>
    %963 = arith.mulf %919, %818 : vector<1x128xf32>
    %964 = arith.mulf %920, %893 : vector<1x128xf32>
    %965 = arith.subf %963, %964 : vector<1x128xf32>
    %966 = arith.mulf %920, %818 : vector<1x128xf32>
    %967 = arith.mulf %919, %893 : vector<1x128xf32>
    %968 = arith.addf %966, %967 : vector<1x128xf32>
    %969 = arith.mulf %919, %824 : vector<1x128xf32>
    %970 = arith.mulf %920, %899 : vector<1x128xf32>
    %971 = arith.subf %969, %970 : vector<1x128xf32>
    %972 = arith.mulf %920, %824 : vector<1x128xf32>
    %973 = arith.mulf %919, %899 : vector<1x128xf32>
    %974 = arith.addf %972, %973 : vector<1x128xf32>
    %975 = arith.cmpf one, %866, %70 : vector<1x128xf32>
    %976 = arith.select %975, %866, %71 : vector<1x128xi1>, vector<1x128xf32>
    %977 = arith.subf %859, %709 : vector<1x128xf32>
    %978 = arith.addf %976, %976 : vector<1x128xf32>
    %979 = tpu.reciprocal %978 {approx = true} : vector<1x128xf32> -> vector<1x128xf32>
    %980 = arith.mulf %977, %979 : vector<1x128xf32>
    %981 = arith.cmpf oge, %980, %70 : vector<1x128xf32>
    %982 = arith.select %981, %71, %73 : vector<1x128xi1>, vector<1x128xf32>
    %983 = math.absf %980 : vector<1x128xf32>
    %984 = arith.minimumf %983, %74 : vector<1x128xf32>
    %985 = arith.mulf %984, %984 : vector<1x128xf32>
    %986 = arith.addf %985, %71 : vector<1x128xf32>
    %987 = math.sqrt %986 : vector<1x128xf32>
    %988 = arith.addf %984, %987 : vector<1x128xf32>
    %989 = tpu.reciprocal %988 {approx = true} : vector<1x128xf32> -> vector<1x128xf32>
    %990 = arith.mulf %982, %989 : vector<1x128xf32>
    %991 = arith.select %975, %990, %70 : vector<1x128xi1>, vector<1x128xf32>
    %992 = arith.mulf %991, %991 : vector<1x128xf32>
    %993 = arith.addf %992, %71 : vector<1x128xf32>
    %994 = math.rsqrt %993 : vector<1x128xf32>
    %995 = arith.mulf %991, %994 : vector<1x128xf32>
    %996 = arith.mulf %994, %994 : vector<1x128xf32>
    %997 = arith.mulf %995, %995 : vector<1x128xf32>
    %998 = arith.mulf %994, %995 : vector<1x128xf32>
    %999 = arith.mulf %998, %866 : vector<1x128xf32>
    %1000 = arith.addf %999, %999 : vector<1x128xf32>
    %1001 = arith.subf %709, %859 : vector<1x128xf32>
    %1002 = arith.mulf %998, %1001 : vector<1x128xf32>
    %1003 = arith.subf %996, %997 : vector<1x128xf32>
    %1004 = arith.mulf %1003, %866 : vector<1x128xf32>
    %1005 = arith.addf %1002, %1004 : vector<1x128xf32>
    %1006 = arith.mulf %996, %709 : vector<1x128xf32>
    %1007 = arith.subf %1006, %1000 : vector<1x128xf32>
    %1008 = arith.mulf %997, %859 : vector<1x128xf32>
    %1009 = arith.addf %1007, %1008 : vector<1x128xf32>
    %1010 = arith.mulf %997, %709 : vector<1x128xf32>
    %1011 = arith.addf %1010, %1000 : vector<1x128xf32>
    %1012 = arith.mulf %996, %859 : vector<1x128xf32>
    %1013 = arith.addf %1011, %1012 : vector<1x128xf32>
    %1014 = arith.mulf %994, %941 : vector<1x128xf32>
    %1015 = arith.mulf %995, %947 : vector<1x128xf32>
    %1016 = arith.subf %1014, %1015 : vector<1x128xf32>
    %1017 = arith.mulf %995, %941 : vector<1x128xf32>
    %1018 = arith.mulf %994, %947 : vector<1x128xf32>
    %1019 = arith.addf %1017, %1018 : vector<1x128xf32>
    %1020 = arith.mulf %994, %944 : vector<1x128xf32>
    %1021 = arith.mulf %995, %950 : vector<1x128xf32>
    %1022 = arith.subf %1020, %1021 : vector<1x128xf32>
    %1023 = arith.mulf %995, %944 : vector<1x128xf32>
    %1024 = arith.mulf %994, %950 : vector<1x128xf32>
    %1025 = arith.addf %1023, %1024 : vector<1x128xf32>
    %1026 = arith.mulf %994, %728 : vector<1x128xf32>
    %1027 = arith.mulf %995, %878 : vector<1x128xf32>
    %1028 = arith.subf %1026, %1027 : vector<1x128xf32>
    %1029 = arith.mulf %995, %728 : vector<1x128xf32>
    %1030 = arith.mulf %994, %878 : vector<1x128xf32>
    %1031 = arith.addf %1029, %1030 : vector<1x128xf32>
    %1032 = arith.mulf %994, %734 : vector<1x128xf32>
    %1033 = arith.mulf %995, %884 : vector<1x128xf32>
    %1034 = arith.subf %1032, %1033 : vector<1x128xf32>
    %1035 = arith.mulf %995, %734 : vector<1x128xf32>
    %1036 = arith.mulf %994, %884 : vector<1x128xf32>
    %1037 = arith.addf %1035, %1036 : vector<1x128xf32>
    %1038 = arith.mulf %994, %740 : vector<1x128xf32>
    %1039 = arith.mulf %995, %890 : vector<1x128xf32>
    %1040 = arith.subf %1038, %1039 : vector<1x128xf32>
    %1041 = arith.mulf %995, %740 : vector<1x128xf32>
    %1042 = arith.mulf %994, %890 : vector<1x128xf32>
    %1043 = arith.addf %1041, %1042 : vector<1x128xf32>
    %1044 = arith.mulf %994, %746 : vector<1x128xf32>
    %1045 = arith.mulf %995, %896 : vector<1x128xf32>
    %1046 = arith.subf %1044, %1045 : vector<1x128xf32>
    %1047 = arith.mulf %995, %746 : vector<1x128xf32>
    %1048 = arith.mulf %994, %896 : vector<1x128xf32>
    %1049 = arith.addf %1047, %1048 : vector<1x128xf32>
    %1050 = arith.cmpf one, %1016, %70 : vector<1x128xf32>
    %1051 = arith.select %1050, %1016, %71 : vector<1x128xi1>, vector<1x128xf32>
    %1052 = arith.subf %934, %1009 : vector<1x128xf32>
    %1053 = arith.addf %1051, %1051 : vector<1x128xf32>
    %1054 = tpu.reciprocal %1053 {approx = true} : vector<1x128xf32> -> vector<1x128xf32>
    %1055 = arith.mulf %1052, %1054 : vector<1x128xf32>
    %1056 = arith.cmpf oge, %1055, %70 : vector<1x128xf32>
    %1057 = arith.select %1056, %71, %73 : vector<1x128xi1>, vector<1x128xf32>
    %1058 = math.absf %1055 : vector<1x128xf32>
    %1059 = arith.minimumf %1058, %74 : vector<1x128xf32>
    %1060 = arith.mulf %1059, %1059 : vector<1x128xf32>
    %1061 = arith.addf %1060, %71 : vector<1x128xf32>
    %1062 = math.sqrt %1061 : vector<1x128xf32>
    %1063 = arith.addf %1059, %1062 : vector<1x128xf32>
    %1064 = tpu.reciprocal %1063 {approx = true} : vector<1x128xf32> -> vector<1x128xf32>
    %1065 = arith.mulf %1057, %1064 : vector<1x128xf32>
    %1066 = arith.select %1050, %1065, %70 : vector<1x128xi1>, vector<1x128xf32>
    %1067 = arith.mulf %1066, %1066 : vector<1x128xf32>
    %1068 = arith.addf %1067, %71 : vector<1x128xf32>
    %1069 = math.rsqrt %1068 : vector<1x128xf32>
    %1070 = arith.mulf %1066, %1069 : vector<1x128xf32>
    %1071 = arith.mulf %1069, %1069 : vector<1x128xf32>
    %1072 = arith.mulf %1070, %1070 : vector<1x128xf32>
    %1073 = arith.mulf %1069, %1070 : vector<1x128xf32>
    %1074 = arith.mulf %1073, %1016 : vector<1x128xf32>
    %1075 = arith.addf %1074, %1074 : vector<1x128xf32>
    %1076 = arith.subf %1009, %934 : vector<1x128xf32>
    %1077 = arith.mulf %1073, %1076 : vector<1x128xf32>
    %1078 = arith.subf %1071, %1072 : vector<1x128xf32>
    %1079 = arith.mulf %1078, %1016 : vector<1x128xf32>
    %1080 = arith.addf %1077, %1079 : vector<1x128xf32>
    %1081 = arith.mulf %1071, %1009 : vector<1x128xf32>
    %1082 = arith.subf %1081, %1075 : vector<1x128xf32>
    %1083 = arith.mulf %1072, %934 : vector<1x128xf32>
    %1084 = arith.addf %1082, %1083 : vector<1x128xf32>
    %1085 = arith.mulf %1072, %1009 : vector<1x128xf32>
    %1086 = arith.addf %1085, %1075 : vector<1x128xf32>
    %1087 = arith.mulf %1071, %934 : vector<1x128xf32>
    %1088 = arith.addf %1086, %1087 : vector<1x128xf32>
    %1089 = arith.mulf %1069, %1005 : vector<1x128xf32>
    %1090 = arith.mulf %1070, %1019 : vector<1x128xf32>
    %1091 = arith.subf %1089, %1090 : vector<1x128xf32>
    %1092 = arith.mulf %1070, %1005 : vector<1x128xf32>
    %1093 = arith.mulf %1069, %1019 : vector<1x128xf32>
    %1094 = arith.addf %1092, %1093 : vector<1x128xf32>
    %1095 = arith.mulf %1069, %1022 : vector<1x128xf32>
    %1096 = arith.mulf %1070, %930 : vector<1x128xf32>
    %1097 = arith.subf %1095, %1096 : vector<1x128xf32>
    %1098 = arith.mulf %1070, %1022 : vector<1x128xf32>
    %1099 = arith.mulf %1069, %930 : vector<1x128xf32>
    %1100 = arith.addf %1098, %1099 : vector<1x128xf32>
    %1101 = arith.mulf %1069, %1028 : vector<1x128xf32>
    %1102 = arith.mulf %1070, %953 : vector<1x128xf32>
    %1103 = arith.subf %1101, %1102 : vector<1x128xf32>
    %1104 = arith.mulf %1070, %1028 : vector<1x128xf32>
    %1105 = arith.mulf %1069, %953 : vector<1x128xf32>
    %1106 = arith.addf %1104, %1105 : vector<1x128xf32>
    %1107 = arith.mulf %1069, %1034 : vector<1x128xf32>
    %1108 = arith.mulf %1070, %959 : vector<1x128xf32>
    %1109 = arith.subf %1107, %1108 : vector<1x128xf32>
    %1110 = arith.mulf %1070, %1034 : vector<1x128xf32>
    %1111 = arith.mulf %1069, %959 : vector<1x128xf32>
    %1112 = arith.addf %1110, %1111 : vector<1x128xf32>
    %1113 = arith.mulf %1069, %1040 : vector<1x128xf32>
    %1114 = arith.mulf %1070, %965 : vector<1x128xf32>
    %1115 = arith.subf %1113, %1114 : vector<1x128xf32>
    %1116 = arith.mulf %1070, %1040 : vector<1x128xf32>
    %1117 = arith.mulf %1069, %965 : vector<1x128xf32>
    %1118 = arith.addf %1116, %1117 : vector<1x128xf32>
    %1119 = arith.mulf %1069, %1046 : vector<1x128xf32>
    %1120 = arith.mulf %1070, %971 : vector<1x128xf32>
    %1121 = arith.subf %1119, %1120 : vector<1x128xf32>
    %1122 = arith.mulf %1070, %1046 : vector<1x128xf32>
    %1123 = arith.mulf %1069, %971 : vector<1x128xf32>
    %1124 = arith.addf %1122, %1123 : vector<1x128xf32>
    %1125 = arith.cmpf one, %1097, %70 : vector<1x128xf32>
    %1126 = arith.select %1125, %1097, %71 : vector<1x128xi1>, vector<1x128xf32>
    %1127 = arith.subf %938, %1084 : vector<1x128xf32>
    %1128 = arith.addf %1126, %1126 : vector<1x128xf32>
    %1129 = tpu.reciprocal %1128 {approx = true} : vector<1x128xf32> -> vector<1x128xf32>
    %1130 = arith.mulf %1127, %1129 : vector<1x128xf32>
    %1131 = arith.cmpf oge, %1130, %70 : vector<1x128xf32>
    %1132 = arith.select %1131, %71, %73 : vector<1x128xi1>, vector<1x128xf32>
    %1133 = math.absf %1130 : vector<1x128xf32>
    %1134 = arith.minimumf %1133, %74 : vector<1x128xf32>
    %1135 = arith.mulf %1134, %1134 : vector<1x128xf32>
    %1136 = arith.addf %1135, %71 : vector<1x128xf32>
    %1137 = math.sqrt %1136 : vector<1x128xf32>
    %1138 = arith.addf %1134, %1137 : vector<1x128xf32>
    %1139 = tpu.reciprocal %1138 {approx = true} : vector<1x128xf32> -> vector<1x128xf32>
    %1140 = arith.mulf %1132, %1139 : vector<1x128xf32>
    %1141 = arith.select %1125, %1140, %70 : vector<1x128xi1>, vector<1x128xf32>
    %1142 = arith.mulf %1141, %1141 : vector<1x128xf32>
    %1143 = arith.addf %1142, %71 : vector<1x128xf32>
    %1144 = math.rsqrt %1143 : vector<1x128xf32>
    %1145 = arith.mulf %1141, %1144 : vector<1x128xf32>
    %1146 = arith.mulf %1144, %1144 : vector<1x128xf32>
    %1147 = arith.mulf %1145, %1145 : vector<1x128xf32>
    %1148 = arith.mulf %1144, %1145 : vector<1x128xf32>
    %1149 = arith.mulf %1148, %1097 : vector<1x128xf32>
    %1150 = arith.addf %1149, %1149 : vector<1x128xf32>
    %1151 = arith.subf %1084, %938 : vector<1x128xf32>
    %1152 = arith.mulf %1148, %1151 : vector<1x128xf32>
    %1153 = arith.subf %1146, %1147 : vector<1x128xf32>
    %1154 = arith.mulf %1153, %1097 : vector<1x128xf32>
    %1155 = arith.addf %1152, %1154 : vector<1x128xf32>
    %1156 = arith.mulf %1146, %1084 : vector<1x128xf32>
    %1157 = arith.subf %1156, %1150 : vector<1x128xf32>
    %1158 = arith.mulf %1147, %938 : vector<1x128xf32>
    %1159 = arith.addf %1157, %1158 : vector<1x128xf32>
    %1160 = arith.mulf %1147, %1084 : vector<1x128xf32>
    %1161 = arith.addf %1160, %1150 : vector<1x128xf32>
    %1162 = arith.mulf %1146, %938 : vector<1x128xf32>
    %1163 = arith.addf %1161, %1162 : vector<1x128xf32>
    %1164 = arith.mulf %1144, %1091 : vector<1x128xf32>
    %1165 = arith.mulf %1145, %1025 : vector<1x128xf32>
    %1166 = arith.subf %1164, %1165 : vector<1x128xf32>
    %1167 = arith.mulf %1145, %1091 : vector<1x128xf32>
    %1168 = arith.mulf %1144, %1025 : vector<1x128xf32>
    %1169 = arith.addf %1167, %1168 : vector<1x128xf32>
    %1170 = arith.mulf %1144, %1080 : vector<1x128xf32>
    %1171 = arith.mulf %1145, %1100 : vector<1x128xf32>
    %1172 = arith.subf %1170, %1171 : vector<1x128xf32>
    %1173 = arith.mulf %1145, %1080 : vector<1x128xf32>
    %1174 = arith.mulf %1144, %1100 : vector<1x128xf32>
    %1175 = arith.addf %1173, %1174 : vector<1x128xf32>
    %1176 = arith.mulf %1144, %1103 : vector<1x128xf32>
    %1177 = arith.mulf %1145, %956 : vector<1x128xf32>
    %1178 = arith.subf %1176, %1177 : vector<1x128xf32>
    %1179 = arith.mulf %1145, %1103 : vector<1x128xf32>
    %1180 = arith.mulf %1144, %956 : vector<1x128xf32>
    %1181 = arith.addf %1179, %1180 : vector<1x128xf32>
    %1182 = arith.mulf %1144, %1109 : vector<1x128xf32>
    %1183 = arith.mulf %1145, %962 : vector<1x128xf32>
    %1184 = arith.subf %1182, %1183 : vector<1x128xf32>
    %1185 = arith.mulf %1145, %1109 : vector<1x128xf32>
    %1186 = arith.mulf %1144, %962 : vector<1x128xf32>
    %1187 = arith.addf %1185, %1186 : vector<1x128xf32>
    %1188 = arith.mulf %1144, %1115 : vector<1x128xf32>
    %1189 = arith.mulf %1145, %968 : vector<1x128xf32>
    %1190 = arith.subf %1188, %1189 : vector<1x128xf32>
    %1191 = arith.mulf %1145, %1115 : vector<1x128xf32>
    %1192 = arith.mulf %1144, %968 : vector<1x128xf32>
    %1193 = arith.addf %1191, %1192 : vector<1x128xf32>
    %1194 = arith.mulf %1144, %1121 : vector<1x128xf32>
    %1195 = arith.mulf %1145, %974 : vector<1x128xf32>
    %1196 = arith.subf %1194, %1195 : vector<1x128xf32>
    %1197 = arith.mulf %1145, %1121 : vector<1x128xf32>
    %1198 = arith.mulf %1144, %974 : vector<1x128xf32>
    %1199 = arith.addf %1197, %1198 : vector<1x128xf32>
    %1200 = arith.cmpf one, %1094, %70 : vector<1x128xf32>
    %1201 = arith.select %1200, %1094, %71 : vector<1x128xi1>, vector<1x128xf32>
    %1202 = arith.subf %1088, %1013 : vector<1x128xf32>
    %1203 = arith.addf %1201, %1201 : vector<1x128xf32>
    %1204 = tpu.reciprocal %1203 {approx = true} : vector<1x128xf32> -> vector<1x128xf32>
    %1205 = arith.mulf %1202, %1204 : vector<1x128xf32>
    %1206 = arith.cmpf oge, %1205, %70 : vector<1x128xf32>
    %1207 = arith.select %1206, %71, %73 : vector<1x128xi1>, vector<1x128xf32>
    %1208 = math.absf %1205 : vector<1x128xf32>
    %1209 = arith.minimumf %1208, %74 : vector<1x128xf32>
    %1210 = arith.mulf %1209, %1209 : vector<1x128xf32>
    %1211 = arith.addf %1210, %71 : vector<1x128xf32>
    %1212 = math.sqrt %1211 : vector<1x128xf32>
    %1213 = arith.addf %1209, %1212 : vector<1x128xf32>
    %1214 = tpu.reciprocal %1213 {approx = true} : vector<1x128xf32> -> vector<1x128xf32>
    %1215 = arith.mulf %1207, %1214 : vector<1x128xf32>
    %1216 = arith.select %1200, %1215, %70 : vector<1x128xi1>, vector<1x128xf32>
    %1217 = arith.mulf %1216, %1216 : vector<1x128xf32>
    %1218 = arith.addf %1217, %71 : vector<1x128xf32>
    %1219 = math.rsqrt %1218 : vector<1x128xf32>
    %1220 = arith.mulf %1216, %1219 : vector<1x128xf32>
    %1221 = arith.mulf %1219, %1219 : vector<1x128xf32>
    %1222 = arith.mulf %1220, %1220 : vector<1x128xf32>
    %1223 = arith.mulf %1219, %1220 : vector<1x128xf32>
    %1224 = arith.mulf %1223, %1094 : vector<1x128xf32>
    %1225 = arith.addf %1224, %1224 : vector<1x128xf32>
    %1226 = arith.subf %1013, %1088 : vector<1x128xf32>
    %1227 = arith.mulf %1223, %1226 : vector<1x128xf32>
    %1228 = arith.subf %1221, %1222 : vector<1x128xf32>
    %1229 = arith.mulf %1228, %1094 : vector<1x128xf32>
    %1230 = arith.addf %1227, %1229 : vector<1x128xf32>
    %1231 = arith.mulf %1221, %1013 : vector<1x128xf32>
    %1232 = arith.subf %1231, %1225 : vector<1x128xf32>
    %1233 = arith.mulf %1222, %1088 : vector<1x128xf32>
    %1234 = arith.addf %1232, %1233 : vector<1x128xf32>
    %1235 = arith.mulf %1222, %1013 : vector<1x128xf32>
    %1236 = arith.addf %1235, %1225 : vector<1x128xf32>
    %1237 = arith.mulf %1221, %1088 : vector<1x128xf32>
    %1238 = arith.addf %1236, %1237 : vector<1x128xf32>
    %1239 = arith.mulf %1219, %1166 : vector<1x128xf32>
    %1240 = arith.mulf %1220, %1172 : vector<1x128xf32>
    %1241 = arith.subf %1239, %1240 : vector<1x128xf32>
    %1242 = arith.mulf %1220, %1166 : vector<1x128xf32>
    %1243 = arith.mulf %1219, %1172 : vector<1x128xf32>
    %1244 = arith.addf %1242, %1243 : vector<1x128xf32>
    %1245 = arith.mulf %1219, %1169 : vector<1x128xf32>
    %1246 = arith.mulf %1220, %1175 : vector<1x128xf32>
    %1247 = arith.subf %1245, %1246 : vector<1x128xf32>
    %1248 = arith.mulf %1220, %1169 : vector<1x128xf32>
    %1249 = arith.mulf %1219, %1175 : vector<1x128xf32>
    %1250 = arith.addf %1248, %1249 : vector<1x128xf32>
    %1251 = arith.mulf %1219, %1031 : vector<1x128xf32>
    %1252 = arith.mulf %1220, %1106 : vector<1x128xf32>
    %1253 = arith.subf %1251, %1252 : vector<1x128xf32>
    %1254 = arith.mulf %1220, %1031 : vector<1x128xf32>
    %1255 = arith.mulf %1219, %1106 : vector<1x128xf32>
    %1256 = arith.addf %1254, %1255 : vector<1x128xf32>
    %1257 = arith.mulf %1219, %1037 : vector<1x128xf32>
    %1258 = arith.mulf %1220, %1112 : vector<1x128xf32>
    %1259 = arith.subf %1257, %1258 : vector<1x128xf32>
    %1260 = arith.mulf %1220, %1037 : vector<1x128xf32>
    %1261 = arith.mulf %1219, %1112 : vector<1x128xf32>
    %1262 = arith.addf %1260, %1261 : vector<1x128xf32>
    %1263 = arith.mulf %1219, %1043 : vector<1x128xf32>
    %1264 = arith.mulf %1220, %1118 : vector<1x128xf32>
    %1265 = arith.subf %1263, %1264 : vector<1x128xf32>
    %1266 = arith.mulf %1220, %1043 : vector<1x128xf32>
    %1267 = arith.mulf %1219, %1118 : vector<1x128xf32>
    %1268 = arith.addf %1266, %1267 : vector<1x128xf32>
    %1269 = arith.mulf %1219, %1049 : vector<1x128xf32>
    %1270 = arith.mulf %1220, %1124 : vector<1x128xf32>
    %1271 = arith.subf %1269, %1270 : vector<1x128xf32>
    %1272 = arith.mulf %1220, %1049 : vector<1x128xf32>
    %1273 = arith.mulf %1219, %1124 : vector<1x128xf32>
    %1274 = arith.addf %1272, %1273 : vector<1x128xf32>
    %1275 = arith.cmpf one, %1247, %70 : vector<1x128xf32>
    %1276 = arith.select %1275, %1247, %71 : vector<1x128xi1>, vector<1x128xf32>
    %1277 = arith.subf %1163, %1234 : vector<1x128xf32>
    %1278 = arith.addf %1276, %1276 : vector<1x128xf32>
    %1279 = tpu.reciprocal %1278 {approx = true} : vector<1x128xf32> -> vector<1x128xf32>
    %1280 = arith.mulf %1277, %1279 : vector<1x128xf32>
    %1281 = arith.cmpf oge, %1280, %70 : vector<1x128xf32>
    %1282 = arith.select %1281, %71, %73 : vector<1x128xi1>, vector<1x128xf32>
    %1283 = math.absf %1280 : vector<1x128xf32>
    %1284 = arith.minimumf %1283, %74 : vector<1x128xf32>
    %1285 = arith.mulf %1284, %1284 : vector<1x128xf32>
    %1286 = arith.addf %1285, %71 : vector<1x128xf32>
    %1287 = math.sqrt %1286 : vector<1x128xf32>
    %1288 = arith.addf %1284, %1287 : vector<1x128xf32>
    %1289 = tpu.reciprocal %1288 {approx = true} : vector<1x128xf32> -> vector<1x128xf32>
    %1290 = arith.mulf %1282, %1289 : vector<1x128xf32>
    %1291 = arith.select %1275, %1290, %70 : vector<1x128xi1>, vector<1x128xf32>
    %1292 = arith.mulf %1291, %1291 : vector<1x128xf32>
    %1293 = arith.addf %1292, %71 : vector<1x128xf32>
    %1294 = math.rsqrt %1293 : vector<1x128xf32>
    %1295 = arith.mulf %1291, %1294 : vector<1x128xf32>
    %1296 = arith.mulf %1294, %1294 : vector<1x128xf32>
    %1297 = arith.mulf %1295, %1295 : vector<1x128xf32>
    %1298 = arith.mulf %1294, %1295 : vector<1x128xf32>
    %1299 = arith.mulf %1298, %1247 : vector<1x128xf32>
    %1300 = arith.addf %1299, %1299 : vector<1x128xf32>
    %1301 = arith.subf %1234, %1163 : vector<1x128xf32>
    %1302 = arith.mulf %1298, %1301 : vector<1x128xf32>
    %1303 = arith.subf %1296, %1297 : vector<1x128xf32>
    %1304 = arith.mulf %1303, %1247 : vector<1x128xf32>
    %1305 = arith.addf %1302, %1304 : vector<1x128xf32>
    %1306 = arith.mulf %1296, %1234 : vector<1x128xf32>
    %1307 = arith.subf %1306, %1300 : vector<1x128xf32>
    %1308 = arith.mulf %1297, %1163 : vector<1x128xf32>
    %1309 = arith.addf %1307, %1308 : vector<1x128xf32>
    %1310 = arith.mulf %1297, %1234 : vector<1x128xf32>
    %1311 = arith.addf %1310, %1300 : vector<1x128xf32>
    %1312 = arith.mulf %1296, %1163 : vector<1x128xf32>
    %1313 = arith.addf %1311, %1312 : vector<1x128xf32>
    %1314 = arith.mulf %1294, %1241 : vector<1x128xf32>
    %1315 = arith.mulf %1295, %1155 : vector<1x128xf32>
    %1316 = arith.subf %1314, %1315 : vector<1x128xf32>
    %1317 = arith.mulf %1295, %1241 : vector<1x128xf32>
    %1318 = arith.mulf %1294, %1155 : vector<1x128xf32>
    %1319 = arith.addf %1317, %1318 : vector<1x128xf32>
    %1320 = arith.mulf %1294, %1230 : vector<1x128xf32>
    %1321 = arith.mulf %1295, %1250 : vector<1x128xf32>
    %1322 = arith.subf %1320, %1321 : vector<1x128xf32>
    %1323 = arith.mulf %1295, %1230 : vector<1x128xf32>
    %1324 = arith.mulf %1294, %1250 : vector<1x128xf32>
    %1325 = arith.addf %1323, %1324 : vector<1x128xf32>
    %1326 = arith.mulf %1294, %1253 : vector<1x128xf32>
    %1327 = arith.mulf %1295, %1181 : vector<1x128xf32>
    %1328 = arith.subf %1326, %1327 : vector<1x128xf32>
    %1329 = arith.mulf %1295, %1253 : vector<1x128xf32>
    %1330 = arith.mulf %1294, %1181 : vector<1x128xf32>
    %1331 = arith.addf %1329, %1330 : vector<1x128xf32>
    %1332 = arith.mulf %1294, %1259 : vector<1x128xf32>
    %1333 = arith.mulf %1295, %1187 : vector<1x128xf32>
    %1334 = arith.subf %1332, %1333 : vector<1x128xf32>
    %1335 = arith.mulf %1295, %1259 : vector<1x128xf32>
    %1336 = arith.mulf %1294, %1187 : vector<1x128xf32>
    %1337 = arith.addf %1335, %1336 : vector<1x128xf32>
    %1338 = arith.mulf %1294, %1265 : vector<1x128xf32>
    %1339 = arith.mulf %1295, %1193 : vector<1x128xf32>
    %1340 = arith.subf %1338, %1339 : vector<1x128xf32>
    %1341 = arith.mulf %1295, %1265 : vector<1x128xf32>
    %1342 = arith.mulf %1294, %1193 : vector<1x128xf32>
    %1343 = arith.addf %1341, %1342 : vector<1x128xf32>
    %1344 = arith.mulf %1294, %1271 : vector<1x128xf32>
    %1345 = arith.mulf %1295, %1199 : vector<1x128xf32>
    %1346 = arith.subf %1344, %1345 : vector<1x128xf32>
    %1347 = arith.mulf %1295, %1271 : vector<1x128xf32>
    %1348 = arith.mulf %1294, %1199 : vector<1x128xf32>
    %1349 = arith.addf %1347, %1348 : vector<1x128xf32>
    %1350 = arith.cmpf one, %1325, %70 : vector<1x128xf32>
    %1351 = arith.select %1350, %1325, %71 : vector<1x128xi1>, vector<1x128xf32>
    %1352 = arith.subf %1313, %1238 : vector<1x128xf32>
    %1353 = arith.addf %1351, %1351 : vector<1x128xf32>
    %1354 = tpu.reciprocal %1353 {approx = true} : vector<1x128xf32> -> vector<1x128xf32>
    %1355 = arith.mulf %1352, %1354 : vector<1x128xf32>
    %1356 = arith.cmpf oge, %1355, %70 : vector<1x128xf32>
    %1357 = arith.select %1356, %71, %73 : vector<1x128xi1>, vector<1x128xf32>
    %1358 = math.absf %1355 : vector<1x128xf32>
    %1359 = arith.minimumf %1358, %74 : vector<1x128xf32>
    %1360 = arith.mulf %1359, %1359 : vector<1x128xf32>
    %1361 = arith.addf %1360, %71 : vector<1x128xf32>
    %1362 = math.sqrt %1361 : vector<1x128xf32>
    %1363 = arith.addf %1359, %1362 : vector<1x128xf32>
    %1364 = tpu.reciprocal %1363 {approx = true} : vector<1x128xf32> -> vector<1x128xf32>
    %1365 = arith.mulf %1357, %1364 : vector<1x128xf32>
    %1366 = arith.select %1350, %1365, %70 : vector<1x128xi1>, vector<1x128xf32>
    %1367 = arith.mulf %1366, %1366 : vector<1x128xf32>
    %1368 = arith.addf %1367, %71 : vector<1x128xf32>
    %1369 = math.rsqrt %1368 : vector<1x128xf32>
    %1370 = arith.mulf %1366, %1369 : vector<1x128xf32>
    %1371 = arith.mulf %1369, %1369 : vector<1x128xf32>
    %1372 = arith.mulf %1370, %1370 : vector<1x128xf32>
    %1373 = arith.mulf %1369, %1370 : vector<1x128xf32>
    %1374 = arith.mulf %1373, %1325 : vector<1x128xf32>
    %1375 = arith.addf %1374, %1374 : vector<1x128xf32>
    %1376 = arith.subf %1238, %1313 : vector<1x128xf32>
    %1377 = arith.mulf %1373, %1376 : vector<1x128xf32>
    %1378 = arith.subf %1371, %1372 : vector<1x128xf32>
    %1379 = arith.mulf %1378, %1325 : vector<1x128xf32>
    %1380 = arith.addf %1377, %1379 : vector<1x128xf32>
    %1381 = arith.mulf %1371, %1238 : vector<1x128xf32>
    %1382 = arith.subf %1381, %1375 : vector<1x128xf32>
    %1383 = arith.mulf %1372, %1313 : vector<1x128xf32>
    %1384 = arith.addf %1382, %1383 : vector<1x128xf32>
    %1385 = arith.mulf %1372, %1238 : vector<1x128xf32>
    %1386 = arith.addf %1385, %1375 : vector<1x128xf32>
    %1387 = arith.mulf %1371, %1313 : vector<1x128xf32>
    %1388 = arith.addf %1386, %1387 : vector<1x128xf32>
    %1389 = arith.mulf %1369, %1244 : vector<1x128xf32>
    %1390 = arith.mulf %1370, %1319 : vector<1x128xf32>
    %1391 = arith.subf %1389, %1390 : vector<1x128xf32>
    %1392 = arith.mulf %1370, %1244 : vector<1x128xf32>
    %1393 = arith.mulf %1369, %1319 : vector<1x128xf32>
    %1394 = arith.addf %1392, %1393 : vector<1x128xf32>
    %1395 = arith.mulf %1369, %1322 : vector<1x128xf32>
    %1396 = arith.mulf %1370, %1305 : vector<1x128xf32>
    %1397 = arith.subf %1395, %1396 : vector<1x128xf32>
    %1398 = arith.mulf %1370, %1322 : vector<1x128xf32>
    %1399 = arith.mulf %1369, %1305 : vector<1x128xf32>
    %1400 = arith.addf %1398, %1399 : vector<1x128xf32>
    %1401 = arith.mulf %1369, %1256 : vector<1x128xf32>
    %1402 = arith.mulf %1370, %1331 : vector<1x128xf32>
    %1403 = arith.subf %1401, %1402 : vector<1x128xf32>
    %1404 = arith.mulf %1370, %1256 : vector<1x128xf32>
    %1405 = arith.mulf %1369, %1331 : vector<1x128xf32>
    %1406 = arith.addf %1404, %1405 : vector<1x128xf32>
    %1407 = arith.mulf %1369, %1262 : vector<1x128xf32>
    %1408 = arith.mulf %1370, %1337 : vector<1x128xf32>
    %1409 = arith.subf %1407, %1408 : vector<1x128xf32>
    %1410 = arith.mulf %1370, %1262 : vector<1x128xf32>
    %1411 = arith.mulf %1369, %1337 : vector<1x128xf32>
    %1412 = arith.addf %1410, %1411 : vector<1x128xf32>
    %1413 = arith.mulf %1369, %1268 : vector<1x128xf32>
    %1414 = arith.mulf %1370, %1343 : vector<1x128xf32>
    %1415 = arith.subf %1413, %1414 : vector<1x128xf32>
    %1416 = arith.mulf %1370, %1268 : vector<1x128xf32>
    %1417 = arith.mulf %1369, %1343 : vector<1x128xf32>
    %1418 = arith.addf %1416, %1417 : vector<1x128xf32>
    %1419 = arith.mulf %1369, %1274 : vector<1x128xf32>
    %1420 = arith.mulf %1370, %1349 : vector<1x128xf32>
    %1421 = arith.subf %1419, %1420 : vector<1x128xf32>
    %1422 = arith.mulf %1370, %1274 : vector<1x128xf32>
    %1423 = arith.mulf %1369, %1349 : vector<1x128xf32>
    %1424 = arith.addf %1422, %1423 : vector<1x128xf32>
    %1425 = arith.cmpf one, %1316, %70 : vector<1x128xf32>
    %1426 = arith.select %1425, %1316, %71 : vector<1x128xi1>, vector<1x128xf32>
    %1427 = arith.subf %1309, %1159 : vector<1x128xf32>
    %1428 = arith.addf %1426, %1426 : vector<1x128xf32>
    %1429 = tpu.reciprocal %1428 {approx = true} : vector<1x128xf32> -> vector<1x128xf32>
    %1430 = arith.mulf %1427, %1429 : vector<1x128xf32>
    %1431 = arith.cmpf oge, %1430, %70 : vector<1x128xf32>
    %1432 = arith.select %1431, %71, %73 : vector<1x128xi1>, vector<1x128xf32>
    %1433 = math.absf %1430 : vector<1x128xf32>
    %1434 = arith.minimumf %1433, %74 : vector<1x128xf32>
    %1435 = arith.mulf %1434, %1434 : vector<1x128xf32>
    %1436 = arith.addf %1435, %71 : vector<1x128xf32>
    %1437 = math.sqrt %1436 : vector<1x128xf32>
    %1438 = arith.addf %1434, %1437 : vector<1x128xf32>
    %1439 = tpu.reciprocal %1438 {approx = true} : vector<1x128xf32> -> vector<1x128xf32>
    %1440 = arith.mulf %1432, %1439 : vector<1x128xf32>
    %1441 = arith.select %1425, %1440, %70 : vector<1x128xi1>, vector<1x128xf32>
    %1442 = arith.mulf %1441, %1441 : vector<1x128xf32>
    %1443 = arith.addf %1442, %71 : vector<1x128xf32>
    %1444 = math.rsqrt %1443 : vector<1x128xf32>
    %1445 = arith.mulf %1441, %1444 : vector<1x128xf32>
    %1446 = arith.mulf %1444, %1444 : vector<1x128xf32>
    %1447 = arith.mulf %1445, %1445 : vector<1x128xf32>
    %1448 = arith.mulf %1444, %1445 : vector<1x128xf32>
    %1449 = arith.mulf %1448, %1316 : vector<1x128xf32>
    %1450 = arith.addf %1449, %1449 : vector<1x128xf32>
    %1451 = arith.subf %1159, %1309 : vector<1x128xf32>
    %1452 = arith.mulf %1448, %1451 : vector<1x128xf32>
    %1453 = arith.subf %1446, %1447 : vector<1x128xf32>
    %1454 = arith.mulf %1453, %1316 : vector<1x128xf32>
    %1455 = arith.addf %1452, %1454 : vector<1x128xf32>
    %1456 = arith.mulf %1446, %1159 : vector<1x128xf32>
    %1457 = arith.subf %1456, %1450 : vector<1x128xf32>
    %1458 = arith.mulf %1447, %1309 : vector<1x128xf32>
    %1459 = arith.addf %1457, %1458 : vector<1x128xf32>
    %1460 = arith.mulf %1447, %1159 : vector<1x128xf32>
    %1461 = arith.addf %1460, %1450 : vector<1x128xf32>
    %1462 = arith.mulf %1446, %1309 : vector<1x128xf32>
    %1463 = arith.addf %1461, %1462 : vector<1x128xf32>
    %1464 = arith.mulf %1444, %1391 : vector<1x128xf32>
    %1465 = arith.mulf %1445, %1397 : vector<1x128xf32>
    %1466 = arith.subf %1464, %1465 : vector<1x128xf32>
    %1467 = arith.mulf %1445, %1391 : vector<1x128xf32>
    %1468 = arith.mulf %1444, %1397 : vector<1x128xf32>
    %1469 = arith.addf %1467, %1468 : vector<1x128xf32>
    %1470 = arith.mulf %1444, %1394 : vector<1x128xf32>
    %1471 = arith.mulf %1445, %1400 : vector<1x128xf32>
    %1472 = arith.subf %1470, %1471 : vector<1x128xf32>
    %1473 = arith.mulf %1445, %1394 : vector<1x128xf32>
    %1474 = arith.mulf %1444, %1400 : vector<1x128xf32>
    %1475 = arith.addf %1473, %1474 : vector<1x128xf32>
    %1476 = arith.mulf %1444, %1178 : vector<1x128xf32>
    %1477 = arith.mulf %1445, %1328 : vector<1x128xf32>
    %1478 = arith.subf %1476, %1477 : vector<1x128xf32>
    %1479 = arith.mulf %1445, %1178 : vector<1x128xf32>
    %1480 = arith.mulf %1444, %1328 : vector<1x128xf32>
    %1481 = arith.addf %1479, %1480 : vector<1x128xf32>
    %1482 = arith.mulf %1444, %1184 : vector<1x128xf32>
    %1483 = arith.mulf %1445, %1334 : vector<1x128xf32>
    %1484 = arith.subf %1482, %1483 : vector<1x128xf32>
    %1485 = arith.mulf %1445, %1184 : vector<1x128xf32>
    %1486 = arith.mulf %1444, %1334 : vector<1x128xf32>
    %1487 = arith.addf %1485, %1486 : vector<1x128xf32>
    %1488 = arith.mulf %1444, %1190 : vector<1x128xf32>
    %1489 = arith.mulf %1445, %1340 : vector<1x128xf32>
    %1490 = arith.subf %1488, %1489 : vector<1x128xf32>
    %1491 = arith.mulf %1445, %1190 : vector<1x128xf32>
    %1492 = arith.mulf %1444, %1340 : vector<1x128xf32>
    %1493 = arith.addf %1491, %1492 : vector<1x128xf32>
    %1494 = arith.mulf %1444, %1196 : vector<1x128xf32>
    %1495 = arith.mulf %1445, %1346 : vector<1x128xf32>
    %1496 = arith.subf %1494, %1495 : vector<1x128xf32>
    %1497 = arith.mulf %1445, %1196 : vector<1x128xf32>
    %1498 = arith.mulf %1444, %1346 : vector<1x128xf32>
    %1499 = arith.addf %1497, %1498 : vector<1x128xf32>
    %1500 = arith.cmpf one, %1466, %70 : vector<1x128xf32>
    %1501 = arith.select %1500, %1466, %71 : vector<1x128xi1>, vector<1x128xf32>
    %1502 = arith.subf %1384, %1459 : vector<1x128xf32>
    %1503 = arith.addf %1501, %1501 : vector<1x128xf32>
    %1504 = tpu.reciprocal %1503 {approx = true} : vector<1x128xf32> -> vector<1x128xf32>
    %1505 = arith.mulf %1502, %1504 : vector<1x128xf32>
    %1506 = arith.cmpf oge, %1505, %70 : vector<1x128xf32>
    %1507 = arith.select %1506, %71, %73 : vector<1x128xi1>, vector<1x128xf32>
    %1508 = math.absf %1505 : vector<1x128xf32>
    %1509 = arith.minimumf %1508, %74 : vector<1x128xf32>
    %1510 = arith.mulf %1509, %1509 : vector<1x128xf32>
    %1511 = arith.addf %1510, %71 : vector<1x128xf32>
    %1512 = math.sqrt %1511 : vector<1x128xf32>
    %1513 = arith.addf %1509, %1512 : vector<1x128xf32>
    %1514 = tpu.reciprocal %1513 {approx = true} : vector<1x128xf32> -> vector<1x128xf32>
    %1515 = arith.mulf %1507, %1514 : vector<1x128xf32>
    %1516 = arith.select %1500, %1515, %70 : vector<1x128xi1>, vector<1x128xf32>
    %1517 = arith.mulf %1516, %1516 : vector<1x128xf32>
    %1518 = arith.addf %1517, %71 : vector<1x128xf32>
    %1519 = math.rsqrt %1518 : vector<1x128xf32>
    %1520 = arith.mulf %1516, %1519 : vector<1x128xf32>
    %1521 = arith.mulf %1519, %1519 : vector<1x128xf32>
    %1522 = arith.mulf %1520, %1520 : vector<1x128xf32>
    %1523 = arith.mulf %1519, %1520 : vector<1x128xf32>
    %1524 = arith.mulf %1523, %1466 : vector<1x128xf32>
    %1525 = arith.addf %1524, %1524 : vector<1x128xf32>
    %1526 = arith.subf %1459, %1384 : vector<1x128xf32>
    %1527 = arith.mulf %1523, %1526 : vector<1x128xf32>
    %1528 = arith.subf %1521, %1522 : vector<1x128xf32>
    %1529 = arith.mulf %1528, %1466 : vector<1x128xf32>
    %1530 = arith.addf %1527, %1529 : vector<1x128xf32>
    %1531 = arith.mulf %1521, %1459 : vector<1x128xf32>
    %1532 = arith.subf %1531, %1525 : vector<1x128xf32>
    %1533 = arith.mulf %1522, %1384 : vector<1x128xf32>
    %1534 = arith.addf %1532, %1533 : vector<1x128xf32>
    %1535 = arith.mulf %1522, %1459 : vector<1x128xf32>
    %1536 = arith.addf %1535, %1525 : vector<1x128xf32>
    %1537 = arith.mulf %1521, %1384 : vector<1x128xf32>
    %1538 = arith.addf %1536, %1537 : vector<1x128xf32>
    %1539 = arith.mulf %1519, %1455 : vector<1x128xf32>
    %1540 = arith.mulf %1520, %1469 : vector<1x128xf32>
    %1541 = arith.subf %1539, %1540 : vector<1x128xf32>
    %1542 = arith.mulf %1520, %1455 : vector<1x128xf32>
    %1543 = arith.mulf %1519, %1469 : vector<1x128xf32>
    %1544 = arith.addf %1542, %1543 : vector<1x128xf32>
    %1545 = arith.mulf %1519, %1472 : vector<1x128xf32>
    %1546 = arith.mulf %1520, %1380 : vector<1x128xf32>
    %1547 = arith.subf %1545, %1546 : vector<1x128xf32>
    %1548 = arith.mulf %1520, %1472 : vector<1x128xf32>
    %1549 = arith.mulf %1519, %1380 : vector<1x128xf32>
    %1550 = arith.addf %1548, %1549 : vector<1x128xf32>
    %1551 = arith.mulf %1519, %1478 : vector<1x128xf32>
    %1552 = arith.mulf %1520, %1403 : vector<1x128xf32>
    %1553 = arith.subf %1551, %1552 : vector<1x128xf32>
    %1554 = arith.mulf %1520, %1478 : vector<1x128xf32>
    %1555 = arith.mulf %1519, %1403 : vector<1x128xf32>
    %1556 = arith.addf %1554, %1555 : vector<1x128xf32>
    %1557 = arith.mulf %1519, %1484 : vector<1x128xf32>
    %1558 = arith.mulf %1520, %1409 : vector<1x128xf32>
    %1559 = arith.subf %1557, %1558 : vector<1x128xf32>
    %1560 = arith.mulf %1520, %1484 : vector<1x128xf32>
    %1561 = arith.mulf %1519, %1409 : vector<1x128xf32>
    %1562 = arith.addf %1560, %1561 : vector<1x128xf32>
    %1563 = arith.mulf %1519, %1490 : vector<1x128xf32>
    %1564 = arith.mulf %1520, %1415 : vector<1x128xf32>
    %1565 = arith.subf %1563, %1564 : vector<1x128xf32>
    %1566 = arith.mulf %1520, %1490 : vector<1x128xf32>
    %1567 = arith.mulf %1519, %1415 : vector<1x128xf32>
    %1568 = arith.addf %1566, %1567 : vector<1x128xf32>
    %1569 = arith.mulf %1519, %1496 : vector<1x128xf32>
    %1570 = arith.mulf %1520, %1421 : vector<1x128xf32>
    %1571 = arith.subf %1569, %1570 : vector<1x128xf32>
    %1572 = arith.mulf %1520, %1496 : vector<1x128xf32>
    %1573 = arith.mulf %1519, %1421 : vector<1x128xf32>
    %1574 = arith.addf %1572, %1573 : vector<1x128xf32>
    %1575 = arith.cmpf one, %1547, %70 : vector<1x128xf32>
    %1576 = arith.select %1575, %1547, %71 : vector<1x128xi1>, vector<1x128xf32>
    %1577 = arith.subf %1388, %1534 : vector<1x128xf32>
    %1578 = arith.addf %1576, %1576 : vector<1x128xf32>
    %1579 = tpu.reciprocal %1578 {approx = true} : vector<1x128xf32> -> vector<1x128xf32>
    %1580 = arith.mulf %1577, %1579 : vector<1x128xf32>
    %1581 = arith.cmpf oge, %1580, %70 : vector<1x128xf32>
    %1582 = arith.select %1581, %71, %73 : vector<1x128xi1>, vector<1x128xf32>
    %1583 = math.absf %1580 : vector<1x128xf32>
    %1584 = arith.minimumf %1583, %74 : vector<1x128xf32>
    %1585 = arith.mulf %1584, %1584 : vector<1x128xf32>
    %1586 = arith.addf %1585, %71 : vector<1x128xf32>
    %1587 = math.sqrt %1586 : vector<1x128xf32>
    %1588 = arith.addf %1584, %1587 : vector<1x128xf32>
    %1589 = tpu.reciprocal %1588 {approx = true} : vector<1x128xf32> -> vector<1x128xf32>
    %1590 = arith.mulf %1582, %1589 : vector<1x128xf32>
    %1591 = arith.select %1575, %1590, %70 : vector<1x128xi1>, vector<1x128xf32>
    %1592 = arith.mulf %1591, %1591 : vector<1x128xf32>
    %1593 = arith.addf %1592, %71 : vector<1x128xf32>
    %1594 = math.rsqrt %1593 : vector<1x128xf32>
    %1595 = arith.mulf %1591, %1594 : vector<1x128xf32>
    %1596 = arith.mulf %1594, %1594 : vector<1x128xf32>
    %1597 = arith.mulf %1595, %1595 : vector<1x128xf32>
    %1598 = arith.mulf %1594, %1595 : vector<1x128xf32>
    %1599 = arith.mulf %1598, %1547 : vector<1x128xf32>
    %1600 = arith.addf %1599, %1599 : vector<1x128xf32>
    %1601 = arith.mulf %1596, %1534 : vector<1x128xf32>
    %1602 = arith.subf %1601, %1600 : vector<1x128xf32>
    %1603 = arith.mulf %1597, %1388 : vector<1x128xf32>
    %1604 = arith.addf %1602, %1603 : vector<1x128xf32>
    %1605 = arith.mulf %1597, %1534 : vector<1x128xf32>
    %1606 = arith.addf %1605, %1600 : vector<1x128xf32>
    %1607 = arith.mulf %1596, %1388 : vector<1x128xf32>
    %1608 = arith.addf %1606, %1607 : vector<1x128xf32>
    %1609 = arith.mulf %1595, %1541 : vector<1x128xf32>
    %1610 = arith.mulf %1594, %1475 : vector<1x128xf32>
    %1611 = arith.addf %1609, %1610 : vector<1x128xf32>
    %1612 = arith.mulf %1595, %1530 : vector<1x128xf32>
    %1613 = arith.mulf %1594, %1550 : vector<1x128xf32>
    %1614 = arith.addf %1612, %1613 : vector<1x128xf32>
    %1615 = arith.mulf %1594, %1553 : vector<1x128xf32>
    %1616 = arith.mulf %1595, %1406 : vector<1x128xf32>
    %1617 = arith.subf %1615, %1616 : vector<1x128xf32>
    %1618 = arith.mulf %1595, %1553 : vector<1x128xf32>
    %1619 = arith.mulf %1594, %1406 : vector<1x128xf32>
    %1620 = arith.addf %1618, %1619 : vector<1x128xf32>
    %1621 = arith.mulf %1594, %1559 : vector<1x128xf32>
    %1622 = arith.mulf %1595, %1412 : vector<1x128xf32>
    %1623 = arith.subf %1621, %1622 : vector<1x128xf32>
    %1624 = arith.mulf %1595, %1559 : vector<1x128xf32>
    %1625 = arith.mulf %1594, %1412 : vector<1x128xf32>
    %1626 = arith.addf %1624, %1625 : vector<1x128xf32>
    %1627 = arith.mulf %1594, %1565 : vector<1x128xf32>
    %1628 = arith.mulf %1595, %1418 : vector<1x128xf32>
    %1629 = arith.subf %1627, %1628 : vector<1x128xf32>
    %1630 = arith.mulf %1595, %1565 : vector<1x128xf32>
    %1631 = arith.mulf %1594, %1418 : vector<1x128xf32>
    %1632 = arith.addf %1630, %1631 : vector<1x128xf32>
    %1633 = arith.mulf %1594, %1571 : vector<1x128xf32>
    %1634 = arith.mulf %1595, %1424 : vector<1x128xf32>
    %1635 = arith.subf %1633, %1634 : vector<1x128xf32>
    %1636 = arith.mulf %1595, %1571 : vector<1x128xf32>
    %1637 = arith.mulf %1594, %1424 : vector<1x128xf32>
    %1638 = arith.addf %1636, %1637 : vector<1x128xf32>
    %1639 = arith.cmpf one, %1544, %70 : vector<1x128xf32>
    %1640 = arith.select %1639, %1544, %71 : vector<1x128xi1>, vector<1x128xf32>
    %1641 = arith.subf %1538, %1463 : vector<1x128xf32>
    %1642 = arith.addf %1640, %1640 : vector<1x128xf32>
    %1643 = tpu.reciprocal %1642 {approx = true} : vector<1x128xf32> -> vector<1x128xf32>
    %1644 = arith.mulf %1641, %1643 : vector<1x128xf32>
    %1645 = arith.cmpf oge, %1644, %70 : vector<1x128xf32>
    %1646 = arith.select %1645, %71, %73 : vector<1x128xi1>, vector<1x128xf32>
    %1647 = math.absf %1644 : vector<1x128xf32>
    %1648 = arith.minimumf %1647, %74 : vector<1x128xf32>
    %1649 = arith.mulf %1648, %1648 : vector<1x128xf32>
    %1650 = arith.addf %1649, %71 : vector<1x128xf32>
    %1651 = math.sqrt %1650 : vector<1x128xf32>
    %1652 = arith.addf %1648, %1651 : vector<1x128xf32>
    %1653 = tpu.reciprocal %1652 {approx = true} : vector<1x128xf32> -> vector<1x128xf32>
    %1654 = arith.mulf %1646, %1653 : vector<1x128xf32>
    %1655 = arith.select %1639, %1654, %70 : vector<1x128xi1>, vector<1x128xf32>
    %1656 = arith.mulf %1655, %1655 : vector<1x128xf32>
    %1657 = arith.addf %1656, %71 : vector<1x128xf32>
    %1658 = math.rsqrt %1657 : vector<1x128xf32>
    %1659 = arith.mulf %1655, %1658 : vector<1x128xf32>
    %1660 = arith.mulf %1658, %1658 : vector<1x128xf32>
    %1661 = arith.mulf %1659, %1659 : vector<1x128xf32>
    %1662 = arith.mulf %1658, %1659 : vector<1x128xf32>
    %1663 = arith.mulf %1662, %1544 : vector<1x128xf32>
    %1664 = arith.addf %1663, %1663 : vector<1x128xf32>
    %1665 = arith.subf %1463, %1538 : vector<1x128xf32>
    %1666 = arith.mulf %1662, %1665 : vector<1x128xf32>
    %1667 = arith.subf %1660, %1661 : vector<1x128xf32>
    %1668 = arith.mulf %1667, %1544 : vector<1x128xf32>
    %1669 = arith.addf %1666, %1668 : vector<1x128xf32>
    %1670 = arith.mulf %1660, %1463 : vector<1x128xf32>
    %1671 = arith.subf %1670, %1664 : vector<1x128xf32>
    %1672 = arith.mulf %1661, %1538 : vector<1x128xf32>
    %1673 = arith.addf %1671, %1672 : vector<1x128xf32>
    %1674 = arith.mulf %1661, %1463 : vector<1x128xf32>
    %1675 = arith.addf %1674, %1664 : vector<1x128xf32>
    %1676 = arith.mulf %1660, %1538 : vector<1x128xf32>
    %1677 = arith.addf %1675, %1676 : vector<1x128xf32>
    %1678 = arith.mulf %1658, %1611 : vector<1x128xf32>
    %1679 = arith.mulf %1659, %1614 : vector<1x128xf32>
    %1680 = arith.subf %1678, %1679 : vector<1x128xf32>
    %1681 = arith.mulf %1659, %1611 : vector<1x128xf32>
    %1682 = arith.mulf %1658, %1614 : vector<1x128xf32>
    %1683 = arith.addf %1681, %1682 : vector<1x128xf32>
    %1684 = arith.mulf %1658, %1481 : vector<1x128xf32>
    %1685 = arith.mulf %1659, %1556 : vector<1x128xf32>
    %1686 = arith.subf %1684, %1685 : vector<1x128xf32>
    %1687 = arith.mulf %1659, %1481 : vector<1x128xf32>
    %1688 = arith.mulf %1658, %1556 : vector<1x128xf32>
    %1689 = arith.addf %1687, %1688 : vector<1x128xf32>
    %1690 = arith.mulf %1658, %1487 : vector<1x128xf32>
    %1691 = arith.mulf %1659, %1562 : vector<1x128xf32>
    %1692 = arith.subf %1690, %1691 : vector<1x128xf32>
    %1693 = arith.mulf %1659, %1487 : vector<1x128xf32>
    %1694 = arith.mulf %1658, %1562 : vector<1x128xf32>
    %1695 = arith.addf %1693, %1694 : vector<1x128xf32>
    %1696 = arith.mulf %1658, %1493 : vector<1x128xf32>
    %1697 = arith.mulf %1659, %1568 : vector<1x128xf32>
    %1698 = arith.subf %1696, %1697 : vector<1x128xf32>
    %1699 = arith.mulf %1659, %1493 : vector<1x128xf32>
    %1700 = arith.mulf %1658, %1568 : vector<1x128xf32>
    %1701 = arith.addf %1699, %1700 : vector<1x128xf32>
    %1702 = arith.mulf %1658, %1499 : vector<1x128xf32>
    %1703 = arith.mulf %1659, %1574 : vector<1x128xf32>
    %1704 = arith.subf %1702, %1703 : vector<1x128xf32>
    %1705 = arith.mulf %1659, %1499 : vector<1x128xf32>
    %1706 = arith.mulf %1658, %1574 : vector<1x128xf32>
    %1707 = arith.addf %1705, %1706 : vector<1x128xf32>
    %1708 = arith.cmpf one, %1680, %70 : vector<1x128xf32>
    %1709 = arith.select %1708, %1680, %71 : vector<1x128xi1>, vector<1x128xf32>
    %1710 = arith.subf %1608, %1673 : vector<1x128xf32>
    %1711 = arith.addf %1709, %1709 : vector<1x128xf32>
    %1712 = tpu.reciprocal %1711 {approx = true} : vector<1x128xf32> -> vector<1x128xf32>
    %1713 = arith.mulf %1710, %1712 : vector<1x128xf32>
    %1714 = arith.cmpf oge, %1713, %70 : vector<1x128xf32>
    %1715 = arith.select %1714, %71, %73 : vector<1x128xi1>, vector<1x128xf32>
    %1716 = math.absf %1713 : vector<1x128xf32>
    %1717 = arith.minimumf %1716, %74 : vector<1x128xf32>
    %1718 = arith.mulf %1717, %1717 : vector<1x128xf32>
    %1719 = arith.addf %1718, %71 : vector<1x128xf32>
    %1720 = math.sqrt %1719 : vector<1x128xf32>
    %1721 = arith.addf %1717, %1720 : vector<1x128xf32>
    %1722 = tpu.reciprocal %1721 {approx = true} : vector<1x128xf32> -> vector<1x128xf32>
    %1723 = arith.mulf %1715, %1722 : vector<1x128xf32>
    %1724 = arith.select %1708, %1723, %70 : vector<1x128xi1>, vector<1x128xf32>
    %1725 = arith.mulf %1724, %1724 : vector<1x128xf32>
    %1726 = arith.addf %1725, %71 : vector<1x128xf32>
    %1727 = math.rsqrt %1726 : vector<1x128xf32>
    %1728 = arith.mulf %1724, %1727 : vector<1x128xf32>
    %1729 = arith.mulf %1727, %1727 : vector<1x128xf32>
    %1730 = arith.mulf %1728, %1728 : vector<1x128xf32>
    %1731 = arith.mulf %1727, %1728 : vector<1x128xf32>
    %1732 = arith.mulf %1731, %1680 : vector<1x128xf32>
    %1733 = arith.addf %1732, %1732 : vector<1x128xf32>
    %1734 = arith.mulf %1729, %1673 : vector<1x128xf32>
    %1735 = arith.subf %1734, %1733 : vector<1x128xf32>
    %1736 = arith.mulf %1730, %1608 : vector<1x128xf32>
    %1737 = arith.addf %1735, %1736 : vector<1x128xf32>
    %1738 = arith.mulf %1730, %1673 : vector<1x128xf32>
    %1739 = arith.addf %1738, %1733 : vector<1x128xf32>
    %1740 = arith.mulf %1729, %1608 : vector<1x128xf32>
    %1741 = arith.addf %1739, %1740 : vector<1x128xf32>
    %1742 = arith.mulf %1728, %1669 : vector<1x128xf32>
    %1743 = arith.mulf %1727, %1683 : vector<1x128xf32>
    %1744 = arith.addf %1742, %1743 : vector<1x128xf32>
    %1745 = arith.mulf %1727, %1686 : vector<1x128xf32>
    %1746 = arith.mulf %1728, %1620 : vector<1x128xf32>
    %1747 = arith.subf %1745, %1746 : vector<1x128xf32>
    %1748 = arith.mulf %1728, %1686 : vector<1x128xf32>
    %1749 = arith.mulf %1727, %1620 : vector<1x128xf32>
    %1750 = arith.addf %1748, %1749 : vector<1x128xf32>
    %1751 = arith.mulf %1727, %1692 : vector<1x128xf32>
    %1752 = arith.mulf %1728, %1626 : vector<1x128xf32>
    %1753 = arith.subf %1751, %1752 : vector<1x128xf32>
    %1754 = arith.mulf %1728, %1692 : vector<1x128xf32>
    %1755 = arith.mulf %1727, %1626 : vector<1x128xf32>
    %1756 = arith.addf %1754, %1755 : vector<1x128xf32>
    %1757 = arith.mulf %1727, %1698 : vector<1x128xf32>
    %1758 = arith.mulf %1728, %1632 : vector<1x128xf32>
    %1759 = arith.subf %1757, %1758 : vector<1x128xf32>
    %1760 = arith.mulf %1728, %1698 : vector<1x128xf32>
    %1761 = arith.mulf %1727, %1632 : vector<1x128xf32>
    %1762 = arith.addf %1760, %1761 : vector<1x128xf32>
    %1763 = arith.mulf %1727, %1704 : vector<1x128xf32>
    %1764 = arith.mulf %1728, %1638 : vector<1x128xf32>
    %1765 = arith.subf %1763, %1764 : vector<1x128xf32>
    %1766 = arith.mulf %1728, %1704 : vector<1x128xf32>
    %1767 = arith.mulf %1727, %1638 : vector<1x128xf32>
    %1768 = arith.addf %1766, %1767 : vector<1x128xf32>
    %1769 = arith.cmpf one, %1744, %70 : vector<1x128xf32>
    %1770 = arith.select %1769, %1744, %71 : vector<1x128xi1>, vector<1x128xf32>
    %1771 = arith.subf %1741, %1677 : vector<1x128xf32>
    %1772 = arith.addf %1770, %1770 : vector<1x128xf32>
    %1773 = tpu.reciprocal %1772 {approx = true} : vector<1x128xf32> -> vector<1x128xf32>
    %1774 = arith.mulf %1771, %1773 : vector<1x128xf32>
    %1775 = arith.cmpf oge, %1774, %70 : vector<1x128xf32>
    %1776 = arith.select %1775, %71, %73 : vector<1x128xi1>, vector<1x128xf32>
    %1777 = math.absf %1774 : vector<1x128xf32>
    %1778 = arith.minimumf %1777, %74 : vector<1x128xf32>
    %1779 = arith.mulf %1778, %1778 : vector<1x128xf32>
    %1780 = arith.addf %1779, %71 : vector<1x128xf32>
    %1781 = math.sqrt %1780 : vector<1x128xf32>
    %1782 = arith.addf %1778, %1781 : vector<1x128xf32>
    %1783 = tpu.reciprocal %1782 {approx = true} : vector<1x128xf32> -> vector<1x128xf32>
    %1784 = arith.mulf %1776, %1783 : vector<1x128xf32>
    %1785 = arith.select %1769, %1784, %70 : vector<1x128xi1>, vector<1x128xf32>
    %1786 = arith.mulf %1785, %1785 : vector<1x128xf32>
    %1787 = arith.addf %1786, %71 : vector<1x128xf32>
    %1788 = math.rsqrt %1787 : vector<1x128xf32>
    %1789 = arith.mulf %1785, %1788 : vector<1x128xf32>
    %1790 = arith.mulf %1788, %1788 : vector<1x128xf32>
    %1791 = arith.mulf %1789, %1789 : vector<1x128xf32>
    %1792 = arith.mulf %1788, %1789 : vector<1x128xf32>
    %1793 = arith.mulf %1792, %1744 : vector<1x128xf32>
    %1794 = arith.addf %1793, %1793 : vector<1x128xf32>
    %1795 = arith.mulf %1790, %1677 : vector<1x128xf32>
    %1796 = arith.subf %1795, %1794 : vector<1x128xf32>
    %1797 = arith.mulf %1791, %1741 : vector<1x128xf32>
    %1798 = arith.addf %1796, %1797 : vector<1x128xf32>
    %1799 = arith.mulf %1791, %1677 : vector<1x128xf32>
    %1800 = arith.addf %1799, %1794 : vector<1x128xf32>
    %1801 = arith.mulf %1790, %1741 : vector<1x128xf32>
    %1802 = arith.addf %1800, %1801 : vector<1x128xf32>
    %1803 = arith.mulf %1788, %1689 : vector<1x128xf32>
    %1804 = arith.mulf %1789, %1750 : vector<1x128xf32>
    %1805 = arith.subf %1803, %1804 : vector<1x128xf32>
    %1806 = arith.mulf %1789, %1689 : vector<1x128xf32>
    %1807 = arith.mulf %1788, %1750 : vector<1x128xf32>
    %1808 = arith.addf %1806, %1807 : vector<1x128xf32>
    %1809 = arith.mulf %1788, %1695 : vector<1x128xf32>
    %1810 = arith.mulf %1789, %1756 : vector<1x128xf32>
    %1811 = arith.subf %1809, %1810 : vector<1x128xf32>
    %1812 = arith.mulf %1789, %1695 : vector<1x128xf32>
    %1813 = arith.mulf %1788, %1756 : vector<1x128xf32>
    %1814 = arith.addf %1812, %1813 : vector<1x128xf32>
    %1815 = arith.mulf %1788, %1701 : vector<1x128xf32>
    %1816 = arith.mulf %1789, %1762 : vector<1x128xf32>
    %1817 = arith.subf %1815, %1816 : vector<1x128xf32>
    %1818 = arith.mulf %1789, %1701 : vector<1x128xf32>
    %1819 = arith.mulf %1788, %1762 : vector<1x128xf32>
    %1820 = arith.addf %1818, %1819 : vector<1x128xf32>
    %1821 = arith.mulf %1788, %1707 : vector<1x128xf32>
    %1822 = arith.mulf %1789, %1768 : vector<1x128xf32>
    %1823 = arith.subf %1821, %1822 : vector<1x128xf32>
    %1824 = arith.mulf %1789, %1707 : vector<1x128xf32>
    %1825 = arith.mulf %1788, %1768 : vector<1x128xf32>
    %1826 = arith.addf %1824, %1825 : vector<1x128xf32>
    %1827 = arith.minimumf %1604, %1737 : vector<1x128xf32>
    %1828 = arith.minimumf %1798, %1802 : vector<1x128xf32>
    %1829 = arith.minimumf %1827, %1828 : vector<1x128xf32>
    %1830 = arith.cmpf oeq, %1798, %1829 : vector<1x128xf32>
    %1831 = arith.select %1830, %1805, %1808 : vector<1x128xi1>, vector<1x128xf32>
    %1832 = arith.cmpf oeq, %1737, %1829 : vector<1x128xf32>
    %1833 = arith.select %1832, %1747, %1831 : vector<1x128xi1>, vector<1x128xf32>
    %1834 = arith.cmpf oeq, %1604, %1829 : vector<1x128xf32>
    %1835 = arith.select %1834, %1617, %1833 : vector<1x128xi1>, vector<1x128xf32>
    %1836 = arith.cmpf oeq, %1798, %1829 : vector<1x128xf32>
    %1837 = arith.select %1836, %1811, %1814 : vector<1x128xi1>, vector<1x128xf32>
    %1838 = arith.cmpf oeq, %1737, %1829 : vector<1x128xf32>
    %1839 = arith.select %1838, %1753, %1837 : vector<1x128xi1>, vector<1x128xf32>
    %1840 = arith.cmpf oeq, %1604, %1829 : vector<1x128xf32>
    %1841 = arith.select %1840, %1623, %1839 : vector<1x128xi1>, vector<1x128xf32>
    %1842 = arith.cmpf oeq, %1798, %1829 : vector<1x128xf32>
    %1843 = arith.select %1842, %1817, %1820 : vector<1x128xi1>, vector<1x128xf32>
    %1844 = arith.cmpf oeq, %1737, %1829 : vector<1x128xf32>
    %1845 = arith.select %1844, %1759, %1843 : vector<1x128xi1>, vector<1x128xf32>
    %1846 = arith.cmpf oeq, %1604, %1829 : vector<1x128xf32>
    %1847 = arith.select %1846, %1629, %1845 : vector<1x128xi1>, vector<1x128xf32>
    %1848 = arith.cmpf oeq, %1798, %1829 : vector<1x128xf32>
    %1849 = arith.select %1848, %1823, %1826 : vector<1x128xi1>, vector<1x128xf32>
    %1850 = arith.cmpf oeq, %1737, %1829 : vector<1x128xf32>
    %1851 = arith.select %1850, %1765, %1849 : vector<1x128xi1>, vector<1x128xf32>
    %1852 = arith.cmpf oeq, %1604, %1829 : vector<1x128xf32>
    %1853 = arith.select %1852, %1635, %1851 : vector<1x128xi1>, vector<1x128xf32>
    %1854 = arith.mulf %1835, %1835 : vector<1x128xf32>
    %1855 = arith.mulf %1841, %1841 : vector<1x128xf32>
    %1856 = arith.addf %1854, %1855 : vector<1x128xf32>
    %1857 = arith.mulf %1847, %1847 : vector<1x128xf32>
    %1858 = arith.addf %1856, %1857 : vector<1x128xf32>
    %1859 = arith.mulf %1853, %1853 : vector<1x128xf32>
    %1860 = arith.addf %1858, %1859 : vector<1x128xf32>
    %1861 = math.rsqrt %1860 : vector<1x128xf32>
    %1862 = arith.mulf %1835, %1861 : vector<1x128xf32>
    %1863 = arith.mulf %1841, %1861 : vector<1x128xf32>
    %1864 = arith.mulf %1847, %1861 : vector<1x128xf32>
    %1865 = arith.mulf %1853, %1861 : vector<1x128xf32>
    %c6 = arith.constant 6 : index
    %1866 = arith.index_cast %1 : i32 to index
    %c0_12 = arith.constant 0 : index
    %1867 = vector.load %arg2[%c6, %1866, %c0_12] : memref<11x1x128xf32, #tpu.memory_space<vmem>>, vector<1x1x128xf32>
    %1868 = vector.shape_cast %1867 : vector<1x1x128xf32> to vector<1x128xf32>
    %1869 = vector.shape_cast %1862 : vector<1x128xf32> to vector<1x1x128xf32>
    tpu.vector_store %arg2[%c6, %1866, %c0_12], %1869 {strides = array<i32>} : memref<11x1x128xf32, #tpu.memory_space<vmem>>, vector<1x1x128xf32>,
    %c7 = arith.constant 7 : index
    %1870 = arith.index_cast %1 : i32 to index
    %c0_13 = arith.constant 0 : index
    %1871 = vector.load %arg2[%c7, %1870, %c0_13] : memref<11x1x128xf32, #tpu.memory_space<vmem>>, vector<1x1x128xf32>
    %1872 = vector.shape_cast %1871 : vector<1x1x128xf32> to vector<1x128xf32>
    %1873 = vector.shape_cast %1863 : vector<1x128xf32> to vector<1x1x128xf32>
    tpu.vector_store %arg2[%c7, %1870, %c0_13], %1873 {strides = array<i32>} : memref<11x1x128xf32, #tpu.memory_space<vmem>>, vector<1x1x128xf32>,
    %c8 = arith.constant 8 : index
    %1874 = arith.index_cast %1 : i32 to index
    %c0_14 = arith.constant 0 : index
    %1875 = vector.load %arg2[%c8, %1874, %c0_14] : memref<11x1x128xf32, #tpu.memory_space<vmem>>, vector<1x1x128xf32>
    %1876 = vector.shape_cast %1875 : vector<1x1x128xf32> to vector<1x128xf32>
    %1877 = vector.shape_cast %1864 : vector<1x128xf32> to vector<1x1x128xf32>
    tpu.vector_store %arg2[%c8, %1874, %c0_14], %1877 {strides = array<i32>} : memref<11x1x128xf32, #tpu.memory_space<vmem>>, vector<1x1x128xf32>,
    %c9 = arith.constant 9 : index
    %1878 = arith.index_cast %1 : i32 to index
    %c0_15 = arith.constant 0 : index
    %1879 = vector.load %arg2[%c9, %1878, %c0_15] : memref<11x1x128xf32, #tpu.memory_space<vmem>>, vector<1x1x128xf32>
    %1880 = vector.shape_cast %1879 : vector<1x1x128xf32> to vector<1x128xf32>
    %1881 = vector.shape_cast %1865 : vector<1x128xf32> to vector<1x1x128xf32>
    tpu.vector_store %arg2[%c9, %1878, %c0_15], %1881 {strides = array<i32>} : memref<11x1x128xf32, #tpu.memory_space<vmem>>, vector<1x1x128xf32>,
    %c1_i32_16 = arith.constant 1 : i32
    return
  }
  func.func @transform_0(%arg0: i32) -> (i32, i32, i32) {
    %c0_i32 = arith.constant 0 : i32
    %c0_i32_0 = arith.constant 0 : i32
    %c0_i32_1 = arith.constant 0 : i32
    return %c0_i32, %arg0, %c0_i32_0 : i32, i32, i32
  }
  func.func @transform_1(%arg0: i32) -> (i32, i32, i32) {
    %c0_i32 = arith.constant 0 : i32
    %c0_i32_0 = arith.constant 0 : i32
    %c0_i32_1 = arith.constant 0 : i32
    return %c0_i32, %arg0, %c0_i32_0 : i32, i32, i32
  }
}

</mosaic_0001>

<bundles_post_ra>
// kernel: pose_post.1
= control target key start
LH: loop header
LB: loop body
LE: loop exit
PB: predicated region body
PF: predicated region fallthrough
CT: control target
= control target key end

     0   :  { %v2185_v32 = vmov -1.0   ;;  %s4088_s0 = inlined_call_operand.vmem [shape: f32[17,1,128], index: 0, kind: input, shape index: {}]   ;;  %s4089_s1 = inlined_call_operand.vmem [shape: f32[11,1,128], index: 1, kind: output, shape index: {}]  }
   0x1   :  { %v8_v0 = vld [vmem:[%s4088_s0] sm:$0x3]   ;;  %v10_v1 = vld [vmem:[%s4088_s0 + $0x2] sm:$0x1]  ;;  %v11_v2 = vld [vmem:[%s4088_s0 + $0x3] sm:$0x1] }
   0x2   :  { %25 = vst [vmem:[%s4089_s1] sm:$0x3] %v8_v0   ;;  %1973 = vst [vmem:[%s4089_s1 + $0x2] sm:$0x1] %v10_v1  ;;  %v12_v3 = vld [vmem:[%s4088_s0 + $0x4] sm:$0x1] }
   0x3   :  { %v13_v4 = vld [vmem:[%s4088_s0 + $0x5] sm:$0x1]  ;;  %v2220_v5 = vld [vmem:[%s4088_s0 + $0x7] sm:$0x1]  ;;  %v24_v6 = vld [vmem:[%s4088_s0 + $0x10] sm:$0x1] }
   0x4   :  { %v32_v7 = vmul.f32 1.442695, %v11_v2  ;;  %v37_v8 = vmul.f32 1.442695, %v12_v3  ;;  %v42_v9 = vmul.f32 1.442695, %v13_v4 }
   0x5   :  { %v47_v10 = vmul.f32 1.442695, %v24_v6  ;;  %vm52_vm0 = vcmp.ne.f32.partialorder %v2220_v5, 0.0  ;;  %v2232_v13 = vld [vmem:[%s4088_s0 + $0x6] sm:$0x1] }
   0x6   :  { %1983 = vpow2.f32 %v32_v7  ;;  %v53_v11 = vsel %vm52_vm0, %v2220_v5, 1.0  ;;  %v2237_v14 = vld [vmem:[%s4088_s0 + $0xa] sm:$0x1]  ;;  %v16_v39 = vld [vmem:[%s4088_s0 + $0x8] sm:$0x1] }
   0x7   :  { %1985 = vpow2.f32 %v37_v8  ;;  %v55_v12 = vadd.f32 %v53_v11, %v53_v11  ;;  %v54_v17 = vsub.f32 %v2237_v14, %v2232_v13  ;;  %v17_v40 = vld [vmem:[%s4088_s0 + $0x9] sm:$0x1]  ;;  %v19_v42 = vld [vmem:[%s4088_s0 + $0xb] sm:$0x1]  ;;  %v20_v43 = vld [vmem:[%s4088_s0 + $0xc] sm:$0x1]  ;;  %v84_v45 = vsub.f32 %v2232_v13, %v2237_v14 }
   0x8   :  { %1987 = vpow2.f32 %v42_v9 }
   0x9   :  { %1989 = vpow2.f32 %v47_v10 }
   0xa   :  { %1991 = vrcp.f32 %v55_v12 }
  0x10   :  { %v1984_v15 = vpop.eup %1983 }
  0x11   :  { %v1986_v16 = vpop.eup %1985  ;;  %1974 = vst [vmem:[%s4089_s1 + $0x3] sm:$0x1] %v1984_v15 }
  0x12   :  { %v1988_v18 = vpop.eup %1987  ;;  %1975 = vst [vmem:[%s4089_s1 + $0x4] sm:$0x1] %v1986_v16 }
  0x13   :  { %v1990_v19 = vpop.eup %1989  ;;  %1976 = vst [vmem:[%s4089_s1 + $0x5] sm:$0x1] %v1988_v18 }
  0x14   :  { %v1992_v20 = vpop.eup %1991  ;;  %1977 = vst [vmem:[%s4089_s1 + $0xa] sm:$0x1] %v1990_v19 }
  0x15   :  { %v57_v21 = vmul.f32 %v1992_v20, %v54_v17 }
  0x17   :  { %v60_v22 = vand.u32 2147483647, %v57_v21  ;;  %vm58_vm3 = vcmp.ge.f32.partialorder %v57_v21, 0.0 }
  0x18   :  { %v59_v33 = vsel %vm58_vm3, 1.0, %v2185_v32 }
  0x19   :  { %v61_v23 = vmin.f32 %v60_v22, 1e+18  ;;  %v2301_v22 = vld [vmem:[%s4088_s0 + $0xd] sm:$0x1] }
  0x1b   :  { %v62_v24 = vmul.f32 %v61_v23, %v61_v23 }
  0x1d   :  { %v63_v25 = vadd.f32 1.0, %v62_v24 }
  0x1f   :  { %1993 = vrsqrt.f32 %v63_v25  ;;  %vm66_vm1 = vcmp.eq.f32.partialorder %v63_v25, inf  ;;  %v69_v27 = vand.u32 2147483648, %v63_v25  ;;  %vm68_vm2 = vcmp.eq.f32.partialorder %v63_v25, 0.0 }
  0x29   :  { %v1994_v26 = vpop.eup %1993 }
  0x2a   :  { %v65_v28 = vmul.f32 %v1994_v26, %v63_v25 }
  0x2c   :  { %v67_v29 = vsel %vm66_vm1, %v63_v25, %v65_v28 }
  0x2d   :  { %v70_v30 = vsel %vm68_vm2, %v69_v27, %v67_v29 }
  0x2e   :  { %v71_v31 = vadd.f32 %v70_v30, %v61_v23 }
  0x30   :  { %1995 = vrcp.f32 %v71_v31 }
  0x3a   :  { %v1996_v34 = vpop.eup %1995 }
  0x3b   :  { %v73_v35 = vmul.f32 %v1996_v34, %v59_v33 }
  0x3d   :  { %v74_v36 = vsel %vm52_vm0, %v73_v35, 0.0 }
  0x3e   :  { %v75_v37 = vmul.f32 %v74_v36, %v74_v36 }
  0x40   :  { %v76_v38 = vadd.f32 1.0, %v75_v37 }
  0x42   :  { %1997 = vrsqrt.f32 %v76_v38 }
  0x4c   :  { %v1998_v41 = vpop.eup %1997 }
  0x4d   :  { %v78_v44 = vmul.f32 %v1998_v41, %v74_v36  ;;  %v101_v46 = vmul.f32 %v1998_v41, %v19_v42  ;;  %v97_v47 = vmul.f32 %v1998_v41, %v16_v39  ;;  %v103_v48 = vmul.f32 %v1998_v41, %v17_v40 }
  0x4e   :  { %v107_v49 = vmul.f32 %v1998_v41, %v20_v43  ;;  %v79_v50 = vmul.f32 %v1998_v41, %v1998_v41  ;;  %v111_v53 = vmul.f32 0.0, %v1998_v41 }
  0x4f   :  { %v80_v51 = vmul.f32 %v78_v44, %v78_v44  ;;  %v81_v52 = vmul.f32 %v1998_v41, %v78_v44  ;;  %v98_v54 = vmul.f32 %v78_v44, %v19_v42  ;;  %v100_v55 = vmul.f32 %v78_v44, %v16_v39 }
  0x50   :  { %v104_v56 = vmul.f32 %v78_v44, %v20_v43  ;;  %v106_v57 = vmul.f32 %v78_v44, %v17_v40  ;;  %v95_v61 = vmul.f32 %v79_v50, %v2237_v14  ;;  %v109_v6 = vmul.f32 0.0, %v78_v44  ;;  %v22_v43 = vld [vmem:[%s4088_s0 + $0xe] sm:$0x1] }
  0x51   :  { %v82_v58 = vmul.f32 %v81_v52, %v2220_v5  ;;  %v85_v59 = vmul.f32 %v84_v45, %v81_v52  ;;  %v86_v60 = vsub.f32 %v79_v50, %v80_v51  ;;  %v93_v62 = vmul.f32 %v80_v51, %v2232_v13 }
  0x52   :  { %v2273_v63 = vsub.f32 %v97_v47, %v98_v54  ;;  %v102_v0 = vadd.f32 %v101_v46, %v100_v55  ;;  %v105_v1 = vsub.f32 %v103_v48, %v104_v56  ;;  %v2276_v4 = vadd.f32 %v107_v49, %v106_v57 }
  0x53   :  { %v83_v2 = vadd.f32 %v82_v58, %v82_v58  ;;  %v87_v3 = vmul.f32 %v86_v60, %v2220_v5  ;;  %v89_v7 = vmul.f32 %v79_v50, %v2232_v13  ;;  %v2279_v8 = vadd.f32 %v111_v53, %v78_v44 }
  0x54   :  { %v2281_v9 = vsub.f32 %v111_v53, %v78_v44  ;;  %vm117_vm4 = vcmp.ne.f32.partialorder %v2273_v63, 0.0  ;;  %v110_v12 = vsub.f32 %v1998_v41, %v109_v6  ;;  %v2284_v15 = vadd.f32 %v1998_v41, %v109_v6 }
  0x55   :  { %v88_v10 = vadd.f32 %v87_v3, %v85_v59  ;;  %v94_v11 = vadd.f32 %v93_v62, %v83_v2  ;;  %v2286_v16 = vsub.f32 %v111_v53, %v109_v6  ;;  %v2288_v17 = vadd.f32 %v111_v53, %v109_v6 }
  0x56   :  { %v118_v5 = vsel %vm117_vm4, %v2273_v63, 1.0  ;;  %v90_v19 = vsub.f32 %v89_v7, %v83_v2  ;;  %v91_v20 = vmul.f32 %v80_v51, %v2237_v14 }
  0x57   :  { %v2293_v13 = vadd.f32 %v95_v61, %v94_v11  ;;  %v120_v18 = vadd.f32 %v118_v5, %v118_v5 }
  0x58   :  { %v2296_v21 = vadd.f32 %v91_v20, %v90_v19 }
  0x59   :  { %1999 = vrcp.f32 %v120_v18 }
  0x5a   :  { %v119_v23 = vsub.f32 %v2301_v22, %v2296_v21 }
  0x63   :  { %v2000_v24 = vpop.eup %1999 }
  0x64   :  { %v122_v25 = vmul.f32 %v2000_v24, %v119_v23 }
  0x66   :  { %v125_v26 = vand.u32 2147483647, %v122_v25  ;;  %vm123_vm7 = vcmp.ge.f32.partialorder %v122_v25, 0.0 }
  0x67   :  { %v124_v36 = vsel %vm123_vm7, 1.0, %v2185_v32 }
  0x68   :  { %v126_v27 = vmin.f32 %v125_v26, 1e+18 }
  0x6a   :  { %v127_v28 = vmul.f32 %v126_v27, %v126_v27 }
  0x6c   :  { %v128_v29 = vadd.f32 1.0, %v127_v28 }
  0x6e   :  { %2001 = vrsqrt.f32 %v128_v29  ;;  %vm131_vm5 = vcmp.eq.f32.partialorder %v128_v29, inf  ;;  %v134_v14 = vand.u32 2147483648, %v128_v29  ;;  %vm133_vm6 = vcmp.eq.f32.partialorder %v128_v29, 0.0 }
  0x78   :  { %v2002_v30 = vpop.eup %2001 }
  0x79   :  { %v130_v31 = vmul.f32 %v2002_v30, %v128_v29 }
  0x7b   :  { %v132_v33 = vsel %vm131_vm5, %v128_v29, %v130_v31 }
  0x7c   :  { %v135_v34 = vsel %vm133_vm6, %v134_v14, %v132_v33 }
  0x7d   :  { %v136_v35 = vadd.f32 %v135_v34, %v126_v27  ;;  %v2368_v34 = vld [vmem:[%s4088_s0 + $0xf] sm:$0x1] }
  0x7f   :  { %2003 = vrcp.f32 %v136_v35 }
  0x89   :  { %v2004_v37 = vpop.eup %2003 }
  0x8a   :  { %v138_v38 = vmul.f32 %v2004_v37, %v124_v36 }
  0x8c   :  { %v139_v39 = vsel %vm117_vm4, %v138_v38, 0.0 }
  0x8d   :  { %v140_v40 = vmul.f32 %v139_v39, %v139_v39 }
  0x8f   :  { %v141_v41 = vadd.f32 1.0, %v140_v40 }
  0x91   :  { %2005 = vrsqrt.f32 %v141_v41 }
  0x9b   :  { %v2006_v42 = vpop.eup %2005 }
  0x9c   :  { %v143_v44 = vmul.f32 %v2006_v42, %v139_v39  ;;  %v162_v45 = vmul.f32 %v2006_v42, %v88_v10  ;;  %v166_v46 = vmul.f32 %v2006_v42, %v102_v0  ;;  %v168_v47 = vmul.f32 %v2006_v42, %v105_v1 }
  0x9d   :  { %v172_v48 = vmul.f32 %v2006_v42, %v22_v43  ;;  %v174_v49 = vmul.f32 %v2006_v42, %v110_v12  ;;  %v178_v58 = vmul.f32 0.0, %v2006_v42  ;;  %v2319_v59 = vmul.f32 %v2006_v42, %v2006_v42 }
  0x9e   :  { %v2311_v50 = vmul.f32 %v2006_v42, %v143_v44  ;;  %v163_v51 = vmul.f32 %v143_v44, %v102_v0  ;;  %v165_v52 = vmul.f32 %v143_v44, %v88_v10  ;;  %v169_v53 = vmul.f32 %v143_v44, %v22_v43 }
  0x9f   :  { %v171_v54 = vmul.f32 %v143_v44, %v105_v1  ;;  %v175_v62 = vmul.f32 0.0, %v143_v44  ;;  %v177_v2 = vmul.f32 %v143_v44, %v110_v12  ;;  %v180_v0 = vmul.f32 %v2006_v42, %v2281_v9 }
  0xa0   :  { %v2313_v55 = vsub.f32 %v162_v45, %v163_v51  ;;  %v2315_v56 = vadd.f32 %v166_v46, %v165_v52  ;;  %v2317_v57 = vsub.f32 %v168_v47, %v169_v53  ;;  %v147_v60 = vmul.f32 %v2311_v50, %v2273_v63 }
  0xa1   :  { %v2323_v61 = vadd.f32 %v172_v48, %v171_v54  ;;  %v182_v1 = vmul.f32 %v143_v44, %v2281_v9  ;;  %v184_v3 = vmul.f32 %v2006_v42, %v2286_v16  ;;  %v2328_v6 = vmul.f32 %v143_v44, %v143_v44 }
  0xa2   :  { %v2330_v7 = vsub.f32 %v174_v49, %v175_v62  ;;  %v2332_v10 = vadd.f32 %v178_v58, %v177_v2  ;;  %v2334_v11 = vsub.f32 %v180_v0, %v175_v62  ;;  %v148_v19 = vadd.f32 %v147_v60, %v147_v60 }
  0xa3   :  { %v2336_v5 = vadd.f32 %v182_v1, %v178_v58  ;;  %v2338_v18 = vsub.f32 %v184_v3, %v143_v44  ;;  %v154_v12 = vmul.f32 %v2319_v59, %v2296_v21  ;;  %v186_v9 = vmul.f32 %v143_v44, %v2286_v16 }
  0xa4   :  { %v2343_v20 = vsub.f32 %v184_v3, %v175_v62  ;;  %v158_v23 = vmul.f32 %v2328_v6, %v2296_v21  ;;  %vm190_vm8 = vcmp.ne.f32.partialorder %v2317_v57, 0.0  ;;  %vm265_vm9 = vcmp.ne.f32.partialorder %v2315_v56, 0.0 }
  0xa5   :  { %v2349_v24 = vadd.f32 %v2006_v42, %v186_v9  ;;  %v2351_v25 = vadd.f32 %v186_v9, %v178_v58  ;;  %v191_v26 = vsel %vm190_vm8, %v2317_v57, 1.0  ;;  %v266_v16 = vsel %vm265_vm9, %v2315_v56, 1.0 }
  0xa6   :  { %v193_v27 = vadd.f32 %v191_v26, %v191_v26  ;;  %v155_v28 = vsub.f32 %v154_v12, %v148_v19  ;;  %v156_v29 = vmul.f32 %v2328_v6, %v2301_v22  ;;  %v268_v30 = vadd.f32 %v266_v16, %v266_v16 }
  0xa7   :  { %v159_v14 = vadd.f32 %v158_v23, %v148_v19  ;;  %v160_v31 = vmul.f32 %v2319_v59, %v2301_v22 }
  0xa8   :  { %2007 = vrcp.f32 %v193_v27  ;;  %v2363_v33 = vadd.f32 %v156_v29, %v155_v28 }
  0xa9   :  { %2009 = vrcp.f32 %v268_v30  ;;  %v2370_v35 = vadd.f32 %v160_v31, %v159_v14 }
  0xaa   :  { %v192_v36 = vsub.f32 %v2368_v34, %v2363_v33 }
  0xab   :  { %v267_v37 = vsub.f32 %v2370_v35, %v2293_v13 }
  0xb2   :  { %v2008_v38 = vpop.eup %2007 }
  0xb3   :  { %v2010_v39 = vpop.eup %2009  ;;  %v195_v40 = vmul.f32 %v2008_v38, %v192_v36  ;;  %v149_v36 = vsub.f32 %v2296_v21, %v2301_v22 }
  0xb4   :  { %v270_v41 = vmul.f32 %v2010_v39, %v267_v37  ;;  %v151_v37 = vsub.f32 %v2319_v59, %v2328_v6 }
  0xb5   :  { %v198_v42 = vand.u32 2147483647, %v195_v40  ;;  %vm196_vm14 = vcmp.ge.f32.partialorder %v195_v40, 0.0  ;;  %v150_v39 = vmul.f32 %v149_v36, %v2311_v50 }
  0xb6   :  { %v273_v43 = vand.u32 2147483647, %v270_v41  ;;  %vm271_vm15 = vcmp.ge.f32.partialorder %v270_v41, 0.0  ;;  %v197_v12 = vsel %vm196_vm14, 1.0, %v2185_v32  ;;  %v152_v40 = vmul.f32 %v151_v37, %v2273_v63 }
  0xb7   :  { %v199_v44 = vmin.f32 %v198_v42, 1e+18  ;;  %v272_v9 = vsel %vm271_vm15, 1.0, %v2185_v32 }
  0xb8   :  { %v274_v45 = vmin.f32 %v273_v43, 1e+18  ;;  %v153_v42 = vadd.f32 %v152_v40, %v150_v39 }
  0xb9   :  { %v200_v46 = vmul.f32 %v199_v44, %v199_v44 }
  0xba   :  { %v275_v47 = vmul.f32 %v274_v45, %v274_v45 }
  0xbb   :  { %v201_v48 = vadd.f32 1.0, %v200_v46 }
  0xbc   :  { %v276_v49 = vadd.f32 1.0, %v275_v47 }
  0xbd   :  { %2011 = vrsqrt.f32 %v201_v48  ;;  %vm204_vm10 = vcmp.eq.f32.partialorder %v201_v48, inf  ;;  %v207_v52 = vand.u32 2147483648, %v201_v48  ;;  %vm206_vm11 = vcmp.eq.f32.partialorder %v201_v48, 0.0 }
  0xbe   :  { %2013 = vrsqrt.f32 %v276_v49  ;;  %vm279_vm12 = vcmp.eq.f32.partialorder %v276_v49, inf  ;;  %v282_v58 = vand.u32 2147483648, %v276_v49  ;;  %vm281_vm13 = vcmp.eq.f32.partialorder %v276_v49, 0.0 }
  0xc7   :  { %v2012_v51 = vpop.eup %2011 }
  0xc8   :  { %v2014_v53 = vpop.eup %2013  ;;  %v203_v54 = vmul.f32 %v2012_v51, %v201_v48 }
  0xc9   :  { %v278_v60 = vmul.f32 %v2014_v53, %v276_v49 }
  0xca   :  { %v205_v62 = vsel %vm204_vm10, %v201_v48, %v203_v54 }
  0xcb   :  { %v208_v2 = vsel %vm206_vm11, %v207_v52, %v205_v62  ;;  %v280_v0 = vsel %vm279_vm12, %v276_v49, %v278_v60 }
  0xcc   :  { %v209_v1 = vadd.f32 %v208_v2, %v199_v44  ;;  %v283_v3 = vsel %vm281_vm13, %v282_v58, %v280_v0  ;;  %v222_v44 = vsub.f32 %v2363_v33, %v2368_v34 }
  0xcd   :  { %v284_v19 = vadd.f32 %v283_v3, %v274_v45 }
  0xce   :  { %2015 = vrcp.f32 %v209_v1 }
  0xcf   :  { %2017 = vrcp.f32 %v284_v19 }
  0xd8   :  { %v2016_v23 = vpop.eup %2015 }
  0xd9   :  { %v2018_v26 = vpop.eup %2017  ;;  %v211_v27 = vmul.f32 %v2016_v23, %v197_v12 }
  0xda   :  { %v286_v16 = vmul.f32 %v2018_v26, %v272_v9 }
  0xdb   :  { %v212_v28 = vsel %vm190_vm8, %v211_v27, 0.0 }
  0xdc   :  { %v213_v29 = vmul.f32 %v212_v28, %v212_v28  ;;  %v287_v14 = vsel %vm265_vm9, %v286_v16, 0.0 }
  0xdd   :  { %v288_v31 = vmul.f32 %v287_v14, %v287_v14 }
  0xde   :  { %v214_v30 = vadd.f32 1.0, %v213_v29 }
  0xdf   :  { %v289_v38 = vadd.f32 1.0, %v288_v31 }
  0xe0   :  { %2019 = vrsqrt.f32 %v214_v30 }
  0xe1   :  { %2021 = vrsqrt.f32 %v289_v38 }
  0xea   :  { %v2020_v41 = vpop.eup %2019 }
  0xeb   :  { %v216_v43 = vmul.f32 %v2020_v41, %v212_v28  ;;  %v235_v45 = vmul.f32 %v2020_v41, %v2313_v55  ;;  %v2391_v46 = vmul.f32 %v2020_v41, %v2020_v41  ;;  %v239_v21 = vmul.f32 %v2020_v41, %v2276_v4  ;;  %v2022_v26 = vpop.eup %2021 }
  0xec   :  { %v241_v22 = vmul.f32 %v2020_v41, %v153_v42  ;;  %v247_v59 = vmul.f32 %v2020_v41, %v2330_v7  ;;  %v245_v63 = vmul.f32 %v2020_v41, %v2323_v61  ;;  %v251_v47 = vmul.f32 0.0, %v2020_v41 }
  0xed   :  { %v218_v6 = vmul.f32 %v216_v43, %v216_v43  ;;  %v219_v50 = vmul.f32 %v2020_v41, %v216_v43  ;;  %v236_v48 = vmul.f32 %v216_v43, %v2276_v4  ;;  %v238_v49 = vmul.f32 %v216_v43, %v2313_v55 }
  0xee   :  { %v242_v51 = vmul.f32 %v216_v43, %v2323_v61  ;;  %v244_v52 = vmul.f32 %v216_v43, %v153_v42  ;;  %v227_v60 = vmul.f32 %v2391_v46, %v2363_v33  ;;  %v248_v61 = vmul.f32 0.0, %v216_v43 }
  0xef   :  { %v220_v53 = vmul.f32 %v219_v50, %v2317_v57  ;;  %v223_v54 = vmul.f32 %v222_v44, %v219_v50  ;;  %v224_v58 = vsub.f32 %v2391_v46, %v218_v6  ;;  %v229_v62 = vmul.f32 %v218_v6, %v2368_v34 }
  0xf0   :  { %v237_v2 = vsub.f32 %v235_v45, %v236_v48  ;;  %v240_v0 = vadd.f32 %v239_v21, %v238_v49  ;;  %v243_v1 = vsub.f32 %v241_v22, %v242_v51  ;;  %v246_v55 = vadd.f32 %v245_v63, %v244_v52 }
  0xf1   :  { %v2404_v3 = vadd.f32 %v220_v53, %v220_v53  ;;  %v225_v4 = vmul.f32 %v224_v58, %v2317_v57  ;;  %v250_v19 = vmul.f32 %v216_v43, %v2330_v7  ;;  %v253_v12 = vmul.f32 %v2020_v41, %v2334_v11 }
  0xf2   :  { %v255_v9 = vmul.f32 %v216_v43, %v2334_v11  ;;  %v257_v23 = vmul.f32 %v2020_v41, %v2338_v18  ;;  %v2414_v28 = vsub.f32 %v247_v59, %v248_v61  ;;  %v259_v11 = vmul.f32 %v216_v43, %v2338_v18 }
  0xf3   :  { %v2411_v27 = vadd.f32 %v225_v4, %v223_v54  ;;  %v228_v16 = vsub.f32 %v227_v60, %v2404_v3  ;;  %v2416_v29 = vadd.f32 %v251_v47, %v250_v19  ;;  %v2418_v57 = vsub.f32 %v253_v12, %v248_v61 }
  0xf4   :  { %v2420_v30 = vadd.f32 %v255_v9, %v251_v47  ;;  %v2422_v7 = vsub.f32 %v257_v23, %v248_v61  ;;  %v261_v36 = vmul.f32 %v2020_v41, %v2343_v20  ;;  %v263_v37 = vmul.f32 %v216_v43, %v2343_v20 }
  0xf5   :  { %v2424_v31 = vadd.f32 %v229_v62, %v228_v16  ;;  %v291_v38 = vmul.f32 %v2022_v26, %v287_v14  ;;  %v310_v39 = vmul.f32 %v2022_v26, %v237_v2  ;;  %v2429_v40 = vadd.f32 %v259_v11, %v251_v47 }
  0xf6   :  { %v2431_v42 = vsub.f32 %v261_v36, %v216_v43  ;;  %v314_v44 = vmul.f32 %v2022_v26, %v243_v1  ;;  %v316_v45 = vmul.f32 %v2022_v26, %v240_v0  ;;  %v2433_v21 = vadd.f32 %v2020_v41, %v263_v37 }
  0xf7   :  { %v2435_v22 = vmul.f32 %v2022_v26, %v291_v38  ;;  %v2437_v59 = vmul.f32 %v291_v38, %v291_v38  ;;  %v311_v50 = vmul.f32 %v291_v38, %v243_v1  ;;  %v313_v18 = vmul.f32 %v291_v38, %v237_v2 }
  0xf8   :  { %v317_v63 = vmul.f32 %v291_v38, %v246_v55  ;;  %v2439_v48 = vmul.f32 %v2022_v26, %v2022_v26  ;;  %v319_v52 = vmul.f32 %v291_v38, %v240_v0  ;;  %v320_v53 = vmul.f32 %v2022_v26, %v246_v55 }
  0xf9   :  { %v295_v20 = vmul.f32 %v2435_v22, %v2315_v56  ;;  %v306_v14 = vmul.f32 %v2437_v59, %v2293_v13  ;;  %v2445_v43 = vsub.f32 %v310_v39, %v311_v50  ;;  %v2447_v47 = vadd.f32 %v314_v44, %v313_v18 }
  0xfa   :  { %v2449_v41 = vsub.f32 %v316_v45, %v317_v63  ;;  %v308_v51 = vmul.f32 %v2439_v48, %v2370_v35  ;;  %v322_v54 = vmul.f32 %v2022_v26, %v2279_v8  ;;  %v323_v58 = vmul.f32 %v291_v38, %v2332_v10 }
  0xfb   :  { %v296_v49 = vadd.f32 %v295_v20, %v295_v20  ;;  %v325_v60 = vmul.f32 %v291_v38, %v2279_v8  ;;  %v326_v62 = vmul.f32 %v2022_v26, %v2332_v10  ;;  %v231_v2 = vmul.f32 %v218_v6, %v2363_v33 }
  0xfc   :  { %v2458_v4 = vadd.f32 %v320_v53, %v319_v52  ;;  %v2460_v61 = vsub.f32 %v322_v54, %v323_v58  ;;  %v328_v0 = vmul.f32 %v2022_v26, %v2284_v15  ;;  %v329_v55 = vmul.f32 %v291_v38, %v2336_v5 }
  0xfd   :  { %v307_v1 = vadd.f32 %v306_v14, %v296_v49  ;;  %v2462_v19 = vadd.f32 %v326_v62, %v325_v60  ;;  %v302_v12 = vmul.f32 %v2439_v48, %v2293_v13  ;;  %v331_v8 = vmul.f32 %v291_v38, %v2284_v15 }
  0xfe   :  { %v332_v10 = vmul.f32 %v2022_v26, %v2336_v5  ;;  %v2472_v33 = vsub.f32 %v328_v0, %v329_v55  ;;  %v334_v6 = vmul.f32 %v2022_v26, %v2288_v17  ;;  %v335_v23 = vmul.f32 %v291_v38, %v2349_v24 }
  0xff   :  { %v2468_v9 = vadd.f32 %v308_v51, %v307_v1  ;;  %v337_v16 = vmul.f32 %v291_v38, %v2288_v17  ;;  %v338_v36 = vmul.f32 %v2022_v26, %v2349_v24  ;;  %v340_v37 = vmul.f32 %v291_v38, %v2351_v25 }
 0x100   :  { %v2477_v11 = vadd.f32 %v332_v10, %v331_v8  ;;  %v342_v39 = vmul.f32 %v2022_v26, %v2351_v25  ;;  %v2482_v44 = vsub.f32 %v334_v6, %v335_v23  ;;  %vm344_vm0 = vcmp.ne.f32.partialorder %v2449_v41, 0.0 }
 0x101   :  { %v2485_v15 = vadd.f32 %v338_v36, %v337_v16  ;;  %v2487_v5 = vsub.f32 %v334_v6, %v340_v37  ;;  %v345_v17 = vsel %vm344_vm0, %v2449_v41, 1.0  ;;  %v232_v24 = vadd.f32 %v231_v2, %v2404_v3 }
 0x102   :  { %v2489_v45 = vadd.f32 %v342_v39, %v337_v16  ;;  %v347_v50 = vadd.f32 %v345_v17, %v345_v17  ;;  %v233_v25 = vmul.f32 %v2391_v46, %v2368_v34  ;;  %v303_v26 = vsub.f32 %v302_v12, %v296_v49 }
 0x103   :  { %v304_v38 = vmul.f32 %v2437_v59, %v2370_v35  ;;  %v297_v10 = vsub.f32 %v2293_v13, %v2370_v35  ;;  %v299_v6 = vsub.f32 %v2439_v48, %v2437_v59 }
 0x104   :  { %2023 = vrcp.f32 %v347_v50  ;;  %v2499_v18 = vadd.f32 %v233_v25, %v232_v24 }
 0x105   :  { %v2501_v63 = vadd.f32 %v304_v38, %v303_v26  ;;  %v298_v23 = vmul.f32 %v297_v10, %v2435_v22  ;;  %v300_v16 = vmul.f32 %v299_v6, %v2315_v56 }
 0x107   :  { %v346_v20 = vsub.f32 %v2499_v18, %v2501_v63  ;;  %v301_v37 = vadd.f32 %v300_v16, %v298_v23 }
 0x10e   :  { %v2024_v14 = vpop.eup %2023 }
 0x10f   :  { %v349_v51 = vmul.f32 %v2024_v14, %v346_v20 }
 0x111   :  { %v352_v52 = vand.u32 2147483647, %v349_v51  ;;  %vm350_vm3 = vcmp.ge.f32.partialorder %v349_v51, 0.0 }
 0x112   :  { %v351_v2 = vsel %vm350_vm3, 1.0, %v2185_v32 }
 0x113   :  { %v353_v53 = vmin.f32 %v352_v52, 1e+18 }
 0x115   :  { %v354_v3 = vmul.f32 %v353_v53, %v353_v53 }
 0x117   :  { %v355_v54 = vadd.f32 1.0, %v354_v3 }
 0x119   :  { %2025 = vrsqrt.f32 %v355_v54  ;;  %vm358_vm1 = vcmp.eq.f32.partialorder %v355_v54, inf  ;;  %v361_v46 = vand.u32 2147483648, %v355_v54  ;;  %vm360_vm2 = vcmp.eq.f32.partialorder %v355_v54, 0.0 }
 0x123   :  { %v2026_v34 = vpop.eup %2025 }
 0x124   :  { %v357_v49 = vmul.f32 %v2026_v34, %v355_v54 }
 0x126   :  { %v359_v58 = vsel %vm358_vm1, %v355_v54, %v357_v49 }
 0x127   :  { %v362_v60 = vsel %vm360_vm2, %v361_v46, %v359_v58 }
 0x128   :  { %v363_v62 = vadd.f32 %v362_v60, %v353_v53 }
 0x12a   :  { %2027 = vrcp.f32 %v363_v62 }
 0x134   :  { %v2028_v1 = vpop.eup %2027 }
 0x135   :  { %v365_v0 = vmul.f32 %v2028_v1, %v351_v2 }
 0x137   :  { %v366_v55 = vsel %vm344_vm0, %v365_v0, 0.0 }
 0x138   :  { %v367_v12 = vmul.f32 %v366_v55, %v366_v55 }
 0x13a   :  { %v368_v8 = vadd.f32 1.0, %v367_v12 }
 0x13c   :  { %2029 = vrsqrt.f32 %v368_v8 }
 0x146   :  { %v2030_v36 = vpop.eup %2029 }
 0x147   :  { %v370_v39 = vmul.f32 %v2030_v36, %v366_v55  ;;  %v393_v17 = vmul.f32 %v2030_v36, %v2411_v27  ;;  %v389_v50 = vmul.f32 %v2030_v36, %v2445_v43  ;;  %v395_v24 = vmul.f32 %v2030_v36, %v301_v37 }
 0x148   :  { %v401_v25 = vmul.f32 %v2030_v36, %v2460_v61  ;;  %v405_v26 = vmul.f32 %v2030_v36, %v2416_v29  ;;  %v399_v35 = vmul.f32 %v2030_v36, %v2458_v4  ;;  %v2541_v34 = vmul.f32 %v2030_v36, %v2030_v36 }
 0x149   :  { %v2518_v13 = vmul.f32 %v2030_v36, %v370_v39  ;;  %v390_v22 = vmul.f32 %v370_v39, %v2411_v27  ;;  %v392_v56 = vmul.f32 %v370_v39, %v2445_v43  ;;  %v396_v59 = vmul.f32 %v370_v39, %v2458_v4 }
 0x14a   :  { %v398_v48 = vmul.f32 %v370_v39, %v301_v37  ;;  %v2530_v51 = vmul.f32 %v370_v39, %v370_v39  ;;  %v402_v27 = vmul.f32 %v370_v39, %v2416_v29  ;;  %v404_v43 = vmul.f32 %v370_v39, %v2460_v61 }
 0x14b   :  { %v2524_v38 = vsub.f32 %v389_v50, %v390_v22  ;;  %v2526_v20 = vadd.f32 %v393_v17, %v392_v56  ;;  %v2528_v14 = vsub.f32 %v395_v24, %v396_v59  ;;  %v374_v52 = vmul.f32 %v2518_v13, %v2449_v41 }
 0x14c   :  { %v2534_v53 = vadd.f32 %v399_v35, %v398_v48  ;;  %v407_v4 = vmul.f32 %v2030_v36, %v2472_v33  ;;  %v408_v3 = vmul.f32 %v370_v39, %v2420_v30  ;;  %v410_v54 = vmul.f32 %v370_v39, %v2472_v33 }
 0x14d   :  { %v2543_v46 = vsub.f32 %v401_v25, %v402_v27  ;;  %v2545_v49 = vadd.f32 %v405_v26, %v404_v43  ;;  %v411_v60 = vmul.f32 %v2030_v36, %v2420_v30  ;;  %v413_v29 = vmul.f32 %v2030_v36, %v2482_v44 }
 0x14e   :  { %v2547_v58 = vsub.f32 %v407_v4, %v408_v3  ;;  %v375_v62 = vadd.f32 %v374_v52, %v374_v52  ;;  %v385_v61 = vmul.f32 %v2530_v51, %v2501_v63  ;;  %v414_v2 = vmul.f32 %v370_v39, %v2429_v40 }
 0x14f   :  { %v416_v33 = vmul.f32 %v370_v39, %v2482_v44  ;;  %v2555_v1 = vadd.f32 %v411_v60, %v410_v54  ;;  %v417_v0 = vmul.f32 %v2030_v36, %v2429_v40  ;;  %v419_v55 = vmul.f32 %v2030_v36, %v2487_v5 }
 0x150   :  { %v420_v12 = vmul.f32 %v370_v39, %v2433_v21  ;;  %v2560_v8 = vsub.f32 %v413_v29, %v414_v2  ;;  %v422_v30 = vmul.f32 %v370_v39, %v2487_v5  ;;  %v423_v10 = vmul.f32 %v2030_v36, %v2433_v21 }
 0x151   :  { %vm425_vm4 = vcmp.ne.f32.partialorder %v2534_v53, 0.0  ;;  %v381_v6 = vmul.f32 %v2541_v34, %v2501_v63  ;;  %v2567_v44 = vadd.f32 %v417_v0, %v416_v33  ;;  %vm506_vm5 = vcmp.ne.f32.partialorder %v2524_v38, 0.0 }
 0x152   :  { %v2569_v23 = vsub.f32 %v419_v55, %v420_v12  ;;  %v426_v40 = vsel %vm425_vm4, %v2534_v53, 1.0  ;;  %v2574_v16 = vadd.f32 %v423_v10, %v422_v30  ;;  %v386_v5 = vadd.f32 %v385_v61, %v375_v62 }
 0x153   :  { %v428_v37 = vadd.f32 %v426_v40, %v426_v40  ;;  %v387_v21 = vmul.f32 %v2541_v34, %v2499_v18  ;;  %v507_v36 = vsel %vm506_vm5, %v2524_v38, 1.0  ;;  %v382_v17 = vsub.f32 %v381_v6, %v375_v62 }
 0x154   :  { %v509_v39 = vadd.f32 %v507_v36, %v507_v36  ;;  %v383_v50 = vmul.f32 %v2530_v51, %v2499_v18 }
 0x155   :  { %2031 = vrcp.f32 %v428_v37  ;;  %v2584_v24 = vadd.f32 %v387_v21, %v386_v5 }
 0x156   :  { %2033 = vrcp.f32 %v509_v39  ;;  %v2586_v25 = vadd.f32 %v383_v50, %v382_v17 }
 0x157   :  { %v427_v26 = vsub.f32 %v2584_v24, %v2468_v9 }
 0x158   :  { %v508_v35 = vsub.f32 %v2586_v25, %v2424_v31 }
 0x15f   :  { %v2032_v22 = vpop.eup %2031 }
 0x160   :  { %v430_v56 = vmul.f32 %v2032_v22, %v427_v26  ;;  %v2034_v59 = vpop.eup %2033 }
 0x161   :  { %v511_v52 = vmul.f32 %v2034_v59, %v508_v35 }
 0x162   :  { %v433_v48 = vand.u32 2147483647, %v430_v56  ;;  %vm431_vm10 = vcmp.ge.f32.partialorder %v430_v56, 0.0  ;;  %v376_v56 = vsub.f32 %v2501_v63, %v2499_v18 }
 0x163   :  { %v514_v43 = vand.u32 2147483647, %v511_v52  ;;  %v432_v5 = vsel %vm431_vm10, 1.0, %v2185_v32  ;;  %vm512_vm11 = vcmp.ge.f32.partialorder %v511_v52, 0.0 }
 0x164   :  { %v434_v27 = vmin.f32 %v433_v48, 1e+18  ;;  %v513_v39 = vsel %vm512_vm11, 1.0, %v2185_v32  ;;  %v378_v48 = vsub.f32 %v2541_v34, %v2530_v51 }
 0x165   :  { %v515_v3 = vmin.f32 %v514_v43, 1e+18 }
 0x166   :  { %v435_v4 = vmul.f32 %v434_v27, %v434_v27  ;;  %v379_v43 = vmul.f32 %v378_v48, %v2449_v41 }
 0x167   :  { %v516_v60 = vmul.f32 %v515_v3, %v515_v3 }
 0x168   :  { %v436_v54 = vadd.f32 1.0, %v435_v4 }
 0x169   :  { %v517_v29 = vadd.f32 1.0, %v516_v60 }
 0x16a   :  { %2035 = vrsqrt.f32 %v436_v54  ;;  %vm439_vm6 = vcmp.eq.f32.partialorder %v436_v54, inf  ;;  %v442_v61 = vand.u32 2147483648, %v436_v54  ;;  %vm441_vm7 = vcmp.eq.f32.partialorder %v436_v54, 0.0 }
 0x16b   :  { %2037 = vrsqrt.f32 %v517_v29  ;;  %vm520_vm8 = vcmp.eq.f32.partialorder %v517_v29, inf  ;;  %v523_v55 = vand.u32 2147483648, %v517_v29  ;;  %vm522_vm9 = vcmp.eq.f32.partialorder %v517_v29, 0.0 }
 0x174   :  { %v2036_v62 = vpop.eup %2035 }
 0x175   :  { %v438_v2 = vmul.f32 %v2036_v62, %v436_v54  ;;  %v2038_v33 = vpop.eup %2037 }
 0x176   :  { %v519_v30 = vmul.f32 %v2038_v33, %v517_v29 }
 0x177   :  { %v440_v0 = vsel %vm439_vm6, %v436_v54, %v438_v2 }
 0x178   :  { %v443_v12 = vsel %vm441_vm7, %v442_v61, %v440_v0  ;;  %v521_v6 = vsel %vm520_vm8, %v517_v29, %v519_v30 }
 0x179   :  { %v444_v10 = vadd.f32 %v443_v12, %v434_v27  ;;  %v524_v40 = vsel %vm522_vm9, %v523_v55, %v521_v6  ;;  %v377_v27 = vmul.f32 %v376_v56, %v2518_v13 }
 0x17a   :  { %v525_v37 = vadd.f32 %v524_v40, %v515_v3 }
 0x17b   :  { %2039 = vrcp.f32 %v444_v10  ;;  %v380_v54 = vadd.f32 %v379_v43, %v377_v27 }
 0x17c   :  { %2041 = vrcp.f32 %v525_v37 }
 0x185   :  { %v2040_v21 = vpop.eup %2039 }
 0x186   :  { %v446_v36 = vmul.f32 %v2040_v21, %v432_v5  ;;  %v2042_v17 = vpop.eup %2041 }
 0x187   :  { %v527_v35 = vmul.f32 %v2042_v17, %v513_v39 }
 0x188   :  { %v447_v50 = vsel %vm425_vm4, %v446_v36, 0.0 }
 0x189   :  { %v448_v26 = vmul.f32 %v447_v50, %v447_v50  ;;  %v528_v59 = vsel %vm506_vm5, %v527_v35, 0.0 }
 0x18a   :  { %v529_v52 = vmul.f32 %v528_v59, %v528_v59 }
 0x18b   :  { %v449_v22 = vadd.f32 1.0, %v448_v26 }
 0x18c   :  { %v530_v4 = vadd.f32 1.0, %v529_v52  ;;  %v538_v52 = vsub.f32 %v2424_v31, %v2586_v25 }
 0x18d   :  { %2043 = vrsqrt.f32 %v449_v22 }
 0x18e   :  { %2045 = vrsqrt.f32 %v530_v4 }
 0x197   :  { %v2044_v3 = vpop.eup %2043 }
 0x198   :  { %v451_v60 = vmul.f32 %v2044_v3, %v447_v50  ;;  %v470_v29 = vmul.f32 %v2044_v3, %v2447_v47  ;;  %v474_v62 = vmul.f32 %v2044_v3, %v2526_v20  ;;  %v476_v61 = vmul.f32 %v2044_v3, %v2528_v14  ;;  %v2634_v26 = vpop.eup %2045 }
 0x199   :  { %v480_v18 = vmul.f32 %v2044_v3, %v380_v54  ;;  %v482_v63 = vmul.f32 %v2044_v3, %v2462_v19  ;;  %v486_v51 = vmul.f32 %v2044_v3, %v2545_v49  ;;  %v2616_v55 = vmul.f32 %v2044_v3, %v2044_v3 }
 0x19a   :  { %v2609_v34 = vmul.f32 %v451_v60, %v451_v60  ;;  %v2611_v13 = vmul.f32 %v2044_v3, %v451_v60  ;;  %v471_v41 = vmul.f32 %v451_v60, %v2526_v20  ;;  %v473_v2 = vmul.f32 %v451_v60, %v2447_v47 }
 0x19b   :  { %v477_v33 = vmul.f32 %v451_v60, %v380_v54  ;;  %v479_v0 = vmul.f32 %v451_v60, %v2528_v14  ;;  %v468_v20 = vmul.f32 %v2616_v55, %v2584_v24  ;;  %v483_v5 = vmul.f32 %v451_v60, %v2545_v49 }
 0x19c   :  { %v455_v12 = vmul.f32 %v2611_v13, %v2534_v53  ;;  %v466_v30 = vmul.f32 %v2609_v34, %v2468_v9  ;;  %v472_v10 = vsub.f32 %v470_v29, %v471_v41  ;;  %v475_v6 = vadd.f32 %v474_v62, %v473_v2 }
 0x19d   :  { %v478_v40 = vsub.f32 %v476_v61, %v477_v33  ;;  %v481_v47 = vadd.f32 %v480_v18, %v479_v0  ;;  %v485_v14 = vmul.f32 %v451_v60, %v2462_v19  ;;  %v488_v21 = vmul.f32 %v2044_v3, %v2477_v11 }
 0x19e   :  { %v2622_v37 = vadd.f32 %v455_v12, %v455_v12  ;;  %v489_v36 = vmul.f32 %v451_v60, %v2555_v1  ;;  %v491_v39 = vmul.f32 %v451_v60, %v2477_v11  ;;  %v2632_v50 = vsub.f32 %v482_v63, %v483_v5 }
 0x19f   :  { %v2636_v35 = vadd.f32 %v486_v51, %v485_v14  ;;  %v492_v49 = vmul.f32 %v2044_v3, %v2555_v1  ;;  %v494_v19 = vmul.f32 %v2044_v3, %v2485_v15  ;;  %v495_v48 = vmul.f32 %v451_v60, %v2567_v44 }
 0x1a0   :  { %v467_v17 = vadd.f32 %v466_v30, %v2622_v37  ;;  %v2638_v22 = vsub.f32 %v488_v21, %v489_v36  ;;  %v497_v11 = vmul.f32 %v451_v60, %v2485_v15  ;;  %v498_v43 = vmul.f32 %v2044_v3, %v2567_v44 }
 0x1a1   :  { %v2648_v27 = vadd.f32 %v492_v49, %v491_v39  ;;  %v500_v4 = vmul.f32 %v2044_v3, %v2489_v45  ;;  %v501_v54 = vmul.f32 %v451_v60, %v2574_v16  ;;  %v2653_v1 = vsub.f32 %v494_v19, %v495_v48 }
 0x1a2   :  { %v2642_v56 = vadd.f32 %v468_v20, %v467_v17  ;;  %v503_v29 = vmul.f32 %v451_v60, %v2489_v45  ;;  %v504_v62 = vmul.f32 %v2044_v3, %v2574_v16  ;;  %v532_v61 = vmul.f32 %v2634_v26, %v528_v59 }
 0x1a3   :  { %v2658_v15 = vadd.f32 %v498_v43, %v497_v11  ;;  %v2660_v18 = vsub.f32 %v500_v4, %v501_v54  ;;  %v533_v63 = vmul.f32 %v2634_v26, %v2634_v26  ;;  %v551_v44 = vmul.f32 %v2634_v26, %v472_v10 }
 0x1a4   :  { %v2665_v51 = vadd.f32 %v504_v62, %v503_v29  ;;  %v534_v41 = vmul.f32 %v532_v61, %v532_v61  ;;  %v535_v2 = vmul.f32 %v2634_v26, %v532_v61  ;;  %v552_v33 = vmul.f32 %v532_v61, %v478_v40 }
 0x1a5   :  { %v554_v45 = vmul.f32 %v532_v61, %v472_v10  ;;  %v555_v16 = vmul.f32 %v2634_v26, %v478_v40  ;;  %v549_v0 = vmul.f32 %v533_v63, %v2586_v25  ;;  %v557_v5 = vmul.f32 %v2634_v26, %v475_v6 }
 0x1a6   :  { %v536_v59 = vmul.f32 %v535_v2, %v2524_v38  ;;  %v539_v3 = vmul.f32 %v538_v52, %v535_v2  ;;  %v540_v60 = vsub.f32 %v533_v63, %v534_v41  ;;  %v547_v12 = vmul.f32 %v534_v41, %v2424_v31 }
 0x1a7   :  { %v2672_v30 = vsub.f32 %v551_v44, %v552_v33  ;;  %v2674_v20 = vadd.f32 %v555_v16, %v554_v45  ;;  %v558_v10 = vmul.f32 %v532_v61, %v481_v47  ;;  %v560_v36 = vmul.f32 %v532_v61, %v475_v6 }
 0x1a8   :  { %v537_v14 = vadd.f32 %v536_v59, %v536_v59  ;;  %v541_v21 = vmul.f32 %v540_v60, %v2524_v38  ;;  %v561_v40 = vmul.f32 %v2634_v26, %v481_v47  ;;  %v563_v39 = vmul.f32 %v2634_v26, %v2414_v28 }
 0x1a9   :  { %v564_v17 = vmul.f32 %v532_v61, %v2543_v46  ;;  %v566_v49 = vmul.f32 %v532_v61, %v2414_v28  ;;  %v462_v19 = vmul.f32 %v2616_v55, %v2468_v9  ;;  %v2687_v52 = vsub.f32 %v557_v5, %v558_v10 }
 0x1aa   :  { %v2685_v48 = vadd.f32 %v541_v21, %v539_v3  ;;  %v548_v11 = vadd.f32 %v547_v12, %v537_v14  ;;  %v2689_v38 = vadd.f32 %v561_v40, %v560_v36  ;;  %v567_v47 = vmul.f32 %v2634_v26, %v2543_v46 }
 0x1ab   :  { %v2691_v6 = vsub.f32 %v563_v39, %v564_v17  ;;  %v569_v43 = vmul.f32 %v2634_v26, %v2418_v57  ;;  %v543_v28 = vmul.f32 %v533_v63, %v2424_v31  ;;  %v570_v54 = vmul.f32 %v532_v61, %v2547_v58 }
 0x1ac   :  { %v2698_v4 = vadd.f32 %v549_v0, %v548_v11  ;;  %v572_v29 = vmul.f32 %v532_v61, %v2418_v57  ;;  %v2702_v62 = vadd.f32 %v567_v47, %v566_v49  ;;  %v573_v44 = vmul.f32 %v2634_v26, %v2547_v58 }
 0x1ad   :  { %v575_v2 = vmul.f32 %v2634_v26, %v2422_v7  ;;  %v576_v46 = vmul.f32 %v532_v61, %v2560_v8  ;;  %v2709_v33 = vsub.f32 %v569_v43, %v570_v54  ;;  %v578_v31 = vmul.f32 %v532_v61, %v2422_v7 }
 0x1ae   :  { %v579_v63 = vmul.f32 %v2634_v26, %v2560_v8  ;;  %v581_v57 = vmul.f32 %v2634_v26, %v2431_v42  ;;  %v2716_v45 = vadd.f32 %v573_v44, %v572_v29  ;;  %v582_v58 = vmul.f32 %v532_v61, %v2569_v23 }
 0x1af   :  { %v2718_v16 = vsub.f32 %v575_v2, %v576_v46  ;;  %v584_v59 = vmul.f32 %v532_v61, %v2431_v42  ;;  %v585_v60 = vmul.f32 %v2634_v26, %v2569_v23  ;;  %vm587_vm12 = vcmp.ne.f32.partialorder %v2672_v30, 0.0 }
 0x1b0   :  { %v2722_v3 = vadd.f32 %v579_v63, %v578_v31  ;;  %v2727_v7 = vsub.f32 %v581_v57, %v582_v58  ;;  %v588_v8 = vsel %vm587_vm12, %v2672_v30, 1.0  ;;  %v463_v5 = vsub.f32 %v462_v19, %v2622_v37 }
 0x1b1   :  { %v2732_v0 = vadd.f32 %v585_v60, %v584_v59  ;;  %v590_v12 = vadd.f32 %v588_v8, %v588_v8  ;;  %v464_v42 = vmul.f32 %v2609_v34, %v2584_v24  ;;  %v544_v61 = vsub.f32 %v543_v28, %v537_v14 }
 0x1b2   :  { %v545_v21 = vmul.f32 %v534_v41, %v2586_v25  ;;  %v457_v46 = vsub.f32 %v2468_v9, %v2584_v24  ;;  %v459_v31 = vsub.f32 %v2616_v55, %v2609_v34 }
 0x1b3   :  { %2047 = vrcp.f32 %v590_v12  ;;  %v2738_v23 = vadd.f32 %v464_v42, %v463_v5 }
 0x1b4   :  { %v2740_v26 = vadd.f32 %v545_v21, %v544_v61  ;;  %v458_v63 = vmul.f32 %v457_v46, %v2611_v13  ;;  %v460_v57 = vmul.f32 %v459_v31, %v2534_v53 }
 0x1b6   :  { %v589_v10 = vsub.f32 %v2738_v23, %v2740_v26  ;;  %v461_v59 = vadd.f32 %v460_v57, %v458_v63 }
 0x1bd   :  { %v2048_v36 = vpop.eup %2047 }
 0x1be   :  { %v592_v40 = vmul.f32 %v2048_v36, %v589_v10 }
 0x1c0   :  { %v595_v39 = vand.u32 2147483647, %v592_v40  ;;  %vm593_vm15 = vcmp.ge.f32.partialorder %v592_v40, 0.0 }
 0x1c1   :  { %v594_v43 = vsel %vm593_vm15, 1.0, %v2185_v32 }
 0x1c2   :  { %v596_v17 = vmin.f32 %v595_v39, 1e+18 }
 0x1c4   :  { %v597_v49 = vmul.f32 %v596_v17, %v596_v17 }
 0x1c6   :  { %v598_v37 = vadd.f32 1.0, %v597_v49 }
 0x1c8   :  { %2049 = vrsqrt.f32 %v598_v37  ;;  %vm601_vm13 = vcmp.eq.f32.partialorder %v598_v37, inf  ;;  %v604_v14 = vand.u32 2147483648, %v598_v37  ;;  %vm603_vm14 = vcmp.eq.f32.partialorder %v598_v37, 0.0 }
 0x1d2   :  { %v2050_v19 = vpop.eup %2049 }
 0x1d3   :  { %v600_v11 = vmul.f32 %v2050_v19, %v598_v37 }
 0x1d5   :  { %v602_v25 = vsel %vm601_vm13, %v598_v37, %v600_v11 }
 0x1d6   :  { %v605_v41 = vsel %vm603_vm14, %v604_v14, %v602_v25 }
 0x1d7   :  { %v606_v47 = vadd.f32 %v605_v41, %v596_v17 }
 0x1d9   :  { %2051 = vrcp.f32 %v606_v47 }
 0x1e3   :  { %v2052_v28 = vpop.eup %2051 }
 0x1e4   :  { %v608_v54 = vmul.f32 %v2052_v28, %v594_v43 }
 0x1e6   :  { %v609_v29 = vsel %vm587_vm12, %v608_v54, 0.0 }
 0x1e7   :  { %v610_v44 = vmul.f32 %v609_v29, %v609_v29 }
 0x1e9   :  { %v611_v2 = vadd.f32 1.0, %v610_v44 }
 0x1eb   :  { %2053 = vrsqrt.f32 %v611_v2 }
 0x1f5   :  { %v2054_v58 = vpop.eup %2053 }
 0x1f6   :  { %v613_v60 = vmul.f32 %v2054_v58, %v609_v29  ;;  %v632_v8 = vmul.f32 %v2054_v58, %v2685_v48  ;;  %v636_v12 = vmul.f32 %v2054_v58, %v2674_v20  ;;  %v638_v5 = vmul.f32 %v2054_v58, %v2687_v52 }
 0x1f7   :  { %v642_v42 = vmul.f32 %v2054_v58, %v461_v59  ;;  %v644_v61 = vmul.f32 %v2054_v58, %v2691_v6  ;;  %v648_v9 = vmul.f32 %v2054_v58, %v2632_v50  ;;  %v2769_v40 = vmul.f32 %v2054_v58, %v2054_v58 }
 0x1f8   :  { %v2758_v24 = vmul.f32 %v2054_v58, %v613_v60  ;;  %v633_v34 = vmul.f32 %v613_v60, %v2674_v20  ;;  %v635_v53 = vmul.f32 %v613_v60, %v2685_v48  ;;  %v639_v13 = vmul.f32 %v613_v60, %v461_v59 }
 0x1f9   :  { %v641_v55 = vmul.f32 %v613_v60, %v2687_v52  ;;  %v645_v20 = vmul.f32 %v613_v60, %v2632_v50  ;;  %v647_v48 = vmul.f32 %v613_v60, %v2691_v6  ;;  %v650_v49 = vmul.f32 %v2054_v58, %v2709_v33 }
 0x1fa   :  { %v2763_v21 = vsub.f32 %v632_v8, %v633_v34  ;;  %v2765_v10 = vadd.f32 %v636_v12, %v635_v53  ;;  %v2767_v36 = vsub.f32 %v638_v5, %v639_v13  ;;  %v617_v39 = vmul.f32 %v2758_v24, %v2672_v30 }
 0x1fb   :  { %v2773_v17 = vadd.f32 %v642_v42, %v641_v55  ;;  %v651_v52 = vmul.f32 %v613_v60, %v2638_v22  ;;  %v653_v37 = vmul.f32 %v613_v60, %v2709_v33  ;;  %v2780_v19 = vmul.f32 %v613_v60, %v613_v60 }
 0x1fc   :  { %v2782_v14 = vsub.f32 %v644_v61, %v645_v20  ;;  %v2784_v11 = vadd.f32 %v648_v9, %v647_v48  ;;  %v654_v41 = vmul.f32 %v2054_v58, %v2638_v22  ;;  %v656_v50 = vmul.f32 %v2054_v58, %v2718_v16 }
 0x1fd   :  { %v2786_v25 = vsub.f32 %v650_v49, %v651_v52  ;;  %v618_v47 = vadd.f32 %v617_v39, %v617_v39  ;;  %v624_v6 = vmul.f32 %v2769_v40, %v2740_v26  ;;  %v657_v43 = vmul.f32 %v613_v60, %v2653_v1 }
 0x1fe   :  { %v659_v33 = vmul.f32 %v613_v60, %v2718_v16  ;;  %v2794_v28 = vadd.f32 %v654_v41, %v653_v37  ;;  %v660_v54 = vmul.f32 %v2054_v58, %v2653_v1  ;;  %v662_v29 = vmul.f32 %v2054_v58, %v2727_v7 }
 0x1ff   :  { %v663_v44 = vmul.f32 %v613_v60, %v2660_v18  ;;  %v2799_v2 = vsub.f32 %v656_v50, %v657_v43  ;;  %v665_v22 = vmul.f32 %v613_v60, %v2727_v7  ;;  %v666_v46 = vmul.f32 %v2054_v58, %v2660_v18 }
 0x200   :  { %vm668_vm0 = vcmp.ne.f32.partialorder %v2767_v36, 0.0  ;;  %v628_v31 = vmul.f32 %v2780_v19, %v2740_v26  ;;  %v2806_v16 = vadd.f32 %v660_v54, %v659_v33  ;;  %vm749_vm1 = vcmp.ne.f32.partialorder %v2765_v10, 0.0 }
 0x201   :  { %v2808_v63 = vsub.f32 %v662_v29, %v663_v44  ;;  %v669_v1 = vsel %vm668_vm0, %v2767_v36, 1.0  ;;  %v2813_v57 = vadd.f32 %v666_v46, %v665_v22  ;;  %v625_v7 = vsub.f32 %v624_v6, %v618_v47 }
 0x202   :  { %v671_v59 = vadd.f32 %v669_v1, %v669_v1  ;;  %v626_v18 = vmul.f32 %v2780_v19, %v2738_v23  ;;  %v750_v58 = vsel %vm749_vm1, %v2765_v10, 1.0  ;;  %v629_v8 = vadd.f32 %v628_v31, %v618_v47 }
 0x203   :  { %v752_v60 = vadd.f32 %v750_v58, %v750_v58  ;;  %v630_v12 = vmul.f32 %v2769_v40, %v2738_v23 }
 0x204   :  { %2055 = vrcp.f32 %v671_v59  ;;  %v2823_v5 = vadd.f32 %v626_v18, %v625_v7 }
 0x205   :  { %2057 = vrcp.f32 %v752_v60  ;;  %v2825_v42 = vadd.f32 %v630_v12, %v629_v8 }
 0x206   :  { %v670_v61 = vsub.f32 %v2642_v56, %v2823_v5 }
 0x207   :  { %v751_v9 = vsub.f32 %v2825_v42, %v2698_v4 }
 0x20e   :  { %v2056_v34 = vpop.eup %2055 }
 0x20f   :  { %v673_v53 = vmul.f32 %v2056_v34, %v670_v61  ;;  %v2058_v13 = vpop.eup %2057 }
 0x210   :  { %v754_v39 = vmul.f32 %v2058_v13, %v751_v9 }
 0x211   :  { %v676_v55 = vand.u32 2147483647, %v673_v53  ;;  %vm674_vm6 = vcmp.ge.f32.partialorder %v673_v53, 0.0  ;;  %v619_v53 = vsub.f32 %v2740_v26, %v2738_v23 }
 0x212   :  { %v757_v48 = vand.u32 2147483647, %v754_v39  ;;  %v675_v7 = vsel %vm674_vm6, 1.0, %v2185_v32  ;;  %vm755_vm7 = vcmp.ge.f32.partialorder %v754_v39, 0.0 }
 0x213   :  { %v677_v20 = vmin.f32 %v676_v55, 1e+18  ;;  %v756_v60 = vsel %vm755_vm7, 1.0, %v2185_v32  ;;  %v621_v55 = vsub.f32 %v2769_v40, %v2780_v19 }
 0x214   :  { %v758_v52 = vmin.f32 %v757_v48, 1e+18 }
 0x215   :  { %v678_v49 = vmul.f32 %v677_v20, %v677_v20  ;;  %v622_v48 = vmul.f32 %v621_v55, %v2672_v30 }
 0x216   :  { %v759_v41 = vmul.f32 %v758_v52, %v758_v52 }
 0x217   :  { %v679_v37 = vadd.f32 1.0, %v678_v49 }
 0x218   :  { %v760_v50 = vadd.f32 1.0, %v759_v41 }
 0x219   :  { %2059 = vrsqrt.f32 %v679_v37  ;;  %vm682_vm2 = vcmp.eq.f32.partialorder %v679_v37, inf  ;;  %v685_v6 = vand.u32 2147483648, %v679_v37  ;;  %vm684_vm3 = vcmp.eq.f32.partialorder %v679_v37, 0.0 }
 0x21a   :  { %2061 = vrsqrt.f32 %v760_v50  ;;  %vm763_vm4 = vcmp.eq.f32.partialorder %v760_v50, inf  ;;  %v766_v29 = vand.u32 2147483648, %v760_v50  ;;  %vm765_vm5 = vcmp.eq.f32.partialorder %v760_v50, 0.0 }
 0x223   :  { %v2060_v47 = vpop.eup %2059 }
 0x224   :  { %v681_v43 = vmul.f32 %v2060_v47, %v679_v37  ;;  %v2062_v33 = vpop.eup %2061 }
 0x225   :  { %v762_v22 = vmul.f32 %v2062_v33, %v760_v50 }
 0x226   :  { %v683_v54 = vsel %vm682_vm2, %v679_v37, %v681_v43 }
 0x227   :  { %v686_v44 = vsel %vm684_vm3, %v685_v6, %v683_v54  ;;  %v764_v31 = vsel %vm763_vm4, %v760_v50, %v762_v22  ;;  %v700_v50 = vsub.f32 %v2823_v5, %v2642_v56 }
 0x228   :  { %v687_v46 = vadd.f32 %v686_v44, %v677_v20  ;;  %v767_v1 = vsel %vm765_vm5, %v766_v29, %v764_v31  ;;  %v620_v20 = vmul.f32 %v619_v53, %v2758_v24 }
 0x229   :  { %v768_v59 = vadd.f32 %v767_v1, %v758_v52 }
 0x22a   :  { %2063 = vrcp.f32 %v687_v46  ;;  %v623_v37 = vadd.f32 %v622_v48, %v620_v20 }
 0x22b   :  { %2065 = vrcp.f32 %v768_v59 }
 0x234   :  { %v2064_v18 = vpop.eup %2063 }
 0x235   :  { %v689_v58 = vmul.f32 %v2064_v18, %v675_v7  ;;  %v2066_v8 = vpop.eup %2065 }
 0x236   :  { %v770_v9 = vmul.f32 %v2066_v8, %v756_v60 }
 0x237   :  { %v690_v12 = vsel %vm668_vm0, %v689_v58, 0.0 }
 0x238   :  { %v691_v61 = vmul.f32 %v690_v12, %v690_v12  ;;  %v771_v13 = vsel %vm749_vm1, %v770_v9, 0.0 }
 0x239   :  { %v772_v39 = vmul.f32 %v771_v13, %v771_v13 }
 0x23a   :  { %v692_v34 = vadd.f32 1.0, %v691_v61 }
 0x23b   :  { %v773_v49 = vadd.f32 1.0, %v772_v39 }
 0x23c   :  { %2067 = vrsqrt.f32 %v692_v34 }
 0x23d   :  { %2069 = vrsqrt.f32 %v773_v49 }
 0x246   :  { %v2068_v52 = vpop.eup %2067 }
 0x247   :  { %v694_v41 = vmul.f32 %v2068_v52, %v690_v12  ;;  %v713_v47 = vmul.f32 %v2068_v52, %v2763_v21  ;;  %v717_v23 = vmul.f32 %v2068_v52, %v2689_v38  ;;  %v719_v26 = vmul.f32 %v2068_v52, %v623_v37  ;;  %v2877_v39 = vpop.eup %2069 }
 0x248   :  { %v725_v40 = vmul.f32 %v2068_v52, %v2782_v14  ;;  %v729_v19 = vmul.f32 %v2068_v52, %v2636_v35  ;;  %v2849_v24 = vmul.f32 %v2068_v52, %v2068_v52  ;;  %v723_v43 = vmul.f32 %v2068_v52, %v2773_v17 }
 0x249   :  { %v2851_v30 = vmul.f32 %v694_v41, %v694_v41  ;;  %v697_v6 = vmul.f32 %v2068_v52, %v694_v41  ;;  %v714_v33 = vmul.f32 %v694_v41, %v2689_v38  ;;  %v716_v54 = vmul.f32 %v694_v41, %v2763_v21 }
 0x24a   :  { %v720_v29 = vmul.f32 %v694_v41, %v2773_v17  ;;  %v722_v44 = vmul.f32 %v694_v41, %v623_v37  ;;  %v705_v1 = vmul.f32 %v2849_v24, %v2823_v5  ;;  %v726_v60 = vmul.f32 %v694_v41, %v2636_v35 }
 0x24b   :  { %v698_v22 = vmul.f32 %v697_v6, %v2767_v36  ;;  %v701_v46 = vmul.f32 %v700_v50, %v697_v6  ;;  %v702_v31 = vsub.f32 %v2849_v24, %v2851_v30  ;;  %v707_v59 = vmul.f32 %v2851_v30, %v2642_v56 }
 0x24c   :  { %v715_v7 = vsub.f32 %v713_v47, %v714_v33  ;;  %v718_v18 = vadd.f32 %v717_v23, %v716_v54  ;;  %v721_v38 = vsub.f32 %v719_v26, %v720_v29  ;;  %v724_v17 = vadd.f32 %v723_v43, %v722_v44 }
 0x24d   :  { %v2864_v58 = vadd.f32 %v698_v22, %v698_v22  ;;  %v703_v21 = vmul.f32 %v702_v31, %v2767_v36  ;;  %v728_v8 = vmul.f32 %v694_v41, %v2782_v14  ;;  %v731_v12 = vmul.f32 %v2068_v52, %v2786_v25 }
 0x24e   :  { %v732_v61 = vmul.f32 %v694_v41, %v2648_v27  ;;  %v734_v9 = vmul.f32 %v694_v41, %v2786_v25  ;;  %v2875_v55 = vsub.f32 %v725_v40, %v726_v60  ;;  %v735_v35 = vmul.f32 %v2068_v52, %v2648_v27 }
 0x24f   :  { %v2872_v34 = vadd.f32 %v703_v21, %v701_v46  ;;  %v706_v53 = vsub.f32 %v705_v1, %v2864_v58  ;;  %v2879_v36 = vadd.f32 %v729_v19, %v728_v8  ;;  %v737_v14 = vmul.f32 %v2068_v52, %v2799_v2 }
 0x250   :  { %v2881_v20 = vsub.f32 %v731_v12, %v732_v61  ;;  %v738_v25 = vmul.f32 %v694_v41, %v2658_v15  ;;  %v740_v49 = vmul.f32 %v694_v41, %v2799_v2  ;;  %v2889_v37 = vadd.f32 %v735_v35, %v734_v9 }
 0x251   :  { %v2885_v48 = vadd.f32 %v707_v59, %v706_v53  ;;  %v741_v50 = vmul.f32 %v2068_v52, %v2658_v15  ;;  %v743_v47 = vmul.f32 %v2068_v52, %v2808_v63  ;;  %v744_v23 = vmul.f32 %v694_v41, %v2665_v51 }
 0x252   :  { %v2894_v26 = vsub.f32 %v737_v14, %v738_v25  ;;  %v746_v27 = vmul.f32 %v694_v41, %v2808_v63  ;;  %v747_v40 = vmul.f32 %v2068_v52, %v2665_v51  ;;  %v775_v19 = vmul.f32 %v2877_v39, %v771_v13 }
 0x253   :  { %v2899_v6 = vadd.f32 %v741_v50, %v740_v49  ;;  %v2901_v43 = vsub.f32 %v743_v47, %v744_v23  ;;  %v794_v2 = vmul.f32 %v2877_v39, %v715_v7  ;;  %v798_v63 = vmul.f32 %v2877_v39, %v721_v38 }
 0x254   :  { %v2904_v33 = vadd.f32 %v747_v40, %v746_v27  ;;  %v2907_v15 = vmul.f32 %v2877_v39, %v775_v19  ;;  %v795_v54 = vmul.f32 %v775_v19, %v721_v38  ;;  %v2909_v29 = vmul.f32 %v775_v19, %v775_v19 }
 0x255   :  { %v797_v44 = vmul.f32 %v775_v19, %v715_v7  ;;  %v2914_v51 = vmul.f32 %v2877_v39, %v2877_v39  ;;  %v800_v46 = vmul.f32 %v2877_v39, %v718_v18  ;;  %v801_v59 = vmul.f32 %v775_v19, %v724_v17 }
 0x256   :  { %v779_v13 = vmul.f32 %v2907_v15, %v2765_v10  ;;  %v790_v52 = vmul.f32 %v2909_v29, %v2698_v4  ;;  %v2920_v41 = vsub.f32 %v794_v2, %v795_v54  ;;  %v803_v7 = vmul.f32 %v775_v19, %v718_v18 }
 0x257   :  { %v2922_v22 = vadd.f32 %v798_v63, %v797_v44  ;;  %v792_v1 = vmul.f32 %v2914_v51, %v2825_v42  ;;  %v804_v38 = vmul.f32 %v2877_v39, %v724_v17  ;;  %v806_v21 = vmul.f32 %v2877_v39, %v2702_v62 }
 0x258   :  { %v780_v31 = vadd.f32 %v779_v13, %v779_v13  ;;  %v807_v60 = vmul.f32 %v775_v19, %v2784_v11  ;;  %v809_v8 = vmul.f32 %v775_v19, %v2702_v62  ;;  %v709_v12 = vmul.f32 %v2851_v30, %v2823_v5 }
 0x259   :  { %v2934_v9 = vsub.f32 %v800_v46, %v801_v59  ;;  %v2936_v53 = vadd.f32 %v804_v38, %v803_v7  ;;  %v810_v18 = vmul.f32 %v2877_v39, %v2784_v11  ;;  %v812_v17 = vmul.f32 %v2877_v39, %v2716_v45 }
 0x25a   :  { %v791_v61 = vadd.f32 %v790_v52, %v780_v31  ;;  %v2938_v35 = vsub.f32 %v806_v21, %v807_v60  ;;  %v786_v14 = vmul.f32 %v2914_v51, %v2698_v4  ;;  %v813_v5 = vmul.f32 %v775_v19, %v2794_v28 }
 0x25b   :  { %v815_v30 = vmul.f32 %v775_v19, %v2716_v45  ;;  %v2950_v25 = vadd.f32 %v810_v18, %v809_v8  ;;  %v816_v49 = vmul.f32 %v2877_v39, %v2794_v28  ;;  %v818_v11 = vmul.f32 %v2877_v39, %v2722_v3 }
 0x25c   :  { %v2946_v62 = vadd.f32 %v792_v1, %v791_v61  ;;  %v819_v50 = vmul.f32 %v775_v19, %v2806_v16  ;;  %v2957_v47 = vsub.f32 %v812_v17, %v813_v5  ;;  %v821_v23 = vmul.f32 %v775_v19, %v2722_v3 }
 0x25d   :  { %v822_v27 = vmul.f32 %v2877_v39, %v2806_v16  ;;  %v824_v45 = vmul.f32 %v2877_v39, %v2732_v0  ;;  %v2964_v40 = vadd.f32 %v816_v49, %v815_v30  ;;  %v825_v28 = vmul.f32 %v775_v19, %v2813_v57 }
 0x25e   :  { %v2966_v2 = vsub.f32 %v818_v11, %v819_v50  ;;  %v827_v54 = vmul.f32 %v775_v19, %v2732_v0  ;;  %v828_v63 = vmul.f32 %v2877_v39, %v2813_v57  ;;  %vm830_vm8 = vcmp.ne.f32.partialorder %v2934_v9, 0.0 }
 0x25f   :  { %v2970_v44 = vadd.f32 %v822_v27, %v821_v23  ;;  %v2975_v3 = vsub.f32 %v824_v45, %v825_v28  ;;  %v831_v16 = vsel %vm830_vm8, %v2934_v9, 1.0  ;;  %v710_v46 = vadd.f32 %v709_v12, %v2864_v58 }
 0x260   :  { %v2980_v13 = vadd.f32 %v828_v63, %v827_v54  ;;  %v833_v52 = vadd.f32 %v831_v16, %v831_v16  ;;  %v711_v0 = vmul.f32 %v2849_v24, %v2642_v56  ;;  %v787_v19 = vsub.f32 %v786_v14, %v780_v31 }
 0x261   :  { %v788_v57 = vmul.f32 %v2909_v29, %v2825_v42  ;;  %v781_v50 = vsub.f32 %v2698_v4, %v2825_v42  ;;  %v783_v23 = vsub.f32 %v2914_v51, %v2909_v29 }
 0x262   :  { %2071 = vrcp.f32 %v833_v52  ;;  %v2987_v39 = vadd.f32 %v711_v0, %v710_v46 }
 0x263   :  { %v2989_v1 = vadd.f32 %v788_v57, %v787_v19  ;;  %v782_v27 = vmul.f32 %v781_v50, %v2907_v15  ;;  %v784_v45 = vmul.f32 %v783_v23, %v2765_v10 }
 0x265   :  { %v832_v59 = vsub.f32 %v2987_v39, %v2989_v1  ;;  %v785_v54 = vadd.f32 %v784_v45, %v782_v27 }
 0x26c   :  { %v2072_v7 = vpop.eup %2071 }
 0x26d   :  { %v835_v38 = vmul.f32 %v2072_v7, %v832_v59 }
 0x26f   :  { %v838_v21 = vand.u32 2147483647, %v835_v38  ;;  %vm836_vm11 = vcmp.ge.f32.partialorder %v835_v38, 0.0 }
 0x270   :  { %v837_v17 = vsel %vm836_vm11, 1.0, %v2185_v32 }
 0x271   :  { %v839_v60 = vmin.f32 %v838_v21, 1e+18 }
 0x273   :  { %v840_v58 = vmul.f32 %v839_v60, %v839_v60 }
 0x275   :  { %v841_v8 = vadd.f32 1.0, %v840_v58 }
 0x277   :  { %2073 = vrsqrt.f32 %v841_v8  ;;  %vm844_vm9 = vcmp.eq.f32.partialorder %v841_v8, inf  ;;  %v847_v24 = vand.u32 2147483648, %v841_v8  ;;  %vm846_vm10 = vcmp.eq.f32.partialorder %v841_v8, 0.0 }
 0x281   :  { %v2074_v56 = vpop.eup %2073 }
 0x282   :  { %v843_v31 = vmul.f32 %v2074_v56, %v841_v8 }
 0x284   :  { %v845_v12 = vsel %vm844_vm9, %v841_v8, %v843_v31 }
 0x285   :  { %v848_v61 = vsel %vm846_vm10, %v847_v24, %v845_v12 }
 0x286   :  { %v849_v18 = vadd.f32 %v848_v61, %v839_v60 }
 0x288   :  { %2075 = vrcp.f32 %v849_v18 }
 0x292   :  { %v2076_v14 = vpop.eup %2075 }
 0x293   :  { %v851_v5 = vmul.f32 %v2076_v14, %v837_v17 }
 0x295   :  { %v852_v30 = vsel %vm830_vm8, %v851_v5, 0.0 }
 0x296   :  { %v853_v49 = vmul.f32 %v852_v30, %v852_v30 }
 0x298   :  { %v854_v11 = vadd.f32 1.0, %v853_v49 }
 0x29a   :  { %2077 = vrsqrt.f32 %v854_v11 }
 0x2a4   :  { %v2078_v28 = vpop.eup %2077 }
 0x2a5   :  { %v856_v63 = vmul.f32 %v2078_v28, %v852_v30  ;;  %v879_v16 = vmul.f32 %v2078_v28, %v2872_v34  ;;  %v875_v52 = vmul.f32 %v2078_v28, %v2920_v41  ;;  %v881_v46 = vmul.f32 %v2078_v28, %v785_v54 }
 0x2a6   :  { %v887_v0 = vmul.f32 %v2078_v28, %v2938_v35  ;;  %v891_v19 = vmul.f32 %v2078_v28, %v2879_v36  ;;  %v885_v42 = vmul.f32 %v2078_v28, %v2936_v53  ;;  %v3029_v56 = vmul.f32 %v2078_v28, %v2078_v28 }
 0x2a7   :  { %v3006_v4 = vmul.f32 %v2078_v28, %v856_v63  ;;  %v876_v15 = vmul.f32 %v856_v63, %v2872_v34  ;;  %v878_v10 = vmul.f32 %v856_v63, %v2920_v41  ;;  %v882_v29 = vmul.f32 %v856_v63, %v2936_v53 }
 0x2a8   :  { %v884_v51 = vmul.f32 %v856_v63, %v785_v54  ;;  %v3018_v38 = vmul.f32 %v856_v63, %v856_v63  ;;  %v888_v34 = vmul.f32 %v856_v63, %v2879_v36  ;;  %v890_v41 = vmul.f32 %v856_v63, %v2938_v35 }
 0x2a9   :  { %v3012_v57 = vsub.f32 %v875_v52, %v876_v15  ;;  %v3014_v59 = vadd.f32 %v879_v16, %v878_v10  ;;  %v3016_v7 = vsub.f32 %v881_v46, %v882_v29  ;;  %v860_v21 = vmul.f32 %v3006_v4, %v2934_v9 }
 0x2aa   :  { %v3022_v60 = vadd.f32 %v885_v42, %v884_v51  ;;  %v893_v53 = vmul.f32 %v2078_v28, %v2957_v47  ;;  %v894_v58 = vmul.f32 %v856_v63, %v2889_v37  ;;  %v896_v8 = vmul.f32 %v856_v63, %v2957_v47 }
 0x2ab   :  { %v3031_v24 = vsub.f32 %v887_v0, %v888_v34  ;;  %v3033_v31 = vadd.f32 %v891_v19, %v890_v41  ;;  %v897_v61 = vmul.f32 %v2078_v28, %v2889_v37  ;;  %v899_v36 = vmul.f32 %v2078_v28, %v2966_v2 }
 0x2ac   :  { %v3035_v12 = vsub.f32 %v893_v53, %v894_v58  ;;  %v861_v18 = vadd.f32 %v860_v21, %v860_v21  ;;  %v871_v35 = vmul.f32 %v3018_v38, %v2989_v1  ;;  %v900_v17 = vmul.f32 %v856_v63, %v2899_v6 }
 0x2ad   :  { %v902_v47 = vmul.f32 %v856_v63, %v2966_v2  ;;  %v3043_v14 = vadd.f32 %v897_v61, %v896_v8  ;;  %v903_v5 = vmul.f32 %v2078_v28, %v2899_v6  ;;  %v905_v30 = vmul.f32 %v2078_v28, %v2975_v3 }
 0x2ae   :  { %v906_v49 = vmul.f32 %v856_v63, %v2904_v33  ;;  %v3048_v11 = vsub.f32 %v899_v36, %v900_v17  ;;  %v908_v37 = vmul.f32 %v856_v63, %v2975_v3  ;;  %v909_v50 = vmul.f32 %v2078_v28, %v2904_v33 }
 0x2af   :  { %vm911_vm12 = vcmp.ne.f32.partialorder %v3022_v60, 0.0  ;;  %v867_v23 = vmul.f32 %v3029_v56, %v2989_v1  ;;  %v3055_v2 = vadd.f32 %v903_v5, %v902_v47  ;;  %vm992_vm13 = vcmp.ne.f32.partialorder %v3012_v57, 0.0 }
 0x2b0   :  { %v3057_v27 = vsub.f32 %v905_v30, %v906_v49  ;;  %v912_v6 = vsel %vm911_vm12, %v3022_v60, 1.0  ;;  %v3062_v45 = vadd.f32 %v909_v50, %v908_v37  ;;  %v872_v3 = vadd.f32 %v871_v35, %v861_v18 }
 0x2b1   :  { %v914_v54 = vadd.f32 %v912_v6, %v912_v6  ;;  %v873_v33 = vmul.f32 %v3029_v56, %v2987_v39  ;;  %v993_v28 = vsel %vm992_vm13, %v3012_v57, 1.0  ;;  %v868_v16 = vsub.f32 %v867_v23, %v861_v18 }
 0x2b2   :  { %v995_v63 = vadd.f32 %v993_v28, %v993_v28  ;;  %v869_v52 = vmul.f32 %v3018_v38, %v2987_v39 }
 0x2b3   :  { %2079 = vrcp.f32 %v914_v54  ;;  %v3072_v46 = vadd.f32 %v873_v33, %v872_v3 }
 0x2b4   :  { %2081 = vrcp.f32 %v995_v63  ;;  %v3074_v0 = vadd.f32 %v869_v52, %v868_v16 }
 0x2b5   :  { %v913_v19 = vsub.f32 %v3072_v46, %v2946_v62 }
 0x2b6   :  { %v994_v42 = vsub.f32 %v3074_v0, %v2885_v48 }
 0x2bd   :  { %v2080_v15 = vpop.eup %2079 }
 0x2be   :  { %v916_v10 = vmul.f32 %v2080_v15, %v913_v19  ;;  %v2082_v29 = vpop.eup %2081 }
 0x2bf   :  { %v997_v21 = vmul.f32 %v2082_v29, %v994_v42 }
 0x2c0   :  { %v919_v51 = vand.u32 2147483647, %v916_v10  ;;  %vm917_vm2 = vcmp.ge.f32.partialorder %v916_v10, 0.0  ;;  %v862_v10 = vsub.f32 %v2989_v1, %v2987_v39 }
 0x2c1   :  { %v1000_v41 = vand.u32 2147483647, %v997_v21  ;;  %v918_v3 = vsel %vm917_vm2, 1.0, %v2185_v32  ;;  %vm998_vm3 = vcmp.ge.f32.partialorder %v997_v21, 0.0 }
 0x2c2   :  { %v920_v34 = vmin.f32 %v919_v51, 1e+18  ;;  %v999_v63 = vsel %vm998_vm3, 1.0, %v2185_v32  ;;  %v864_v51 = vsub.f32 %v3029_v56, %v3018_v38 }
 0x2c3   :  { %v1001_v58 = vmin.f32 %v1000_v41, 1e+18 }
 0x2c4   :  { %v921_v53 = vmul.f32 %v920_v34, %v920_v34  ;;  %v865_v41 = vmul.f32 %v864_v51, %v2934_v9 }
 0x2c5   :  { %v1002_v61 = vmul.f32 %v1001_v58, %v1001_v58 }
 0x2c6   :  { %v922_v8 = vadd.f32 1.0, %v921_v53 }
 0x2c7   :  { %v1003_v36 = vadd.f32 1.0, %v1002_v61 }
 0x2c8   :  { %2083 = vrsqrt.f32 %v922_v8  ;;  %vm925_vm14 = vcmp.eq.f32.partialorder %v922_v8, inf  ;;  %v928_v35 = vand.u32 2147483648, %v922_v8  ;;  %vm927_vm15 = vcmp.eq.f32.partialorder %v922_v8, 0.0 }
 0x2c9   :  { %2085 = vrsqrt.f32 %v1003_v36  ;;  %vm1006_vm0 = vcmp.eq.f32.partialorder %v1003_v36, inf  ;;  %v1009_v30 = vand.u32 2147483648, %v1003_v36  ;;  %vm1008_vm1 = vcmp.eq.f32.partialorder %v1003_v36, 0.0 }
 0x2d2   :  { %v2084_v18 = vpop.eup %2083 }
 0x2d3   :  { %v924_v17 = vmul.f32 %v2084_v18, %v922_v8  ;;  %v2086_v47 = vpop.eup %2085 }
 0x2d4   :  { %v1005_v37 = vmul.f32 %v2086_v47, %v1003_v36 }
 0x2d5   :  { %v926_v5 = vsel %vm925_vm14, %v922_v8, %v924_v17 }
 0x2d6   :  { %v929_v49 = vsel %vm927_vm15, %v928_v35, %v926_v5  ;;  %v1007_v23 = vsel %vm1006_vm0, %v1003_v36, %v1005_v37 }
 0x2d7   :  { %v930_v50 = vadd.f32 %v929_v49, %v920_v34  ;;  %v1010_v6 = vsel %vm1008_vm1, %v1009_v30, %v1007_v23  ;;  %v863_v34 = vmul.f32 %v862_v10, %v3006_v4 }
 0x2d8   :  { %v1011_v54 = vadd.f32 %v1010_v6, %v1001_v58 }
 0x2d9   :  { %2087 = vrcp.f32 %v930_v50  ;;  %v866_v8 = vadd.f32 %v865_v41, %v863_v34 }
 0x2da   :  { %2089 = vrcp.f32 %v1011_v54 }
 0x2e3   :  { %v2088_v33 = vpop.eup %2087 }
 0x2e4   :  { %v932_v28 = vmul.f32 %v2088_v33, %v918_v3  ;;  %v2090_v16 = vpop.eup %2089 }
 0x2e5   :  { %v1013_v42 = vmul.f32 %v2090_v16, %v999_v63 }
 0x2e6   :  { %v933_v52 = vsel %vm911_vm12, %v932_v28, 0.0 }
 0x2e7   :  { %v934_v19 = vmul.f32 %v933_v52, %v933_v52  ;;  %v1014_v29 = vsel %vm992_vm13, %v1013_v42, 0.0 }
 0x2e8   :  { %v1015_v21 = vmul.f32 %v1014_v29, %v1014_v29 }
 0x2e9   :  { %v935_v15 = vadd.f32 1.0, %v934_v19 }
 0x2ea   :  { %v1016_v53 = vadd.f32 1.0, %v1015_v21  ;;  %v1024_v21 = vsub.f32 %v2885_v48, %v3074_v0 }
 0x2eb   :  { %2091 = vrsqrt.f32 %v935_v15 }
 0x2ec   :  { %2093 = vrsqrt.f32 %v1016_v53 }
 0x2f5   :  { %v2092_v58 = vpop.eup %2091 }
 0x2f6   :  { %v937_v61 = vmul.f32 %v2092_v58, %v933_v52  ;;  %v956_v36 = vmul.f32 %v2092_v58, %v2922_v22  ;;  %v960_v18 = vmul.f32 %v2092_v58, %v3014_v59  ;;  %v962_v35 = vmul.f32 %v2092_v58, %v3016_v7  ;;  %v3122_v19 = vpop.eup %2093 }
 0x2f7   :  { %v966_v39 = vmul.f32 %v2092_v58, %v866_v8  ;;  %v968_v1 = vmul.f32 %v2092_v58, %v2950_v25  ;;  %v972_v38 = vmul.f32 %v2092_v58, %v3033_v31  ;;  %v3104_v30 = vmul.f32 %v2092_v58, %v2092_v58 }
 0x2f8   :  { %v3097_v56 = vmul.f32 %v937_v61, %v937_v61  ;;  %v3099_v4 = vmul.f32 %v2092_v58, %v937_v61  ;;  %v957_v9 = vmul.f32 %v937_v61, %v3014_v59  ;;  %v959_v17 = vmul.f32 %v937_v61, %v2922_v22 }
 0x2f9   :  { %v963_v47 = vmul.f32 %v937_v61, %v866_v8  ;;  %v965_v5 = vmul.f32 %v937_v61, %v3016_v7  ;;  %v954_v59 = vmul.f32 %v3104_v30, %v3072_v46  ;;  %v969_v3 = vmul.f32 %v937_v61, %v3033_v31 }
 0x2fa   :  { %v941_v49 = vmul.f32 %v3099_v4, %v3022_v60  ;;  %v952_v37 = vmul.f32 %v3097_v56, %v2946_v62  ;;  %v958_v50 = vsub.f32 %v956_v36, %v957_v9  ;;  %v961_v23 = vadd.f32 %v960_v18, %v959_v17 }
 0x2fb   :  { %v964_v6 = vsub.f32 %v962_v35, %v963_v47  ;;  %v967_v22 = vadd.f32 %v966_v39, %v965_v5  ;;  %v971_v7 = vmul.f32 %v937_v61, %v2950_v25  ;;  %v974_v33 = vmul.f32 %v2092_v58, %v2964_v40 }
 0x2fc   :  { %v3110_v54 = vadd.f32 %v941_v49, %v941_v49  ;;  %v975_v28 = vmul.f32 %v937_v61, %v3043_v14  ;;  %v977_v63 = vmul.f32 %v937_v61, %v2964_v40  ;;  %v3120_v52 = vsub.f32 %v968_v1, %v969_v3 }
 0x2fd   :  { %v3124_v42 = vadd.f32 %v972_v38, %v971_v7  ;;  %v978_v31 = vmul.f32 %v2092_v58, %v3043_v14  ;;  %v980_v25 = vmul.f32 %v2092_v58, %v2970_v44  ;;  %v981_v51 = vmul.f32 %v937_v61, %v3055_v2 }
 0x2fe   :  { %v953_v16 = vadd.f32 %v952_v37, %v3110_v54  ;;  %v3126_v15 = vsub.f32 %v974_v33, %v975_v28  ;;  %v983_v40 = vmul.f32 %v937_v61, %v2970_v44  ;;  %v984_v41 = vmul.f32 %v2092_v58, %v3055_v2 }
 0x2ff   :  { %v3136_v34 = vadd.f32 %v978_v31, %v977_v63  ;;  %v986_v53 = vmul.f32 %v2092_v58, %v2980_v13  ;;  %v987_v8 = vmul.f32 %v937_v61, %v3062_v45  ;;  %v3141_v14 = vsub.f32 %v980_v25, %v981_v51 }
 0x300   :  { %v3130_v10 = vadd.f32 %v954_v59, %v953_v16  ;;  %v989_v36 = vmul.f32 %v937_v61, %v2980_v13  ;;  %v990_v18 = vmul.f32 %v2092_v58, %v3062_v45  ;;  %v1018_v35 = vmul.f32 %v3122_v19, %v1014_v29 }
 0x301   :  { %v3146_v44 = vadd.f32 %v984_v41, %v983_v40  ;;  %v3148_v39 = vsub.f32 %v986_v53, %v987_v8  ;;  %v1019_v1 = vmul.f32 %v3122_v19, %v3122_v19  ;;  %v1037_v2 = vmul.f32 %v3122_v19, %v958_v50 }
 0x302   :  { %v3153_v38 = vadd.f32 %v990_v18, %v989_v36  ;;  %v1020_v9 = vmul.f32 %v1018_v35, %v1018_v35  ;;  %v1021_v17 = vmul.f32 %v3122_v19, %v1018_v35  ;;  %v1038_v47 = vmul.f32 %v1018_v35, %v964_v6 }
 0x303   :  { %v1040_v13 = vmul.f32 %v1018_v35, %v958_v50  ;;  %v1041_v45 = vmul.f32 %v3122_v19, %v964_v6  ;;  %v1035_v5 = vmul.f32 %v1019_v1, %v3074_v0  ;;  %v1043_v3 = vmul.f32 %v3122_v19, %v961_v23 }
 0x304   :  { %v1022_v29 = vmul.f32 %v1021_v17, %v3012_v57  ;;  %v1025_v58 = vmul.f32 %v1024_v21, %v1021_v17  ;;  %v1026_v61 = vsub.f32 %v1019_v1, %v1020_v9  ;;  %v1033_v49 = vmul.f32 %v1020_v9, %v2885_v48 }
 0x305   :  { %v3160_v37 = vsub.f32 %v1037_v2, %v1038_v47  ;;  %v3162_v59 = vadd.f32 %v1041_v45, %v1040_v13  ;;  %v1044_v50 = vmul.f32 %v1018_v35, %v967_v22  ;;  %v1046_v28 = vmul.f32 %v1018_v35, %v961_v23 }
 0x306   :  { %v1023_v7 = vadd.f32 %v1022_v29, %v1022_v29  ;;  %v1027_v33 = vmul.f32 %v1026_v61, %v3012_v57  ;;  %v1047_v6 = vmul.f32 %v3122_v19, %v967_v22  ;;  %v1049_v63 = vmul.f32 %v3122_v19, %v2875_v55 }
 0x307   :  { %v1050_v16 = vmul.f32 %v1018_v35, %v3031_v24  ;;  %v1052_v31 = vmul.f32 %v1018_v35, %v2875_v55  ;;  %v948_v25 = vmul.f32 %v3104_v30, %v2946_v62  ;;  %v3175_v21 = vsub.f32 %v1043_v3, %v1044_v50 }
 0x308   :  { %v3173_v51 = vadd.f32 %v1027_v33, %v1025_v58  ;;  %v1034_v40 = vadd.f32 %v1033_v49, %v1023_v7  ;;  %v3177_v57 = vadd.f32 %v1047_v6, %v1046_v28  ;;  %v1053_v22 = vmul.f32 %v3122_v19, %v3031_v24 }
 0x309   :  { %v3179_v23 = vsub.f32 %v1049_v63, %v1050_v16  ;;  %v1055_v41 = vmul.f32 %v3122_v19, %v2881_v20  ;;  %v1029_v55 = vmul.f32 %v1019_v1, %v2885_v48  ;;  %v1056_v8 = vmul.f32 %v1018_v35, %v3035_v12 }
 0x30a   :  { %v3186_v53 = vadd.f32 %v1035_v5, %v1034_v40  ;;  %v1058_v36 = vmul.f32 %v1018_v35, %v2881_v20  ;;  %v3190_v18 = vadd.f32 %v1053_v22, %v1052_v31  ;;  %v1059_v2 = vmul.f32 %v3122_v19, %v3035_v12 }
 0x30b   :  { %v1061_v17 = vmul.f32 %v3122_v19, %v2894_v26  ;;  %v1062_v24 = vmul.f32 %v1018_v35, %v3048_v11  ;;  %v3197_v47 = vsub.f32 %v1055_v41, %v1056_v8  ;;  %v1064_v48 = vmul.f32 %v1018_v35, %v2894_v26 }
 0x30c   :  { %v1065_v1 = vmul.f32 %v3122_v19, %v3048_v11  ;;  %v1067_v20 = vmul.f32 %v3122_v19, %v2901_v43  ;;  %v3204_v13 = vadd.f32 %v1059_v2, %v1058_v36  ;;  %v1068_v12 = vmul.f32 %v1018_v35, %v3057_v27 }
 0x30d   :  { %v3206_v45 = vsub.f32 %v1061_v17, %v1062_v24  ;;  %v1070_v29 = vmul.f32 %v1018_v35, %v2901_v43  ;;  %v1071_v61 = vmul.f32 %v3122_v19, %v3057_v27  ;;  %vm1073_vm4 = vcmp.ne.f32.partialorder %v3160_v37, 0.0 }
 0x30e   :  { %v3210_v58 = vadd.f32 %v1065_v1, %v1064_v48  ;;  %v3215_v26 = vsub.f32 %v1067_v20, %v1068_v12  ;;  %v1074_v11 = vsel %vm1073_vm4, %v3160_v37, 1.0  ;;  %v949_v3 = vsub.f32 %v948_v25, %v3110_v54 }
 0x30f   :  { %v3220_v5 = vadd.f32 %v1071_v61, %v1070_v29  ;;  %v1076_v49 = vadd.f32 %v1074_v11, %v1074_v11  ;;  %v950_v43 = vmul.f32 %v3097_v56, %v3072_v46  ;;  %v1030_v35 = vsub.f32 %v1029_v55, %v1023_v7 }
 0x310   :  { %v1031_v33 = vmul.f32 %v1020_v9, %v3074_v0  ;;  %v943_v24 = vsub.f32 %v2946_v62, %v3072_v46  ;;  %v945_v48 = vsub.f32 %v3104_v30, %v3097_v56 }
 0x311   :  { %2095 = vrcp.f32 %v1076_v49  ;;  %v3226_v27 = vadd.f32 %v950_v43, %v949_v3 }
 0x312   :  { %v3228_v19 = vadd.f32 %v1031_v33, %v1030_v35  ;;  %v944_v1 = vmul.f32 %v943_v24, %v3099_v4  ;;  %v946_v20 = vmul.f32 %v945_v48, %v3022_v60 }
 0x314   :  { %v1075_v50 = vsub.f32 %v3226_v27, %v3228_v19  ;;  %v947_v29 = vadd.f32 %v946_v20, %v944_v1 }
 0x31b   :  { %v2096_v28 = vpop.eup %2095 }
 0x31c   :  { %v1078_v6 = vmul.f32 %v2096_v28, %v1075_v50 }
 0x31e   :  { %v1081_v63 = vand.u32 2147483647, %v1078_v6  ;;  %vm1079_vm7 = vcmp.ge.f32.partialorder %v1078_v6, 0.0 }
 0x31f   :  { %v1080_v41 = vsel %vm1079_vm7, 1.0, %v2185_v32 }
 0x320   :  { %v1082_v16 = vmin.f32 %v1081_v63, 1e+18 }
 0x322   :  { %v1083_v31 = vmul.f32 %v1082_v16, %v1082_v16 }
 0x324   :  { %v1084_v54 = vadd.f32 1.0, %v1083_v31 }
 0x326   :  { %2097 = vrsqrt.f32 %v1084_v54  ;;  %vm1087_vm5 = vcmp.eq.f32.partialorder %v1084_v54, inf  ;;  %v1090_v7 = vand.u32 2147483648, %v1084_v54  ;;  %vm1089_vm6 = vcmp.eq.f32.partialorder %v1084_v54, 0.0 }
 0x330   :  { %v2098_v25 = vpop.eup %2097 }
 0x331   :  { %v1086_v40 = vmul.f32 %v2098_v25, %v1084_v54 }
 0x333   :  { %v1088_v0 = vsel %vm1087_vm5, %v1084_v54, %v1086_v40 }
 0x334   :  { %v1091_v9 = vsel %vm1089_vm6, %v1090_v7, %v1088_v0 }
 0x335   :  { %v1092_v22 = vadd.f32 %v1091_v9, %v1082_v16 }
 0x337   :  { %2099 = vrcp.f32 %v1092_v22 }
 0x341   :  { %v2100_v55 = vpop.eup %2099 }
 0x342   :  { %v1094_v8 = vmul.f32 %v2100_v55, %v1080_v41 }
 0x344   :  { %v1095_v36 = vsel %vm1073_vm4, %v1094_v8, 0.0 }
 0x345   :  { %v1096_v2 = vmul.f32 %v1095_v36, %v1095_v36 }
 0x347   :  { %v1097_v17 = vadd.f32 1.0, %v1096_v2 }
 0x349   :  { %2101 = vrsqrt.f32 %v1097_v17 }
 0x353   :  { %v2102_v12 = vpop.eup %2101 }
 0x354   :  { %v1099_v61 = vmul.f32 %v2102_v12, %v1095_v36  ;;  %v1118_v11 = vmul.f32 %v2102_v12, %v3173_v51  ;;  %v1122_v49 = vmul.f32 %v2102_v12, %v3162_v59  ;;  %v1124_v3 = vmul.f32 %v2102_v12, %v3175_v21 }
 0x355   :  { %v1128_v43 = vmul.f32 %v2102_v12, %v947_v29  ;;  %v1130_v35 = vmul.f32 %v2102_v12, %v3179_v23  ;;  %v1134_v62 = vmul.f32 %v2102_v12, %v3120_v52  ;;  %v3257_v6 = vmul.f32 %v2102_v12, %v2102_v12 }
 0x356   :  { %v3246_v46 = vmul.f32 %v2102_v12, %v1099_v61  ;;  %v1119_v56 = vmul.f32 %v1099_v61, %v3162_v59  ;;  %v1121_v60 = vmul.f32 %v1099_v61, %v3173_v51  ;;  %v1125_v4 = vmul.f32 %v1099_v61, %v947_v29 }
 0x357   :  { %v1127_v30 = vmul.f32 %v1099_v61, %v3175_v21  ;;  %v1131_v59 = vmul.f32 %v1099_v61, %v3120_v52  ;;  %v1133_v51 = vmul.f32 %v1099_v61, %v3179_v23  ;;  %v1136_v31 = vmul.f32 %v2102_v12, %v3197_v47 }
 0x358   :  { %v3251_v33 = vsub.f32 %v1118_v11, %v1119_v56  ;;  %v3253_v50 = vadd.f32 %v1122_v49, %v1121_v60  ;;  %v3255_v28 = vsub.f32 %v1124_v3, %v1125_v4  ;;  %v1103_v63 = vmul.f32 %v3246_v46, %v3160_v37 }
 0x359   :  { %v3261_v16 = vadd.f32 %v1128_v43, %v1127_v30  ;;  %v1137_v21 = vmul.f32 %v1099_v61, %v3126_v15  ;;  %v1139_v54 = vmul.f32 %v1099_v61, %v3197_v47  ;;  %v3268_v25 = vmul.f32 %v1099_v61, %v1099_v61 }
 0x35a   :  { %v3270_v7 = vsub.f32 %v1130_v35, %v1131_v59  ;;  %v3272_v40 = vadd.f32 %v1134_v62, %v1133_v51  ;;  %v1140_v9 = vmul.f32 %v2102_v12, %v3126_v15  ;;  %v1142_v52 = vmul.f32 %v2102_v12, %v3206_v45 }
 0x35b   :  { %v3274_v0 = vsub.f32 %v1136_v31, %v1137_v21  ;;  %v1104_v22 = vadd.f32 %v1103_v63, %v1103_v63  ;;  %v1110_v23 = vmul.f32 %v3257_v6, %v3228_v19  ;;  %v1143_v41 = vmul.f32 %v1099_v61, %v3141_v14 }
 0x35c   :  { %v1145_v47 = vmul.f32 %v1099_v61, %v3206_v45  ;;  %v3282_v55 = vadd.f32 %v1140_v9, %v1139_v54  ;;  %v1146_v8 = vmul.f32 %v2102_v12, %v3141_v14  ;;  %v1148_v36 = vmul.f32 %v2102_v12, %v3215_v26 }
 0x35d   :  { %v1149_v2 = vmul.f32 %v1099_v61, %v3148_v39  ;;  %v3287_v17 = vsub.f32 %v1142_v52, %v1143_v41  ;;  %v1151_v15 = vmul.f32 %v1099_v61, %v3215_v26  ;;  %v1152_v24 = vmul.f32 %v2102_v12, %v3148_v39 }
 0x35e   :  { %vm1154_vm8 = vcmp.ne.f32.partialorder %v3255_v28, 0.0  ;;  %v1114_v48 = vmul.f32 %v3268_v25, %v3228_v19  ;;  %v3294_v45 = vadd.f32 %v1146_v8, %v1145_v47  ;;  %vm1235_vm9 = vcmp.ne.f32.partialorder %v3253_v50, 0.0 }
 0x35f   :  { %v3296_v1 = vsub.f32 %v1148_v36, %v1149_v2  ;;  %v1155_v14 = vsel %vm1154_vm8, %v3255_v28, 1.0  ;;  %v3301_v20 = vadd.f32 %v1152_v24, %v1151_v15  ;;  %v1111_v26 = vsub.f32 %v1110_v23, %v1104_v22 }
 0x360   :  { %v1157_v29 = vadd.f32 %v1155_v14, %v1155_v14  ;;  %v1112_v39 = vmul.f32 %v3268_v25, %v3226_v27  ;;  %v1236_v12 = vsel %vm1235_vm9, %v3253_v50, 1.0  ;;  %v1115_v11 = vadd.f32 %v1114_v48, %v1104_v22 }
 0x361   :  { %v1238_v61 = vadd.f32 %v1236_v12, %v1236_v12  ;;  %v1116_v49 = vmul.f32 %v3257_v6, %v3226_v27 }
 0x362   :  { %2103 = vrcp.f32 %v1157_v29  ;;  %v3311_v3 = vadd.f32 %v1112_v39, %v1111_v26 }
 0x363   :  { %2105 = vrcp.f32 %v1238_v61  ;;  %v3313_v43 = vadd.f32 %v1116_v49, %v1115_v11 }
 0x364   :  { %v1156_v35 = vsub.f32 %v3130_v10, %v3311_v3 }
 0x365   :  { %v1237_v62 = vsub.f32 %v3313_v43, %v3186_v53 }
 0x36c   :  { %v2104_v56 = vpop.eup %2103 }
 0x36d   :  { %v1159_v60 = vmul.f32 %v2104_v56, %v1156_v35  ;;  %v2106_v4 = vpop.eup %2105 }
 0x36e   :  { %v1240_v63 = vmul.f32 %v2106_v4, %v1237_v62 }
 0x36f   :  { %v1162_v30 = vand.u32 2147483647, %v1159_v60  ;;  %vm1160_vm14 = vcmp.ge.f32.partialorder %v1159_v60, 0.0  ;;  %v1105_v60 = vsub.f32 %v3228_v19, %v3226_v27 }
 0x370   :  { %v1243_v51 = vand.u32 2147483647, %v1240_v63  ;;  %v1161_v26 = vsel %vm1160_vm14, 1.0, %v2185_v32  ;;  %vm1241_vm15 = vcmp.ge.f32.partialorder %v1240_v63, 0.0 }
 0x371   :  { %v1163_v59 = vmin.f32 %v1162_v30, 1e+18  ;;  %v1242_v61 = vsel %vm1241_vm15, 1.0, %v2185_v32  ;;  %v1107_v30 = vsub.f32 %v3257_v6, %v3268_v25 }
 0x372   :  { %v1244_v21 = vmin.f32 %v1243_v51, 1e+18 }
 0x373   :  { %v1164_v31 = vmul.f32 %v1163_v59, %v1163_v59  ;;  %v1108_v51 = vmul.f32 %v1107_v30, %v3160_v37 }
 0x374   :  { %v1245_v9 = vmul.f32 %v1244_v21, %v1244_v21 }
 0x375   :  { %v1165_v54 = vadd.f32 1.0, %v1164_v31 }
 0x376   :  { %v1246_v52 = vadd.f32 1.0, %v1245_v9 }
 0x377   :  { %2107 = vrsqrt.f32 %v1165_v54  ;;  %vm1168_vm10 = vcmp.eq.f32.partialorder %v1165_v54, inf  ;;  %v1171_v23 = vand.u32 2147483648, %v1165_v54  ;;  %vm1170_vm11 = vcmp.eq.f32.partialorder %v1165_v54, 0.0 }
 0x378   :  { %2109 = vrsqrt.f32 %v1246_v52  ;;  %vm1249_vm12 = vcmp.eq.f32.partialorder %v1246_v52, inf  ;;  %v1252_v36 = vand.u32 2147483648, %v1246_v52  ;;  %vm1251_vm13 = vcmp.eq.f32.partialorder %v1246_v52, 0.0 }
 0x381   :  { %v2108_v22 = vpop.eup %2107 }
 0x382   :  { %v1167_v41 = vmul.f32 %v2108_v22, %v1165_v54  ;;  %v2110_v47 = vpop.eup %2109 }
 0x383   :  { %v1248_v15 = vmul.f32 %v2110_v47, %v1246_v52 }
 0x384   :  { %v1169_v8 = vsel %vm1168_vm10, %v1165_v54, %v1167_v41 }
 0x385   :  { %v1172_v2 = vsel %vm1170_vm11, %v1171_v23, %v1169_v8  ;;  %v1250_v48 = vsel %vm1249_vm12, %v1246_v52, %v1248_v15  ;;  %v1186_v52 = vsub.f32 %v3311_v3, %v3130_v10 }
 0x386   :  { %v1173_v24 = vadd.f32 %v1172_v2, %v1163_v59  ;;  %v1253_v14 = vsel %vm1251_vm13, %v1252_v36, %v1250_v48  ;;  %v1106_v59 = vmul.f32 %v1105_v60, %v3246_v46 }
 0x387   :  { %v1254_v29 = vadd.f32 %v1253_v14, %v1244_v21 }
 0x388   :  { %2111 = vrcp.f32 %v1173_v24  ;;  %v1109_v54 = vadd.f32 %v1108_v51, %v1106_v59 }
 0x389   :  { %2113 = vrcp.f32 %v1254_v29 }
 0x392   :  { %v2112_v39 = vpop.eup %2111 }
 0x393   :  { %v1175_v12 = vmul.f32 %v2112_v39, %v1161_v26  ;;  %v2114_v11 = vpop.eup %2113 }
 0x394   :  { %v1256_v62 = vmul.f32 %v2114_v11, %v1242_v61 }
 0x395   :  { %v1176_v49 = vsel %vm1154_vm8, %v1175_v12, 0.0 }
 0x396   :  { %v1177_v35 = vmul.f32 %v1176_v49, %v1176_v49  ;;  %v1257_v4 = vsel %vm1235_vm9, %v1256_v62, 0.0 }
 0x397   :  { %v1258_v63 = vmul.f32 %v1257_v4, %v1257_v4 }
 0x398   :  { %v1178_v56 = vadd.f32 1.0, %v1177_v35 }
 0x399   :  { %v1259_v31 = vadd.f32 1.0, %v1258_v63 }
 0x39a   :  { %2115 = vrsqrt.f32 %v1178_v56 }
 0x39b   :  { %2117 = vrsqrt.f32 %v1259_v31 }
 0x3a4   :  { %v2116_v21 = vpop.eup %2115 }
 0x3a5   :  { %v1180_v9 = vmul.f32 %v2116_v21, %v1176_v49  ;;  %v1199_v22 = vmul.f32 %v2116_v21, %v3251_v33  ;;  %v1203_v27 = vmul.f32 %v2116_v21, %v3177_v57  ;;  %v1205_v19 = vmul.f32 %v2116_v21, %v1109_v54  ;;  %v3365_v63 = vpop.eup %2117 }
 0x3a6   :  { %v1211_v6 = vmul.f32 %v2116_v21, %v3270_v7  ;;  %v1215_v25 = vmul.f32 %v2116_v21, %v3124_v42  ;;  %v3337_v46 = vmul.f32 %v2116_v21, %v2116_v21  ;;  %v1209_v41 = vmul.f32 %v2116_v21, %v3261_v16 }
 0x3a7   :  { %v3339_v37 = vmul.f32 %v1180_v9, %v1180_v9  ;;  %v1183_v23 = vmul.f32 %v2116_v21, %v1180_v9  ;;  %v1200_v47 = vmul.f32 %v1180_v9, %v3177_v57  ;;  %v1202_v8 = vmul.f32 %v1180_v9, %v3251_v33 }
 0x3a8   :  { %v1206_v36 = vmul.f32 %v1180_v9, %v3261_v16  ;;  %v1208_v2 = vmul.f32 %v1180_v9, %v1109_v54  ;;  %v1191_v14 = vmul.f32 %v3337_v46, %v3311_v3  ;;  %v1212_v61 = vmul.f32 %v1180_v9, %v3124_v42 }
 0x3a9   :  { %v1184_v15 = vmul.f32 %v1183_v23, %v3255_v28  ;;  %v1187_v24 = vmul.f32 %v1186_v52, %v1183_v23  ;;  %v1188_v48 = vsub.f32 %v3337_v46, %v3339_v37  ;;  %v1193_v29 = vmul.f32 %v3339_v37, %v3130_v10 }
 0x3aa   :  { %v1201_v26 = vsub.f32 %v1199_v22, %v1200_v47  ;;  %v1204_v39 = vadd.f32 %v1203_v27, %v1202_v8  ;;  %v1207_v57 = vsub.f32 %v1205_v19, %v1206_v36  ;;  %v1210_v16 = vadd.f32 %v1209_v41, %v1208_v2 }
 0x3ab   :  { %v3352_v12 = vadd.f32 %v1184_v15, %v1184_v15  ;;  %v1189_v33 = vmul.f32 %v1188_v48, %v3255_v28  ;;  %v1214_v11 = vmul.f32 %v1180_v9, %v3270_v7  ;;  %v1217_v49 = vmul.f32 %v2116_v21, %v3274_v0 }
 0x3ac   :  { %v1218_v35 = vmul.f32 %v1180_v9, %v3136_v34  ;;  %v1220_v62 = vmul.f32 %v1180_v9, %v3274_v0  ;;  %v3363_v30 = vsub.f32 %v1211_v6, %v1212_v61  ;;  %v1221_v42 = vmul.f32 %v2116_v21, %v3136_v34 }
 0x3ad   :  { %v3360_v56 = vadd.f32 %v1189_v33, %v1187_v24  ;;  %v1192_v60 = vsub.f32 %v1191_v14, %v3352_v12  ;;  %v3367_v28 = vadd.f32 %v1215_v25, %v1214_v11  ;;  %v1223_v7 = vmul.f32 %v2116_v21, %v3287_v17 }
 0x3ae   :  { %v3369_v59 = vsub.f32 %v1217_v49, %v1218_v35  ;;  %v1224_v0 = vmul.f32 %v1180_v9, %v3146_v44  ;;  %v1226_v31 = vmul.f32 %v1180_v9, %v3287_v17  ;;  %v3377_v54 = vadd.f32 %v1221_v42, %v1220_v62 }
 0x3af   :  { %v3373_v51 = vadd.f32 %v1193_v29, %v1192_v60  ;;  %v1227_v52 = vmul.f32 %v2116_v21, %v3146_v44  ;;  %v1229_v22 = vmul.f32 %v2116_v21, %v3296_v1  ;;  %v1230_v27 = vmul.f32 %v1180_v9, %v3153_v38 }
 0x3b0   :  { %v3382_v19 = vsub.f32 %v1223_v7, %v1224_v0  ;;  %v1232_v34 = vmul.f32 %v1180_v9, %v3296_v1  ;;  %v1233_v6 = vmul.f32 %v2116_v21, %v3153_v38  ;;  %v1261_v25 = vmul.f32 %v3365_v63, %v1257_v4 }
 0x3b1   :  { %v3387_v23 = vadd.f32 %v1227_v52, %v1226_v31  ;;  %v3389_v41 = vsub.f32 %v1229_v22, %v1230_v27  ;;  %v1280_v17 = vmul.f32 %v3365_v63, %v1201_v26  ;;  %v1284_v1 = vmul.f32 %v3365_v63, %v1207_v57 }
 0x3b2   :  { %v3392_v47 = vadd.f32 %v1233_v6, %v1232_v34  ;;  %v3395_v44 = vmul.f32 %v3365_v63, %v1261_v25  ;;  %v1281_v8 = vmul.f32 %v1261_v25, %v1207_v57  ;;  %v3397_v36 = vmul.f32 %v1261_v25, %v1261_v25 }
 0x3b3   :  { %v1283_v2 = vmul.f32 %v1261_v25, %v1201_v26  ;;  %v3402_v38 = vmul.f32 %v3365_v63, %v3365_v63  ;;  %v1286_v24 = vmul.f32 %v3365_v63, %v1204_v39  ;;  %v1287_v29 = vmul.f32 %v1261_v25, %v1210_v16 }
 0x3b4   :  { %v1265_v4 = vmul.f32 %v3395_v44, %v3253_v50  ;;  %v1276_v21 = vmul.f32 %v3397_v36, %v3186_v53  ;;  %v3408_v9 = vsub.f32 %v1280_v17, %v1281_v8  ;;  %v1289_v26 = vmul.f32 %v1261_v25, %v1204_v39 }
 0x3b5   :  { %v3410_v15 = vadd.f32 %v1284_v1, %v1283_v2  ;;  %v1278_v14 = vmul.f32 %v3402_v38, %v3313_v43  ;;  %v1290_v57 = vmul.f32 %v3365_v63, %v1210_v16  ;;  %v1292_v33 = vmul.f32 %v3365_v63, %v3190_v18 }
 0x3b6   :  { %v1266_v48 = vadd.f32 %v1265_v4, %v1265_v4  ;;  %v1293_v61 = vmul.f32 %v1261_v25, %v3272_v40  ;;  %v1295_v11 = vmul.f32 %v1261_v25, %v3190_v18  ;;  %v1195_v49 = vmul.f32 %v3339_v37, %v3311_v3 }
 0x3b7   :  { %v3422_v62 = vsub.f32 %v1286_v24, %v1287_v29  ;;  %v3424_v60 = vadd.f32 %v1290_v57, %v1289_v26  ;;  %v1296_v39 = vmul.f32 %v3365_v63, %v3272_v40  ;;  %v1298_v16 = vmul.f32 %v3365_v63, %v3204_v13 }
 0x3b8   :  { %v1277_v35 = vadd.f32 %v1276_v21, %v1266_v48  ;;  %v3426_v42 = vsub.f32 %v1292_v33, %v1293_v61  ;;  %v1272_v7 = vmul.f32 %v3402_v38, %v3186_v53  ;;  %v1299_v3 = vmul.f32 %v1261_v25, %v3282_v55 }
 0x3b9   :  { %v1301_v37 = vmul.f32 %v1261_v25, %v3204_v13  ;;  %v3438_v0 = vadd.f32 %v1296_v39, %v1295_v11  ;;  %v1302_v31 = vmul.f32 %v3365_v63, %v3282_v55  ;;  %v1304_v40 = vmul.f32 %v3365_v63, %v3210_v58 }
 0x3ba   :  { %v3434_v18 = vadd.f32 %v1278_v14, %v1277_v35  ;;  %v1305_v52 = vmul.f32 %v1261_v25, %v3294_v45  ;;  %v3445_v22 = vsub.f32 %v1298_v16, %v1299_v3  ;;  %v1307_v27 = vmul.f32 %v1261_v25, %v3210_v58 }
 0x3bb   :  { %v1308_v34 = vmul.f32 %v3365_v63, %v3294_v45  ;;  %v1310_v13 = vmul.f32 %v3365_v63, %v3220_v5  ;;  %v3452_v6 = vadd.f32 %v1302_v31, %v1301_v37  ;;  %v1311_v55 = vmul.f32 %v1261_v25, %v3301_v20 }
 0x3bc   :  { %v3454_v17 = vsub.f32 %v1304_v40, %v1305_v52  ;;  %v1313_v8 = vmul.f32 %v1261_v25, %v3220_v5  ;;  %v1314_v1 = vmul.f32 %v3365_v63, %v3301_v20  ;;  %vm1316_vm0 = vcmp.ne.f32.partialorder %v3422_v62, 0.0 }
 0x3bd   :  { %v3458_v2 = vadd.f32 %v1308_v34, %v1307_v27  ;;  %v3463_v58 = vsub.f32 %v1310_v13, %v1311_v55  ;;  %v1317_v45 = vsel %vm1316_vm0, %v3422_v62, 1.0  ;;  %v1196_v24 = vadd.f32 %v1195_v49, %v3352_v12 }
 0x3be   :  { %v3468_v4 = vadd.f32 %v1314_v1, %v1313_v8  ;;  %v1319_v21 = vadd.f32 %v1317_v45, %v1317_v45  ;;  %v1197_v5 = vmul.f32 %v3337_v46, %v3130_v10  ;;  %v1273_v25 = vsub.f32 %v1272_v7, %v1266_v48 }
 0x3bf   :  { %v1274_v20 = vmul.f32 %v3397_v36, %v3313_v43  ;;  %v1267_v52 = vsub.f32 %v3186_v53, %v3313_v43  ;;  %v1269_v27 = vsub.f32 %v3402_v38, %v3397_v36 }
 0x3c0   :  { %2119 = vrcp.f32 %v1319_v21  ;;  %v3475_v63 = vadd.f32 %v1197_v5, %v1196_v24 }
 0x3c1   :  { %v3477_v14 = vadd.f32 %v1274_v20, %v1273_v25  ;;  %v1268_v34 = vmul.f32 %v1267_v52, %v3395_v44  ;;  %v1270_v13 = vmul.f32 %v1269_v27, %v3253_v50 }
 0x3c3   :  { %v1318_v29 = vsub.f32 %v3475_v63, %v3477_v14  ;;  %v1271_v8 = vadd.f32 %v1270_v13, %v1268_v34 }
 0x3ca   :  { %v2120_v26 = vpop.eup %2119 }
 0x3cb   :  { %v1321_v57 = vmul.f32 %v2120_v26, %v1318_v29 }
 0x3cd   :  { %v1324_v33 = vand.u32 2147483647, %v1321_v57  ;;  %vm1322_vm3 = vcmp.ge.f32.partialorder %v1321_v57, 0.0 }
 0x3ce   :  { %v1323_v16 = vsel %vm1322_vm3, 1.0, %v2185_v32 }
 0x3cf   :  { %v1325_v61 = vmin.f32 %v1324_v33, 1e+18 }
 0x3d1   :  { %v1326_v12 = vmul.f32 %v1325_v61, %v1325_v61 }
 0x3d3   :  { %v1327_v11 = vadd.f32 1.0, %v1326_v12 }
 0x3d5   :  { %2121 = vrsqrt.f32 %v1327_v11  ;;  %vm1330_vm1 = vcmp.eq.f32.partialorder %v1327_v11, inf  ;;  %v1333_v46 = vand.u32 2147483648, %v1327_v11  ;;  %vm1332_vm2 = vcmp.eq.f32.partialorder %v1327_v11, 0.0 }
 0x3df   :  { %v2122_v10 = vpop.eup %2121 }
 0x3e0   :  { %v1329_v48 = vmul.f32 %v2122_v10, %v1327_v11 }
 0x3e2   :  { %v1331_v49 = vsel %vm1330_vm1, %v1327_v11, %v1329_v48 }
 0x3e3   :  { %v1334_v35 = vsel %vm1332_vm2, %v1333_v46, %v1331_v49 }
 0x3e4   :  { %v1335_v39 = vadd.f32 %v1334_v35, %v1325_v61 }
 0x3e6   :  { %2123 = vrcp.f32 %v1335_v39 }
 0x3f0   :  { %v2124_v7 = vpop.eup %2123 }
 0x3f1   :  { %v1337_v3 = vmul.f32 %v2124_v7, %v1323_v16 }
 0x3f3   :  { %v1338_v37 = vsel %vm1316_vm0, %v1337_v3, 0.0 }
 0x3f4   :  { %v1339_v31 = vmul.f32 %v1338_v37, %v1338_v37 }
 0x3f6   :  { %v1340_v40 = vadd.f32 1.0, %v1339_v31 }
 0x3f8   :  { %2125 = vrsqrt.f32 %v1340_v40 }
 0x402   :  { %v2126_v55 = vpop.eup %2125 }
 0x403   :  { %v1342_v1 = vmul.f32 %v2126_v55, %v1338_v37  ;;  %v1365_v45 = vmul.f32 %v2126_v55, %v3360_v56  ;;  %v1361_v21 = vmul.f32 %v2126_v55, %v3408_v9  ;;  %v1367_v24 = vmul.f32 %v2126_v55, %v1271_v8 }
 0x404   :  { %v1373_v5 = vmul.f32 %v2126_v55, %v3426_v42  ;;  %v1377_v25 = vmul.f32 %v2126_v55, %v3367_v28  ;;  %v1371_v43 = vmul.f32 %v2126_v55, %v3424_v60  ;;  %v3517_v10 = vmul.f32 %v2126_v55, %v2126_v55 }
 0x405   :  { %v3494_v53 = vmul.f32 %v2126_v55, %v1342_v1  ;;  %v1362_v44 = vmul.f32 %v1342_v1, %v3360_v56  ;;  %v1364_v50 = vmul.f32 %v1342_v1, %v3408_v9  ;;  %v1368_v36 = vmul.f32 %v1342_v1, %v3424_v60 }
 0x406   :  { %v1370_v38 = vmul.f32 %v1342_v1, %v1271_v8  ;;  %v3506_v57 = vmul.f32 %v1342_v1, %v1342_v1  ;;  %v1374_v56 = vmul.f32 %v1342_v1, %v3367_v28  ;;  %v1376_v9 = vmul.f32 %v1342_v1, %v3426_v42 }
 0x407   :  { %v3500_v20 = vsub.f32 %v1361_v21, %v1362_v44  ;;  %v3502_v29 = vadd.f32 %v1365_v45, %v1364_v50  ;;  %v3504_v26 = vsub.f32 %v1367_v24, %v1368_v36  ;;  %v1346_v33 = vmul.f32 %v3494_v53, %v3422_v62 }
 0x408   :  { %v3510_v61 = vadd.f32 %v1371_v43, %v1370_v38  ;;  %v1379_v60 = vmul.f32 %v2126_v55, %v3445_v22  ;;  %v1380_v12 = vmul.f32 %v1342_v1, %v3377_v54  ;;  %v1382_v11 = vmul.f32 %v1342_v1, %v3445_v22 }
 0x409   :  { %v3519_v46 = vsub.f32 %v1373_v5, %v1374_v56  ;;  %v3521_v48 = vadd.f32 %v1377_v25, %v1376_v9  ;;  %v1383_v35 = vmul.f32 %v2126_v55, %v3377_v54  ;;  %v1385_v28 = vmul.f32 %v2126_v55, %v3454_v17 }
 0x40a   :  { %v3523_v49 = vsub.f32 %v1379_v60, %v1380_v12  ;;  %v1347_v39 = vadd.f32 %v1346_v33, %v1346_v33  ;;  %v1357_v42 = vmul.f32 %v3506_v57, %v3477_v14  ;;  %v1386_v16 = vmul.f32 %v1342_v1, %v3387_v23 }
 0x40b   :  { %v1388_v22 = vmul.f32 %v1342_v1, %v3454_v17  ;;  %v3531_v7 = vadd.f32 %v1383_v35, %v1382_v11  ;;  %v1389_v3 = vmul.f32 %v2126_v55, %v3387_v23  ;;  %v1391_v37 = vmul.f32 %v2126_v55, %v3463_v58 }
 0x40c   :  { %v1392_v31 = vmul.f32 %v1342_v1, %v3392_v47  ;;  %v3536_v40 = vsub.f32 %v1385_v28, %v1386_v16  ;;  %v1394_v54 = vmul.f32 %v1342_v1, %v3463_v58  ;;  %v1395_v52 = vmul.f32 %v2126_v55, %v3392_v47 }
 0x40d   :  { %vm1397_vm4 = vcmp.ne.f32.partialorder %v3510_v61, 0.0  ;;  %v1353_v27 = vmul.f32 %v3517_v10, %v3477_v14  ;;  %v3543_v17 = vadd.f32 %v1389_v3, %v1388_v22  ;;  %vm1478_vm5 = vcmp.ne.f32.partialorder %v3500_v20, 0.0 }
 0x40e   :  { %v3545_v34 = vsub.f32 %v1391_v37, %v1392_v31  ;;  %v1398_v23 = vsel %vm1397_vm4, %v3510_v61, 1.0  ;;  %v3550_v13 = vadd.f32 %v1395_v52, %v1394_v54  ;;  %v1358_v58 = vadd.f32 %v1357_v42, %v1347_v39 }
 0x40f   :  { %v1400_v8 = vadd.f32 %v1398_v23, %v1398_v23  ;;  %v1359_v47 = vmul.f32 %v3517_v10, %v3475_v63  ;;  %v1479_v55 = vsel %vm1478_vm5, %v3500_v20, 1.0  ;;  %v1354_v45 = vsub.f32 %v1353_v27, %v1347_v39 }
 0x410   :  { %v1481_v1 = vadd.f32 %v1479_v55, %v1479_v55  ;;  %v1355_v21 = vmul.f32 %v3506_v57, %v3475_v63 }
 0x411   :  { %2127 = vrcp.f32 %v1400_v8  ;;  %v3560_v24 = vadd.f32 %v1359_v47, %v1358_v58 }
 0x412   :  { %2129 = vrcp.f32 %v1481_v1  ;;  %v3562_v5 = vadd.f32 %v1355_v21, %v1354_v45 }
 0x413   :  { %v1399_v25 = vsub.f32 %v3560_v24, %v3434_v18 }
 0x414   :  { %v1480_v43 = vsub.f32 %v3562_v5, %v3373_v51 }
 0x41b   :  { %v2128_v44 = vpop.eup %2127 }
 0x41c   :  { %v1402_v50 = vmul.f32 %v2128_v44, %v1399_v25  ;;  %v2130_v36 = vpop.eup %2129 }
 0x41d   :  { %v1483_v33 = vmul.f32 %v2130_v36, %v1480_v43 }
 0x41e   :  { %v1405_v38 = vand.u32 2147483647, %v1402_v50  ;;  %vm1403_vm10 = vcmp.ge.f32.partialorder %v1402_v50, 0.0  ;;  %v1348_v50 = vsub.f32 %v3477_v14, %v3475_v63 }
 0x41f   :  { %v1486_v9 = vand.u32 2147483647, %v1483_v33  ;;  %v1404_v58 = vsel %vm1403_vm10, 1.0, %v2185_v32  ;;  %vm1484_vm11 = vcmp.ge.f32.partialorder %v1483_v33, 0.0 }
 0x420   :  { %v1406_v56 = vmin.f32 %v1405_v38, 1e+18  ;;  %v1485_v1 = vsel %vm1484_vm11, 1.0, %v2185_v32  ;;  %v1350_v38 = vsub.f32 %v3517_v10, %v3506_v57 }
 0x421   :  { %v1487_v12 = vmin.f32 %v1486_v9, 1e+18 }
 0x422   :  { %v1407_v60 = vmul.f32 %v1406_v56, %v1406_v56  ;;  %v1351_v9 = vmul.f32 %v1350_v38, %v3422_v62 }
 0x423   :  { %v1488_v35 = vmul.f32 %v1487_v12, %v1487_v12 }
 0x424   :  { %v1408_v11 = vadd.f32 1.0, %v1407_v60 }
 0x425   :  { %v1489_v28 = vadd.f32 1.0, %v1488_v35 }
 0x426   :  { %2131 = vrsqrt.f32 %v1408_v11  ;;  %vm1411_vm6 = vcmp.eq.f32.partialorder %v1408_v11, inf  ;;  %v1414_v42 = vand.u32 2147483648, %v1408_v11  ;;  %vm1413_vm7 = vcmp.eq.f32.partialorder %v1408_v11, 0.0 }
 0x427   :  { %2133 = vrsqrt.f32 %v1489_v28  ;;  %vm1492_vm8 = vcmp.eq.f32.partialorder %v1489_v28, inf  ;;  %v1495_v37 = vand.u32 2147483648, %v1489_v28  ;;  %vm1494_vm9 = vcmp.eq.f32.partialorder %v1489_v28, 0.0 }
 0x430   :  { %v2132_v39 = vpop.eup %2131 }
 0x431   :  { %v1410_v16 = vmul.f32 %v2132_v39, %v1408_v11  ;;  %v2134_v22 = vpop.eup %2133 }
 0x432   :  { %v1491_v54 = vmul.f32 %v2134_v22, %v1489_v28 }
 0x433   :  { %v1412_v3 = vsel %vm1411_vm6, %v1408_v11, %v1410_v16 }
 0x434   :  { %v1415_v31 = vsel %vm1413_vm7, %v1414_v42, %v1412_v3  ;;  %v1493_v27 = vsel %vm1492_vm8, %v1489_v28, %v1491_v54 }
 0x435   :  { %v1416_v52 = vadd.f32 %v1415_v31, %v1406_v56  ;;  %v1496_v23 = vsel %vm1494_vm9, %v1495_v37, %v1493_v27  ;;  %v1349_v56 = vmul.f32 %v1348_v50, %v3494_v53 }
 0x436   :  { %v1497_v8 = vadd.f32 %v1496_v23, %v1487_v12 }
 0x437   :  { %2135 = vrcp.f32 %v1416_v52  ;;  %v1352_v11 = vadd.f32 %v1351_v9, %v1349_v56 }
 0x438   :  { %2137 = vrcp.f32 %v1497_v8 }
 0x441   :  { %v2136_v47 = vpop.eup %2135 }
 0x442   :  { %v1418_v55 = vmul.f32 %v2136_v47, %v1404_v58  ;;  %v2138_v45 = vpop.eup %2137 }
 0x443   :  { %v1499_v43 = vmul.f32 %v2138_v45, %v1485_v1 }
 0x444   :  { %v1419_v21 = vsel %vm1397_vm4, %v1418_v55, 0.0 }
 0x445   :  { %v1420_v25 = vmul.f32 %v1419_v21, %v1419_v21  ;;  %v1500_v36 = vsel %vm1478_vm5, %v1499_v43, 0.0 }
 0x446   :  { %v1501_v33 = vmul.f32 %v1500_v36, %v1500_v36 }
 0x447   :  { %v1421_v44 = vadd.f32 1.0, %v1420_v25 }
 0x448   :  { %v1502_v60 = vadd.f32 1.0, %v1501_v33  ;;  %v1510_v33 = vsub.f32 %v3373_v51, %v3562_v5 }
 0x449   :  { %2139 = vrsqrt.f32 %v1421_v44 }
 0x44a   :  { %2141 = vrsqrt.f32 %v1502_v60 }
 0x453   :  { %v2140_v12 = vpop.eup %2139 }
 0x454   :  { %v1423_v35 = vmul.f32 %v2140_v12, %v1419_v21  ;;  %v1442_v28 = vmul.f32 %v2140_v12, %v3410_v15  ;;  %v1446_v39 = vmul.f32 %v2140_v12, %v3502_v29  ;;  %v1448_v42 = vmul.f32 %v2140_v12, %v3504_v26  ;;  %v3610_v25 = vpop.eup %2141 }
 0x455   :  { %v1452_v63 = vmul.f32 %v2140_v12, %v1352_v11  ;;  %v1454_v14 = vmul.f32 %v2140_v12, %v3438_v0  ;;  %v1458_v57 = vmul.f32 %v2140_v12, %v3521_v48  ;;  %v3592_v37 = vmul.f32 %v2140_v12, %v2140_v12 }
 0x456   :  { %v3585_v10 = vmul.f32 %v1423_v35, %v1423_v35  ;;  %v3587_v53 = vmul.f32 %v2140_v12, %v1423_v35  ;;  %v1443_v62 = vmul.f32 %v1423_v35, %v3502_v29  ;;  %v1445_v16 = vmul.f32 %v1423_v35, %v3410_v15 }
 0x457   :  { %v1449_v22 = vmul.f32 %v1423_v35, %v1352_v11  ;;  %v1451_v3 = vmul.f32 %v1423_v35, %v3504_v26  ;;  %v1440_v29 = vmul.f32 %v3592_v37, %v3560_v24  ;;  %v1455_v58 = vmul.f32 %v1423_v35, %v3521_v48 }
 0x458   :  { %v1427_v31 = vmul.f32 %v3587_v53, %v3510_v61  ;;  %v1438_v54 = vmul.f32 %v3585_v10, %v3434_v18  ;;  %v1444_v52 = vsub.f32 %v1442_v28, %v1443_v62  ;;  %v1447_v27 = vadd.f32 %v1446_v39, %v1445_v16 }
 0x459   :  { %v1450_v23 = vsub.f32 %v1448_v42, %v1449_v22  ;;  %v1453_v15 = vadd.f32 %v1452_v63, %v1451_v3  ;;  %v1457_v26 = vmul.f32 %v1423_v35, %v3438_v0  ;;  %v1460_v47 = vmul.f32 %v2140_v12, %v3452_v6 }
 0x45a   :  { %v3598_v8 = vadd.f32 %v1427_v31, %v1427_v31  ;;  %v1461_v55 = vmul.f32 %v1423_v35, %v3531_v7  ;;  %v1463_v1 = vmul.f32 %v1423_v35, %v3452_v6  ;;  %v3608_v21 = vsub.f32 %v1454_v14, %v1455_v58 }
 0x45b   :  { %v3612_v43 = vadd.f32 %v1458_v57, %v1457_v26  ;;  %v1464_v48 = vmul.f32 %v2140_v12, %v3531_v7  ;;  %v1466_v0 = vmul.f32 %v2140_v12, %v3458_v2  ;;  %v1467_v38 = vmul.f32 %v1423_v35, %v3543_v17 }
 0x45c   :  { %v1439_v45 = vadd.f32 %v1438_v54, %v3598_v8  ;;  %v3614_v44 = vsub.f32 %v1460_v47, %v1461_v55  ;;  %v1469_v6 = vmul.f32 %v1423_v35, %v3458_v2  ;;  %v1470_v9 = vmul.f32 %v2140_v12, %v3543_v17 }
 0x45d   :  { %v3624_v56 = vadd.f32 %v1464_v48, %v1463_v1  ;;  %v1472_v60 = vmul.f32 %v2140_v12, %v3468_v4  ;;  %v1473_v11 = vmul.f32 %v1423_v35, %v3550_v13  ;;  %v3629_v7 = vsub.f32 %v1466_v0, %v1467_v38 }
 0x45e   :  { %v3618_v50 = vadd.f32 %v1440_v29, %v1439_v45  ;;  %v1475_v28 = vmul.f32 %v1423_v35, %v3468_v4  ;;  %v1476_v39 = vmul.f32 %v2140_v12, %v3550_v13  ;;  %v1504_v42 = vmul.f32 %v3610_v25, %v1500_v36 }
 0x45f   :  { %v3634_v2 = vadd.f32 %v1470_v9, %v1469_v6  ;;  %v3636_v63 = vsub.f32 %v1472_v60, %v1473_v11  ;;  %v1505_v14 = vmul.f32 %v3610_v25, %v3610_v25  ;;  %v1523_v17 = vmul.f32 %v3610_v25, %v1444_v52 }
 0x460   :  { %v3641_v57 = vadd.f32 %v1476_v39, %v1475_v28  ;;  %v1506_v62 = vmul.f32 %v1504_v42, %v1504_v42  ;;  %v1507_v16 = vmul.f32 %v3610_v25, %v1504_v42  ;;  %v1524_v22 = vmul.f32 %v1504_v42, %v1450_v23 }
 0x461   :  { %v1526_v4 = vmul.f32 %v1504_v42, %v1444_v52  ;;  %v1527_v13 = vmul.f32 %v3610_v25, %v1450_v23  ;;  %v1521_v3 = vmul.f32 %v1505_v14, %v3562_v5  ;;  %v1529_v58 = vmul.f32 %v3610_v25, %v1447_v27 }
 0x462   :  { %v1508_v36 = vmul.f32 %v1507_v16, %v3500_v20  ;;  %v1511_v12 = vmul.f32 %v1510_v33, %v1507_v16  ;;  %v1512_v35 = vsub.f32 %v1505_v14, %v1506_v62  ;;  %v1519_v31 = vmul.f32 %v1506_v62, %v3373_v51 }
 0x463   :  { %v3648_v54 = vsub.f32 %v1523_v17, %v1524_v22  ;;  %v3650_v29 = vadd.f32 %v1527_v13, %v1526_v4  ;;  %v1530_v52 = vmul.f32 %v1504_v42, %v1453_v15  ;;  %v1532_v55 = vmul.f32 %v1504_v42, %v1447_v27 }
 0x464   :  { %v1509_v26 = vadd.f32 %v1508_v36, %v1508_v36  ;;  %v1513_v47 = vmul.f32 %v1512_v35, %v3500_v20  ;;  %v1533_v23 = vmul.f32 %v3610_v25, %v1453_v15  ;;  %v1535_v1 = vmul.f32 %v3610_v25, %v3363_v30 }
 0x465   :  { %v1536_v45 = vmul.f32 %v1504_v42, %v3519_v46  ;;  %v1538_v48 = vmul.f32 %v1504_v42, %v3363_v30  ;;  %v1434_v0 = vmul.f32 %v3592_v37, %v3434_v18  ;;  %v3663_v33 = vsub.f32 %v1529_v58, %v1530_v52 }
 0x466   :  { %v3661_v38 = vadd.f32 %v1513_v47, %v1511_v12  ;;  %v1520_v6 = vadd.f32 %v1519_v31, %v1509_v26  ;;  %v3665_v20 = vadd.f32 %v1533_v23, %v1532_v55  ;;  %v1539_v15 = vmul.f32 %v3610_v25, %v3519_v46 }
 0x467   :  { %v3667_v27 = vsub.f32 %v1535_v1, %v1536_v45  ;;  %v1541_v9 = vmul.f32 %v3610_v25, %v3369_v59  ;;  %v1515_v30 = vmul.f32 %v1505_v14, %v3373_v51  ;;  %v1542_v11 = vmul.f32 %v1504_v42, %v3523_v49 }
 0x468   :  { %v3674_v60 = vadd.f32 %v1521_v3, %v1520_v6  ;;  %v1544_v28 = vmul.f32 %v1504_v42, %v3369_v59  ;;  %v3678_v39 = vadd.f32 %v1539_v15, %v1538_v48  ;;  %v1545_v17 = vmul.f32 %v3610_v25, %v3523_v49 }
 0x469   :  { %v1547_v16 = vmul.f32 %v3610_v25, %v3382_v19  ;;  %v1548_v46 = vmul.f32 %v1504_v42, %v3536_v40  ;;  %v3685_v22 = vsub.f32 %v1541_v9, %v1542_v11  ;;  %v1550_v51 = vmul.f32 %v1504_v42, %v3382_v19 }
 0x46a   :  { %v1551_v14 = vmul.f32 %v3610_v25, %v3536_v40  ;;  %v1553_v59 = vmul.f32 %v3610_v25, %v3389_v41  ;;  %v3692_v4 = vadd.f32 %v1545_v17, %v1544_v28  ;;  %v1554_v49 = vmul.f32 %v1504_v42, %v3545_v34 }
 0x46b   :  { %v3694_v13 = vsub.f32 %v1547_v16, %v1548_v46  ;;  %v1556_v36 = vmul.f32 %v1504_v42, %v3389_v41  ;;  %v1557_v35 = vmul.f32 %v3610_v25, %v3545_v34  ;;  %vm1559_vm12 = vcmp.ne.f32.partialorder %v3648_v54, 0.0 }
 0x46c   :  { %v3698_v12 = vadd.f32 %v1551_v14, %v1550_v51  ;;  %v3703_v19 = vsub.f32 %v1553_v59, %v1554_v49  ;;  %v1560_v40 = vsel %vm1559_vm12, %v3648_v54, 1.0  ;;  %v1435_v58 = vsub.f32 %v1434_v0, %v3598_v8 }
 0x46d   :  { %v3708_v3 = vadd.f32 %v1557_v35, %v1556_v36  ;;  %v1562_v31 = vadd.f32 %v1560_v40, %v1560_v40  ;;  %v1436_v41 = vmul.f32 %v3585_v10, %v3560_v24  ;;  %v1516_v42 = vsub.f32 %v1515_v30, %v1509_v26 }
 0x46e   :  { %v1517_v47 = vmul.f32 %v1506_v62, %v3562_v5  ;;  %v1429_v46 = vsub.f32 %v3434_v18, %v3560_v24  ;;  %v1431_v51 = vsub.f32 %v3592_v37, %v3585_v10 }
 0x46f   :  { %2143 = vrcp.f32 %v1562_v31  ;;  %v3714_v34 = vadd.f32 %v1436_v41, %v1435_v58 }
 0x470   :  { %v3716_v25 = vadd.f32 %v1517_v47, %v1516_v42  ;;  %v1430_v14 = vmul.f32 %v1429_v46, %v3587_v53  ;;  %v1432_v59 = vmul.f32 %v1431_v51, %v3510_v61 }
 0x472   :  { %v1561_v52 = vsub.f32 %v3714_v34, %v3716_v25  ;;  %v1433_v36 = vadd.f32 %v1432_v59, %v1430_v14 }
 0x479   :  { %v2144_v55 = vpop.eup %2143 }
 0x47a   :  { %v1564_v23 = vmul.f32 %v2144_v55, %v1561_v52 }
 0x47c   :  { %v1567_v1 = vand.u32 2147483647, %v1564_v23  ;;  %vm1565_vm15 = vcmp.ge.f32.partialorder %v1564_v23, 0.0 }
 0x47d   :  { %v1566_v9 = vsel %vm1565_vm15, 1.0, %v2185_v32 }
 0x47e   :  { %v1568_v45 = vmin.f32 %v1567_v1, 1e+18 }
 0x480   :  { %v1569_v48 = vmul.f32 %v1568_v45, %v1568_v45 }
 0x482   :  { %v1570_v8 = vadd.f32 1.0, %v1569_v48 }
 0x484   :  { %2145 = vrsqrt.f32 %v1570_v8  ;;  %vm1573_vm13 = vcmp.eq.f32.partialorder %v1570_v8, inf  ;;  %v1576_v26 = vand.u32 2147483648, %v1570_v8  ;;  %vm1575_vm14 = vcmp.eq.f32.partialorder %v1570_v8, 0.0 }
 0x48e   :  { %v2146_v0 = vpop.eup %2145 }
 0x48f   :  { %v1572_v6 = vmul.f32 %v2146_v0, %v1570_v8 }
 0x491   :  { %v1574_v5 = vsel %vm1573_vm13, %v1570_v8, %v1572_v6 }
 0x492   :  { %v1577_v62 = vsel %vm1575_vm14, %v1576_v26, %v1574_v5 }
 0x493   :  { %v1578_v15 = vadd.f32 %v1577_v62, %v1568_v45 }
 0x495   :  { %2147 = vrcp.f32 %v1578_v15 }
 0x49f   :  { %v2148_v30 = vpop.eup %2147 }
 0x4a0   :  { %v1580_v11 = vmul.f32 %v2148_v30, %v1566_v9 }
 0x4a2   :  { %v1581_v28 = vsel %vm1559_vm12, %v1580_v11, 0.0 }
 0x4a3   :  { %v1582_v17 = vmul.f32 %v1581_v28, %v1581_v28 }
 0x4a5   :  { %v1583_v16 = vadd.f32 1.0, %v1582_v17 }
 0x4a7   :  { %2149 = vrsqrt.f32 %v1583_v16 }
 0x4b1   :  { %v2150_v49 = vpop.eup %2149 }
 0x4b2   :  { %v1585_v35 = vmul.f32 %v2150_v49, %v1581_v28  ;;  %v3730_v40 = vmul.f32 %v2150_v49, %v3661_v38  ;;  %v1608_v31 = vmul.f32 %v2150_v49, %v3650_v29  ;;  %v1610_v58 = vmul.f32 %v2150_v49, %v3663_v33 }
 0x4b3   :  { %v1614_v41 = vmul.f32 %v2150_v49, %v1433_v36  ;;  %v1616_v18 = vmul.f32 %v2150_v49, %v3667_v27  ;;  %v1620_v24 = vmul.f32 %v2150_v49, %v3608_v21  ;;  %v3749_v23 = vmul.f32 %v2150_v49, %v2150_v49 }
 0x4b4   :  { %v3736_v10 = vmul.f32 %v2150_v49, %v1585_v35  ;;  %v3739_v53 = vmul.f32 %v1585_v35, %v3650_v29  ;;  %v1607_v61 = vmul.f32 %v1585_v35, %v3661_v38  ;;  %v1611_v37 = vmul.f32 %v1585_v35, %v1433_v36 }
 0x4b5   :  { %v1613_v42 = vmul.f32 %v1585_v35, %v3663_v33  ;;  %v1617_v29 = vmul.f32 %v1585_v35, %v3608_v21  ;;  %v1619_v38 = vmul.f32 %v1585_v35, %v3667_v27  ;;  %v1622_v33 = vmul.f32 %v2150_v49, %v3685_v22 }
 0x4b6   :  { %v1606_v47 = vsub.f32 %v3730_v40, %v3739_v53  ;;  %v3745_v52 = vadd.f32 %v1608_v31, %v1607_v61  ;;  %v3747_v55 = vsub.f32 %v1610_v58, %v1611_v37  ;;  %v1589_v1 = vmul.f32 %v3736_v10, %v3648_v54 }
 0x4b7   :  { %v3753_v45 = vadd.f32 %v1614_v41, %v1613_v42  ;;  %v1623_v48 = vmul.f32 %v1585_v35, %v3614_v44  ;;  %v1625_v8 = vmul.f32 %v1585_v35, %v3685_v22  ;;  %v3760_v0 = vmul.f32 %v1585_v35, %v1585_v35 }
 0x4b8   :  { %v3762_v26 = vsub.f32 %v1616_v18, %v1617_v29  ;;  %v3764_v6 = vadd.f32 %v1620_v24, %v1619_v38  ;;  %v1626_v62 = vmul.f32 %v2150_v49, %v3614_v44  ;;  %v1628_v21 = vmul.f32 %v2150_v49, %v3694_v13 }
 0x4b9   :  { %v3766_v5 = vsub.f32 %v1622_v33, %v1623_v48  ;;  %v1590_v15 = vadd.f32 %v1589_v1, %v1589_v1  ;;  %v1596_v27 = vmul.f32 %v3749_v23, %v3716_v25  ;;  %v1629_v9 = vmul.f32 %v1585_v35, %v3629_v7 }
 0x4ba   :  { %v1631_v22 = vmul.f32 %v1585_v35, %v3694_v13  ;;  %v3774_v30 = vadd.f32 %v1626_v62, %v1625_v8  ;;  %v1632_v11 = vmul.f32 %v2150_v49, %v3629_v7  ;;  %v1634_v28 = vmul.f32 %v2150_v49, %v3703_v19 }
 0x4bb   :  { %v1635_v17 = vmul.f32 %v1585_v35, %v3636_v63  ;;  %v3779_v16 = vsub.f32 %v1628_v21, %v1629_v9  ;;  %v1637_v44 = vmul.f32 %v1585_v35, %v3703_v19  ;;  %v1638_v46 = vmul.f32 %v2150_v49, %v3636_v63 }
 0x4bc   :  { %vm1640_vm0 = vcmp.ne.f32.partialorder %v3747_v55, 0.0  ;;  %v1600_v51 = vmul.f32 %v3760_v0, %v3716_v25  ;;  %v3786_v13 = vadd.f32 %v1632_v11, %v1631_v22  ;;  %vm1710_vm1 = vcmp.ne.f32.partialorder %v3745_v52, 0.0 }
 0x4bd   :  { %v3788_v14 = vsub.f32 %v1634_v28, %v1635_v17  ;;  %v1641_v7 = vsel %vm1640_vm0, %v3747_v55, 1.0  ;;  %v3793_v59 = vadd.f32 %v1638_v46, %v1637_v44  ;;  %v1597_v19 = vsub.f32 %v1596_v27, %v1590_v15 }
 0x4be   :  { %v1643_v36 = vadd.f32 %v1641_v7, %v1641_v7  ;;  %v1598_v63 = vmul.f32 %v3760_v0, %v3714_v34  ;;  %v1711_v49 = vsel %vm1710_vm1, %v3745_v52, 1.0  ;;  %v1601_v31 = vadd.f32 %v1600_v51, %v1590_v15 }
 0x4bf   :  { %v1713_v35 = vadd.f32 %v1711_v49, %v1711_v49  ;;  %v1602_v58 = vmul.f32 %v3749_v23, %v3714_v34 }
 0x4c0   :  { %2151 = vrcp.f32 %v1643_v36  ;;  %v3803_v41 = vadd.f32 %v1598_v63, %v1597_v19 }
 0x4c1   :  { %2153 = vrcp.f32 %v1713_v35  ;;  %v3805_v18 = vadd.f32 %v1602_v58, %v1601_v31 }
 0x4c2   :  { %v1642_v24 = vsub.f32 %v3618_v50, %v3803_v41 }
 0x4c3   :  { %v1712_v61 = vsub.f32 %v3805_v18, %v3674_v60 }
 0x4ca   :  { %v2152_v37 = vpop.eup %2151 }
 0x4cb   :  { %v1645_v42 = vmul.f32 %v2152_v37, %v1642_v24  ;;  %v2154_v1 = vpop.eup %2153 }
 0x4cc   :  { %v1715_v38 = vmul.f32 %v2154_v1, %v1712_v61 }
 0x4cd   :  { %v1648_v29 = vand.u32 2147483647, %v1645_v42  ;;  %vm1646_vm6 = vcmp.ge.f32.partialorder %v1645_v42, 0.0  ;;  %v1591_v42 = vsub.f32 %v3716_v25, %v3714_v34 }
 0x4ce   :  { %v1718_v48 = vand.u32 2147483647, %v1715_v38  ;;  %v1647_v49 = vsel %vm1646_vm6, 1.0, %v2185_v32  ;;  %vm1716_vm7 = vcmp.ge.f32.partialorder %v1715_v38, 0.0  ;;  %v1593_v38 = vsub.f32 %v3749_v23, %v3760_v0 }
 0x4cf   :  { %v1649_v33 = vmin.f32 %v1648_v29, 1e+18  ;;  %v1717_v58 = vsel %vm1716_vm7, 1.0, %v2185_v32 }
 0x4d0   :  { %v1719_v62 = vmin.f32 %v1718_v48, 1e+18 }
 0x4d1   :  { %v1650_v8 = vmul.f32 %v1649_v33, %v1649_v33 }
 0x4d2   :  { %v1720_v15 = vmul.f32 %v1719_v62, %v1719_v62 }
 0x4d3   :  { %v1651_v21 = vadd.f32 1.0, %v1650_v8 }
 0x4d4   :  { %v1721_v27 = vadd.f32 1.0, %v1720_v15 }
 0x4d5   :  { %2155 = vrsqrt.f32 %v1651_v21  ;;  %vm1654_vm2 = vcmp.eq.f32.partialorder %v1651_v21, inf  ;;  %v1657_v22 = vand.u32 2147483648, %v1651_v21  ;;  %vm1656_vm3 = vcmp.eq.f32.partialorder %v1651_v21, 0.0 }
 0x4d6   :  { %2157 = vrsqrt.f32 %v1721_v27  ;;  %vm1724_vm4 = vcmp.eq.f32.partialorder %v1721_v27, inf  ;;  %v1727_v44 = vand.u32 2147483648, %v1721_v27  ;;  %vm1726_vm5 = vcmp.eq.f32.partialorder %v1721_v27, 0.0 }
 0x4df   :  { %v2156_v9 = vpop.eup %2155 }
 0x4e0   :  { %v1653_v11 = vmul.f32 %v2156_v9, %v1651_v21  ;;  %v2158_v28 = vpop.eup %2157 }
 0x4e1   :  { %v1723_v51 = vmul.f32 %v2158_v28, %v1721_v27 }
 0x4e2   :  { %v1655_v17 = vsel %vm1654_vm2, %v1651_v21, %v1653_v11  ;;  %v1594_v21 = vmul.f32 %v1593_v38, %v3648_v54 }
 0x4e3   :  { %v1658_v46 = vsel %vm1656_vm3, %v1657_v22, %v1655_v17  ;;  %v1725_v36 = vsel %vm1724_vm4, %v1721_v27, %v1723_v51 }
 0x4e4   :  { %v1659_v7 = vadd.f32 %v1658_v46, %v1649_v33  ;;  %v1728_v19 = vsel %vm1726_vm5, %v1727_v44, %v1725_v36 }
 0x4e5   :  { %v1729_v63 = vadd.f32 %v1728_v19, %v1719_v62  ;;  %v1592_v62 = vmul.f32 %v1591_v42, %v3736_v10 }
 0x4e6   :  { %2159 = vrcp.f32 %v1659_v7 }
 0x4e7   :  { %2161 = vrcp.f32 %v1729_v63  ;;  %v1595_v27 = vadd.f32 %v1594_v21, %v1592_v62 }
 0x4f0   :  { %v2160_v35 = vpop.eup %2159 }
 0x4f1   :  { %v1661_v31 = vmul.f32 %v2160_v35, %v1647_v49  ;;  %v2162_v24 = vpop.eup %2161 }
 0x4f2   :  { %v1731_v1 = vmul.f32 %v2162_v24, %v1717_v58 }
 0x4f3   :  { %v1662_v61 = vsel %vm1640_vm0, %v1661_v31, 0.0 }
 0x4f4   :  { %v1663_v37 = vmul.f32 %v1662_v61, %v1662_v61  ;;  %v1732_v33 = vsel %vm1710_vm1, %v1731_v1, 0.0 }
 0x4f5   :  { %v1733_v48 = vmul.f32 %v1732_v33, %v1732_v33 }
 0x4f6   :  { %v1664_v29 = vadd.f32 1.0, %v1663_v37 }
 0x4f7   :  { %v1734_v8 = vadd.f32 1.0, %v1733_v48 }
 0x4f8   :  { %2163 = vrsqrt.f32 %v1664_v29 }
 0x4f9   :  { %2165 = vrsqrt.f32 %v1734_v8 }
 0x502   :  { %v2164_v15 = vpop.eup %2163 }
 0x503   :  { %v1666_v9 = vmul.f32 %v2164_v15, %v1662_v61  ;;  %v1681_v22 = vmul.f32 %v2164_v15, %v3665_v20  ;;  %v1684_v11 = vmul.f32 %v2164_v15, %v3753_v45  ;;  %v3826_v28 = vmul.f32 %v2164_v15, %v3762_v26  ;;  %v2166_v49 = vpop.eup %2165 }
 0x504   :  { %v1690_v34 = vmul.f32 %v2164_v15, %v3612_v43  ;;  %v3830_v25 = vmul.f32 %v2164_v15, %v3766_v5  ;;  %v1696_v10 = vmul.f32 %v2164_v15, %v3624_v56  ;;  %v3833_v23 = vmul.f32 %v2164_v15, %v2164_v15 }
 0x505   :  { %v1668_v54 = vmul.f32 %v1666_v9, %v1666_v9  ;;  %v1669_v0 = vmul.f32 %v2164_v15, %v1666_v9  ;;  %v1680_v20 = vmul.f32 %v1666_v9, %v1606_v47  ;;  %v1683_v17 = vmul.f32 %v1666_v9, %v1595_v27 }
 0x506   :  { %v3839_v45 = vmul.f32 %v1666_v9, %v3612_v43  ;;  %v1689_v44 = vmul.f32 %v1666_v9, %v3762_v26  ;;  %v1672_v51 = vmul.f32 %v3833_v23, %v3803_v41  ;;  %v3847_v36 = vmul.f32 %v1666_v9, %v3624_v56 }
 0x507   :  { %v1670_v46 = vmul.f32 %v1669_v0, %v3747_v55  ;;  %v1674_v7 = vmul.f32 %v1668_v54, %v3618_v50  ;;  %v1682_v19 = vadd.f32 %v1681_v22, %v1680_v20  ;;  %v1685_v63 = vadd.f32 %v1684_v11, %v1683_v17 }
 0x508   :  { %v1688_v40 = vsub.f32 %v3826_v28, %v3839_v45  ;;  %v3851_v53 = vadd.f32 %v1690_v34, %v1689_v44  ;;  %v1694_v47 = vsub.f32 %v3830_v25, %v3847_v36  ;;  %v1695_v55 = vmul.f32 %v1666_v9, %v3766_v5 }
 0x509   :  { %v3853_v43 = vadd.f32 %v1670_v46, %v1670_v46  ;;  %v3859_v26 = vmul.f32 %v2164_v15, %v3779_v16  ;;  %v3862_v56 = vmul.f32 %v1666_v9, %v3634_v2  ;;  %v1701_v35 = vmul.f32 %v1666_v9, %v3779_v16 }
 0x50a   :  { %v1702_v31 = vmul.f32 %v2164_v15, %v3634_v2  ;;  %v3867_v58 = vmul.f32 %v2164_v15, %v3788_v14  ;;  %v3870_v61 = vadd.f32 %v1696_v10, %v1695_v55  ;;  %v3873_v5 = vmul.f32 %v1666_v9, %v3641_v57 }
 0x50b   :  { %v1673_v24 = vsub.f32 %v1672_v51, %v3853_v43  ;;  %v1700_v37 = vsub.f32 %v3859_v26, %v3862_v56  ;;  %v1707_v29 = vmul.f32 %v1666_v9, %v3788_v14  ;;  %v1708_v16 = vmul.f32 %v2164_v15, %v3641_v57 }
 0x50c   :  { %v3877_v1 = vadd.f32 %v1702_v31, %v1701_v35  ;;  %v1706_v48 = vsub.f32 %v3867_v58, %v3873_v5  ;;  %v1736_v42 = vmul.f32 %v2166_v49, %v1732_v33  ;;  %v1755_v8 = vmul.f32 %v2166_v49, %v1682_v19 }
 0x50d   :  { %v3881_v2 = vadd.f32 %v1674_v7, %v1673_v24  ;;  %v3885_v38 = vadd.f32 %v1708_v16, %v1707_v29  ;;  %v1759_v62 = vmul.f32 %v2166_v49, %v1685_v63  ;;  %v1761_v14 = vmul.f32 %v2166_v49, %v3678_v39 }
 0x50e   :  { %v3887_v21 = vmul.f32 %v2166_v49, %v1736_v42  ;;  %v1756_v27 = vmul.f32 %v1736_v42, %v1685_v63  ;;  %v1758_v22 = vmul.f32 %v1736_v42, %v1682_v19  ;;  %v3889_v11 = vmul.f32 %v1736_v42, %v1736_v42 }
 0x50f   :  { %v1762_v57 = vmul.f32 %v1736_v42, %v3764_v6  ;;  %v3893_v15 = vmul.f32 %v2166_v49, %v2166_v49  ;;  %v1764_v44 = vmul.f32 %v1736_v42, %v3678_v39  ;;  %v1765_v46 = vmul.f32 %v2166_v49, %v3764_v6 }
 0x510   :  { %v1740_v9 = vmul.f32 %v3887_v21, %v3745_v52  ;;  %v1751_v33 = vmul.f32 %v3889_v11, %v3674_v60  ;;  %v3899_v34 = vsub.f32 %v1755_v8, %v1756_v27  ;;  %v3901_v10 = vadd.f32 %v1759_v62, %v1758_v22 }
 0x511   :  { %v3903_v0 = vsub.f32 %v1761_v14, %v1762_v57  ;;  %v1753_v17 = vmul.f32 %v3893_v15, %v3805_v18  ;;  %v1767_v51 = vmul.f32 %v2166_v49, %v3692_v4  ;;  %v1768_v7 = vmul.f32 %v1736_v42, %v3774_v30 }
 0x512   :  { %v1741_v20 = vadd.f32 %v1740_v9, %v1740_v9  ;;  %v1770_v19 = vmul.f32 %v1736_v42, %v3692_v4  ;;  %v1771_v63 = vmul.f32 %v2166_v49, %v3774_v30  ;;  %v1676_v55 = vmul.f32 %v1668_v54, %v3803_v41 }
 0x513   :  { %v3914_v31 = vadd.f32 %v1765_v46, %v1764_v44  ;;  %v3916_v24 = vsub.f32 %v1767_v51, %v1768_v7  ;;  %v1773_v39 = vmul.f32 %v2166_v49, %v3698_v12  ;;  %v1774_v6 = vmul.f32 %v1736_v42, %v3786_v13 }
 0x514   :  { %v1752_v35 = vadd.f32 %v1751_v33, %v1741_v20  ;;  %v3918_v29 = vadd.f32 %v1771_v63, %v1770_v19  ;;  %v1747_v16 = vmul.f32 %v3893_v15, %v3674_v60  ;;  %v1776_v4 = vmul.f32 %v1736_v42, %v3698_v12 }
 0x515   :  { %v1777_v30 = vmul.f32 %v2166_v49, %v3786_v13  ;;  %v3928_v41 = vsub.f32 %v1773_v39, %v1774_v6  ;;  %v1779_v54 = vmul.f32 %v2166_v49, %v3708_v3  ;;  %v1780_v62 = vmul.f32 %v1736_v42, %v3793_v59 }
 0x516   :  { %v3924_v8 = vadd.f32 %v1753_v17, %v1752_v35  ;;  %v1782_v27 = vmul.f32 %v1736_v42, %v3708_v3  ;;  %v1783_v14 = vmul.f32 %v2166_v49, %v3793_v59  ;;  %vm1785_vm8 = vcmp.ne.f32.partialorder %v3899_v34, 0.0 }
 0x517   :  { %v3933_v22 = vadd.f32 %v1777_v30, %v1776_v4  ;;  %v3937_v57 = vsub.f32 %v1779_v54, %v1780_v62  ;;  %v1786_v12 = vsel %vm1785_vm8, %v3899_v34, 1.0  ;;  %v1677_v33 = vadd.f32 %v1676_v55, %v3853_v43 }
 0x518   :  { %v3942_v13 = vadd.f32 %v1783_v14, %v1782_v27  ;;  %v1788_v9 = vadd.f32 %v1786_v12, %v1786_v12  ;;  %v1678_v3 = vmul.f32 %v3833_v23, %v3618_v50  ;;  %v1748_v42 = vsub.f32 %v1747_v16, %v1741_v20 }
 0x519   :  { %v1749_v59 = vmul.f32 %v3889_v11, %v3805_v18  ;;  %v1742_v27 = vsub.f32 %v3674_v60, %v3805_v18  ;;  %v1744_v14 = vsub.f32 %v3893_v15, %v3889_v11 }
 0x51a   :  { %2167 = vrcp.f32 %v1788_v9  ;;  %v3949_v49 = vadd.f32 %v1678_v3, %v1677_v33 }
 0x51b   :  { %v3951_v17 = vadd.f32 %v1749_v59, %v1748_v42  ;;  %v1743_v12 = vmul.f32 %v1742_v27, %v3887_v21  ;;  %v1745_v9 = vmul.f32 %v1744_v14, %v3745_v52 }
 0x51d   :  { %v1787_v44 = vsub.f32 %v3949_v49, %v3951_v17  ;;  %v1746_v3 = vadd.f32 %v1745_v9, %v1743_v12 }
 0x524   :  { %v2168_v46 = vpop.eup %2167 }
 0x525   :  { %v1790_v51 = vmul.f32 %v2168_v46, %v1787_v44 }
 0x527   :  { %v1793_v7 = vand.u32 2147483647, %v1790_v51  ;;  %vm1791_vm11 = vcmp.ge.f32.partialorder %v1790_v51, 0.0 }
 0x528   :  { %v1792_v6 = vsel %vm1791_vm11, 1.0, %v2185_v32 }
 0x529   :  { %v1794_v19 = vmin.f32 %v1793_v7, 1e+18 }
 0x52b   :  { %v1795_v43 = vmul.f32 %v1794_v19, %v1794_v19 }
 0x52d   :  { %v1796_v63 = vadd.f32 1.0, %v1795_v43 }
 0x52f   :  { %2169 = vrsqrt.f32 %v1796_v63  ;;  %vm1799_vm9 = vcmp.eq.f32.partialorder %v1796_v63, inf  ;;  %v1802_v23 = vand.u32 2147483648, %v1796_v63  ;;  %vm1801_vm10 = vcmp.eq.f32.partialorder %v1796_v63, 0.0 }
 0x539   :  { %v2170_v50 = vpop.eup %2169 }
 0x53a   :  { %v1798_v20 = vmul.f32 %v2170_v50, %v1796_v63 }
 0x53c   :  { %v1800_v55 = vsel %vm1799_vm9, %v1796_v63, %v1798_v20 }
 0x53d   :  { %v1803_v35 = vsel %vm1801_vm10, %v1802_v23, %v1800_v55 }
 0x53e   :  { %v1804_v39 = vadd.f32 %v1803_v35, %v1794_v19 }
 0x540   :  { %2171 = vrcp.f32 %v1804_v39 }
 0x54a   :  { %v2172_v16 = vpop.eup %2171 }
 0x54b   :  { %v1806_v4 = vmul.f32 %v2172_v16, %v1792_v6 }
 0x54d   :  { %v1807_v30 = vsel %vm1785_vm8, %v1806_v4, 0.0 }
 0x54e   :  { %v1808_v54 = vmul.f32 %v1807_v30, %v1807_v30 }
 0x550   :  { %v1809_v62 = vadd.f32 1.0, %v1808_v54 }
 0x552   :  { %2173 = vrsqrt.f32 %v1809_v62 }
 0x55c   :  { %v2174_v33 = vpop.eup %2173 }
 0x55d   :  { %v1811_v42 = vmul.f32 %v2174_v33, %v1807_v30  ;;  %v1826_v59 = vmul.f32 %v2174_v33, %v3901_v10  ;;  %v3966_v44 = vmul.f32 %v2174_v33, %v3903_v0  ;;  %v1832_v46 = vmul.f32 %v2174_v33, %v3851_v53 }
 0x55e   :  { %v3970_v51 = vmul.f32 %v2174_v33, %v3916_v24  ;;  %v1838_v60 = vmul.f32 %v2174_v33, %v3870_v61  ;;  %v3974_v18 = vmul.f32 %v2174_v33, %v3928_v41  ;;  %v1812_v21 = vmul.f32 %v2174_v33, %v2174_v33 }
 0x55f   :  { %v1813_v52 = vmul.f32 %v1811_v42, %v1811_v42  ;;  %v1814_v11 = vmul.f32 %v2174_v33, %v1811_v42  ;;  %v1825_v15 = vmul.f32 %v1811_v42, %v1746_v3  ;;  %v3977_v7 = vmul.f32 %v1811_v42, %v3851_v53 }
 0x560   :  { %v1831_v10 = vmul.f32 %v1811_v42, %v3903_v0  ;;  %v3981_v19 = vmul.f32 %v1811_v42, %v3870_v61  ;;  %v1817_v63 = vmul.f32 %v1812_v21, %v3951_v17  ;;  %v1837_v23 = vmul.f32 %v1811_v42, %v3916_v24 }
 0x561   :  { %v1815_v43 = vmul.f32 %v1814_v11, %v3899_v34  ;;  %v1819_v50 = vmul.f32 %v1813_v52, %v3949_v49  ;;  %v3987_v20 = vadd.f32 %v1826_v59, %v1825_v15  ;;  %v1830_v55 = vsub.f32 %v3966_v44, %v3977_v7 }
 0x562   :  { %v3991_v53 = vadd.f32 %v1832_v46, %v1831_v10  ;;  %v1836_v0 = vsub.f32 %v3970_v51, %v3981_v19  ;;  %v3995_v35 = vadd.f32 %v1838_v60, %v1837_v23  ;;  %v3998_v34 = vmul.f32 %v1811_v42, %v3877_v1 }
 0x563   :  { %v1816_v61 = vadd.f32 %v1815_v43, %v1815_v43  ;;  %v1843_v39 = vmul.f32 %v1811_v42, %v3928_v41  ;;  %v1844_v24 = vmul.f32 %v2174_v33, %v3877_v1  ;;  %v4003_v6 = vmul.f32 %v2174_v33, %v3937_v57 }
 0x564   :  { %v4006_v16 = vmul.f32 %v1811_v42, %v3885_v38  ;;  %v1849_v4 = vmul.f32 %v1811_v42, %v3937_v57  ;;  %v1821_v54 = vmul.f32 %v1813_v52, %v3951_v17  ;;  %v1842_v62 = vsub.f32 %v3974_v18, %v3998_v34 }
 0x565   :  { %v1818_v30 = vsub.f32 %v1817_v63, %v1816_v61  ;;  %v1850_v27 = vmul.f32 %v2174_v33, %v3885_v38  ;;  %v1845_v14 = vadd.f32 %v1844_v24, %v1843_v39  ;;  %vm1852_vm12 = vcmp.ne.f32.partialorder %v3987_v20, 0.0 }
 0x566   :  { %v1848_v1 = vsub.f32 %v4003_v6, %v4006_v16  ;;  %v1853_v57 = vsel %vm1852_vm12, %v3987_v20, 1.0  ;;  %v1822_v9 = vadd.f32 %v1821_v54, %v1816_v61  ;;  %v1823_v3 = vmul.f32 %v1812_v21, %v3949_v49 }
 0x567   :  { %v4016_v41 = vadd.f32 %v1819_v50, %v1818_v30  ;;  %v4018_v12 = vadd.f32 %v1850_v27, %v1849_v4  ;;  %v1855_v17 = vadd.f32 %v1853_v57, %v1853_v57 }
 0x568   :  { %v1824_v33 = vadd.f32 %v1823_v3, %v1822_v9 }
 0x569   :  { %v1916_v38 = vmin.f32 %v3881_v2, %v4016_v41  ;;  %2175 = vrcp.f32 %v1855_v17 }
 0x56a   :  { %v1854_v42 = vsub.f32 %v1824_v33, %v3924_v8 }
 0x573   :  { %v2176_v59 = vpop.eup %2175 }
 0x574   :  { %v1857_v46 = vmul.f32 %v2176_v59, %v1854_v42 }
 0x576   :  { %v1860_v60 = vand.u32 2147483647, %v1857_v46  ;;  %vm1858_vm15 = vcmp.ge.f32.partialorder %v1857_v46, 0.0 }
 0x577   :  { %v1859_v23 = vsel %vm1858_vm15, 1.0, %v2185_v32 }
 0x578   :  { %v1861_v52 = vmin.f32 %v1860_v60, 1e+18 }
 0x57a   :  { %v1862_v11 = vmul.f32 %v1861_v52, %v1861_v52 }
 0x57c   :  { %v1863_v15 = vadd.f32 1.0, %v1862_v11 }
 0x57e   :  { %2177 = vrsqrt.f32 %v1863_v15  ;;  %vm1866_vm13 = vcmp.eq.f32.partialorder %v1863_v15, inf  ;;  %v1869_v43 = vand.u32 2147483648, %v1863_v15  ;;  %vm1868_vm14 = vcmp.eq.f32.partialorder %v1863_v15, 0.0 }
 0x588   :  { %v2178_v10 = vpop.eup %2177 }
 0x589   :  { %v1865_v63 = vmul.f32 %v2178_v10, %v1863_v15 }
 0x58b   :  { %v1867_v49 = vsel %vm1866_vm13, %v1863_v15, %v1865_v63 }
 0x58c   :  { %v1870_v21 = vsel %vm1868_vm14, %v1869_v43, %v1867_v49 }
 0x58d   :  { %v1871_v50 = vadd.f32 %v1870_v21, %v1861_v52 }
 0x58f   :  { %2179 = vrcp.f32 %v1871_v50 }
 0x599   :  { %v2180_v61 = vpop.eup %2179 }
 0x59a   :  { %v1873_v39 = vmul.f32 %v2180_v61, %v1859_v23 }
 0x59c   :  { %v1874_v24 = vsel %vm1852_vm12, %v1873_v39, 0.0 }
 0x59d   :  { %v1875_v4 = vmul.f32 %v1874_v24, %v1874_v24 }
 0x59f   :  { %v1876_v30 = vadd.f32 1.0, %v1875_v4 }
 0x5a1   :  { %2181 = vrsqrt.f32 %v1876_v30 }
 0x5ab   :  { %v2182_v54 = vpop.eup %2181 }
 0x5ac   :  { %v1878_v27 = vmul.f32 %v2182_v54, %v1874_v24  ;;  %v1879_v57 = vmul.f32 %v2182_v54, %v2182_v54  ;;  %v1892_v17 = vmul.f32 %v2182_v54, %v3914_v31  ;;  %v1896_v9 = vmul.f32 %v2182_v54, %v3991_v53 }
 0x5ad   :  { %v1898_v3 = vmul.f32 %v2182_v54, %v3918_v29  ;;  %v1902_v42 = vmul.f32 %v2182_v54, %v3995_v35  ;;  %v1904_v32 = vmul.f32 %v2182_v54, %v3933_v22  ;;  %v1908_v59 = vmul.f32 %v2182_v54, %v1845_v14 }
 0x5ae   :  { %v1880_v46 = vmul.f32 %v1878_v27, %v1878_v27  ;;  %v1881_v60 = vmul.f32 %v2182_v54, %v1878_v27  ;;  %v1884_v52 = vmul.f32 %v1879_v57, %v3924_v8  ;;  %v1890_v11 = vmul.f32 %v1879_v57, %v1824_v33 }
 0x5af   :  { %v1893_v15 = vmul.f32 %v1878_v27, %v3991_v53  ;;  %v1895_v10 = vmul.f32 %v1878_v27, %v3914_v31  ;;  %v1899_v43 = vmul.f32 %v1878_v27, %v3995_v35  ;;  %v1901_v63 = vmul.f32 %v1878_v27, %v3918_v29 }
 0x5b0   :  { %v1882_v49 = vmul.f32 %v1881_v60, %v3987_v20  ;;  %v1886_v21 = vmul.f32 %v1880_v46, %v1824_v33  ;;  %v1888_v50 = vmul.f32 %v1880_v46, %v3924_v8  ;;  %v1905_v23 = vmul.f32 %v1878_v27, %v1845_v14 }
 0x5b1   :  { %v1894_v61 = vsub.f32 %v1892_v17, %v1893_v15  ;;  %v1897_v39 = vadd.f32 %v1896_v9, %v1895_v10  ;;  %v1900_v24 = vsub.f32 %v1898_v3, %v1899_v43  ;;  %v1903_v4 = vadd.f32 %v1902_v42, %v1901_v63 }
 0x5b2   :  { %v1883_v30 = vadd.f32 %v1882_v49, %v1882_v49  ;;  %v1906_v57 = vsub.f32 %v1904_v32, %v1905_v23  ;;  %v1907_v53 = vmul.f32 %v1878_v27, %v3933_v22  ;;  %v1910_v31 = vmul.f32 %v2182_v54, %v3942_v13 }
 0x5b3   :  { %v1911_v35 = vmul.f32 %v1878_v27, %v4018_v12  ;;  %v1913_v29 = vmul.f32 %v1878_v27, %v3942_v13  ;;  %v1914_v20 = vmul.f32 %v2182_v54, %v4018_v12 }
 0x5b4   :  { %v1885_v33 = vsub.f32 %v1884_v52, %v1883_v30  ;;  %v1889_v60 = vadd.f32 %v1888_v50, %v1883_v30  ;;  %v1909_v8 = vadd.f32 %v1908_v59, %v1907_v53 }
 0x5b5   :  { %v1912_v14 = vsub.f32 %v1910_v31, %v1911_v35  ;;  %v1915_v17 = vadd.f32 %v1914_v20, %v1913_v29 }
 0x5b6   :  { %v1887_v9 = vadd.f32 %v1886_v21, %v1885_v33  ;;  %v1891_v3 = vadd.f32 %v1890_v11, %v1889_v60 }
 0x5b8   :  { %v1917_v42 = vmin.f32 %v1887_v9, %v1891_v3 }
 0x5ba   :  { %v1918_v22 = vmin.f32 %v1916_v38, %v1917_v42 }
 0x5bc   :  { %vm1919_vm0 = vcmp.eq.f32.partialorder %v1887_v9, %v1918_v22  ;;  %vm1921_vm1 = vcmp.eq.f32.partialorder %v4016_v41, %v1918_v22  ;;  %vm1923_vm2 = vcmp.eq.f32.partialorder %v3881_v2, %v1918_v22 }
 0x5bd   :  { %v1920_v13 = vsel %vm1919_vm0, %v1894_v61, %v1897_v39  ;;  %v1925_v27 = vsel %vm1919_vm0, %v1900_v24, %v1903_v4  ;;  %v1928_v12 = vsel %vm1919_vm0, %v1906_v57, %v1909_v8  ;;  %v1931_v54 = vsel %vm1919_vm0, %v1912_v14, %v1915_v17 }
 0x5be   :  { %v1922_v32 = vsel %vm1921_vm1, %v1830_v55, %v1920_v13  ;;  %v1926_v59 = vsel %vm1921_vm1, %v1836_v0, %v1925_v27  ;;  %v1929_v38 = vsel %vm1921_vm1, %v1842_v62, %v1928_v12  ;;  %v1932_v2 = vsel %vm1921_vm1, %v1848_v1, %v1931_v54 }
 0x5bf   :  { %v1924_v41 = vsel %vm1923_vm2, %v1688_v40, %v1922_v32  ;;  %v1927_v44 = vsel %vm1923_vm2, %v1694_v47, %v1926_v59  ;;  %v1930_v51 = vsel %vm1923_vm2, %v1700_v37, %v1929_v38  ;;  %v1933_v18 = vsel %vm1923_vm2, %v1706_v48, %v1932_v2 }
 0x5c0   :  { %v1934_v7 = vmul.f32 %v1924_v41, %v1924_v41  ;;  %v1935_v19 = vmul.f32 %v1927_v44, %v1927_v44  ;;  %v1937_v55 = vmul.f32 %v1930_v51, %v1930_v51  ;;  %v1939_v34 = vmul.f32 %v1933_v18, %v1933_v18 }
 0x5c2   :  { %v1936_v0 = vadd.f32 %v1935_v19, %v1934_v7 }
 0x5c4   :  { %v1938_v6 = vadd.f32 %v1937_v55, %v1936_v0 }
 0x5c6   :  { %v1940_v28 = vadd.f32 %v1939_v34, %v1938_v6 }
 0x5c8   :  { %2183 = vrsqrt.f32 %v1940_v28 }
 0x5d2   :  { %v2184_v45 = vpop.eup %2183 }
 0x5d3   :  { %v1942_v40 = vmul.f32 %v2184_v45, %v1924_v41  ;;  %v1943_v25 = vmul.f32 %v2184_v45, %v1927_v44  ;;  %v1944_v36 = vmul.f32 %v2184_v45, %v1930_v51  ;;  %v1945_v47 = vmul.f32 %v2184_v45, %v1933_v18 }
 0x5d5   :  { %1978 = vst [vmem:[%s4089_s1 + $0x6] sm:$0x1] %v1942_v40  ;;  %1979 = vst [vmem:[%s4089_s1 + $0x7] sm:$0x1] %v1943_v25 }
 0x5d6   :  { %1980 = vst [vmem:[%s4089_s1 + $0x8] sm:$0x1] %v1944_v36  ;;  %1981 = vst [vmem:[%s4089_s1 + $0x9] sm:$0x1] %v1945_v47 }

</bundles_post_ra>
